<compile_context>
chip_gen: v7x
topology: tpu7x:2x2x1
jax: 0.10.0
libtpu: 0.0.40
codegen_flags: <defaults>
</compile_context>

<pallas_src>
import functools

import jax
import jax.numpy as jnp
from jax.experimental import pallas as pl
from jax.experimental.pallas import tpu as pltpu


CIN_PAD = 8                      # stem input channels padded 3 -> 8 (sublane-friendly K)
TARGET_ROWS = 256                # per-tile matmul M target (tile_h * W)
MAX_TILE_H = 8
VMEM_LIMIT = 32 * 1024 * 1024    # explicit scoped-VMEM budget, safe on v5e/v6e/v7x


def _pick_tile_h(h, w):
    """Row-tile height so the per-tile matmul M = tile_h * W stays small."""
    t = max(1, min(MAX_TILE_H, TARGET_ROWS // w, h))
    while h % t:
        t -= 1
    return t


# ----------------------------- in-kernel helpers ---------------------------- #

def _conv_tap_packed(x_ref, w_ref, row0, tile_h, out_w):
    """3x3 conv for one output row tile as ONE tap-packed MXU matmul.

    x_ref: (1, H+2, W+2, Cin)  VMEM-resident zero-padded image (bf16)
    w_ref: (9*Cin, Cout)       BN-scale-folded weights (bf16), tap-major layout
    Returns f32 accumulator of shape (tile_h*out_w, Cout).
    """
    cin = x_ref.shape[-1]
    band = x_ref[0, pl.ds(row0, tile_h + 2), :, :]            # (tile_h+2, W+2, Cin)
    taps = []
    for di in range(3):
        rows = band[di:di + tile_h]                           # (tile_h, W+2, Cin)
        for dj in range(3):
            taps.append(rows[:, dj:dj + out_w, :])            # (tile_h, out_w, Cin)
    patches = jnp.concatenate(taps, axis=-1)                  # (tile_h, out_w, 9*Cin)
    xs = patches.reshape(tile_h * out_w, 9 * cin)             # im2col, K = 9*Cin
    return jnp.dot(xs, w_ref[...], preferred_element_type=jnp.float32)


# ------------------------------- Pallas kernels ------------------------------ #

def _conv_bn_relu_pad_kernel(x_ref, w_ref, b_ref, o_ref, *, tile_h):
    """conv3x3 + folded-BN bias + ReLU, written into a pre-padded output image."""
    _, _, wp, _ = x_ref.shape
    out_w = wp - 2
    cout = o_ref.shape[-1]
    h = pl.program_id(1)

    @pl.when(h == 0)
    def _():
        # Zero the whole padded output once per image so the 1-px halo is exact
        # zeros for the next layer.  TODO(synk): zero only the border at 224^2.
        o_ref[...] = jnp.zeros_like(o_ref)

    row0 = pl.multiple_of(h * tile_h, tile_h)
    acc = _conv_tap_packed(x_ref, w_ref, row0, tile_h, out_w)
    y = jnp.maximum(acc + b_ref[...], 0.0)                    # f32 epilogue
    o_ref[0, pl.ds(row0 + 1, tile_h), 1:out_w + 1, :] = (
        y.reshape(tile_h, out_w, cout).astype(o_ref.dtype))


def _conv_res_gap_fc_kernel(x_ref, w_ref, b_ref, r_ref, wfc_ref, bfc_ref,
                            o_ref, gap_ref, *, tile_h, inv_hw):
    """conv3x3 + folded-BN bias + residual + ReLU with fused GAP + Linear(C,1).

    The final activation never leaves VMEM; only (N, 1) logits are emitted.
    """
    _, _, wp, _ = x_ref.shape
    out_w = wp - 2
    cout = b_ref.shape[-1]
    n = pl.program_id(0)
    h = pl.program_id(1)

    @pl.when((n == 0) & (h == 0))
    def _():
        o_ref[...] = jnp.zeros_like(o_ref)                    # logits block init

    @pl.when(h == 0)
    def _():
        gap_ref[...] = jnp.zeros_like(gap_ref)                # per-image GAP sums

    row0 = pl.multiple_of(h * tile_h, tile_h)
    acc = _conv_tap_packed(x_ref, w_ref, row0, tile_h, out_w)
    res = r_ref[0, pl.ds(row0 + 1, tile_h), :, :][:, 1:out_w + 1, :]
    res = res.reshape(tile_h * out_w, cout).astype(jnp.float32)
    y = jnp.maximum(acc + b_ref[...] + res, 0.0)              # f32 epilogue
    gap_ref[...] += jnp.sum(y, axis=0, keepdims=True)         # (1, C) running sum

    @pl.when(h == pl.num_programs(1) - 1)
    def _():
        pooled = gap_ref[...] * inv_hw                                     # (1, C)
        logit = jnp.sum(pooled * wfc_ref[...], axis=-1, keepdims=True)     # (1, 1)
        logit = logit + bfc_ref[...]
        row_ids = jax.lax.broadcasted_iota(jnp.int32, o_ref.shape, 0)      # (N, 1)
        o_ref[...] += jnp.where(row_ids == n, logit, 0.0)


# -------------------------------- JAX wrappers ------------------------------- #

def conv3x3_bn_relu_pad(x_pad, w2d, bias):
    """Fused 3x3 conv (stride 1) + folded-BN bias + ReLU.

    x_pad: (N, H+2, W+2, Cin) bf16, spatially zero-padded.
    w2d:   (9*Cin, Cout) bf16 tap-major, BN scale folded in.
    bias:  (1, Cout) f32.
    Returns (N, H+2, W+2, Cout) bf16, already zero-padded for the next 3x3 conv.
    """
    n, hp, wp, cin = x_pad.shape
    h, w = hp - 2, wp - 2
    cout = bias.shape[-1]
    tile_h = _pick_tile_h(h, w)

    return pl.pallas_call(
        functools.partial(_conv_bn_relu_pad_kernel, tile_h=tile_h),
        out_shape=jax.ShapeDtypeStruct((n, hp, wp, cout), jnp.bfloat16),
        grid=(n, h // tile_h),
        in_specs=[
            pl.BlockSpec((1, hp, wp, cin), lambda i, j: (i, 0, 0, 0)),
            pl.BlockSpec(w2d.shape, lambda i, j: (0, 0)),
            pl.BlockSpec(bias.shape, lambda i, j: (0, 0)),
        ],
        out_specs=pl.BlockSpec((1, hp, wp, cout), lambda i, j: (i, 0, 0, 0)),
        compiler_params=pltpu.CompilerParams(
            dimension_semantics=("parallel", "arbitrary"),
            vmem_limit_bytes=VMEM_LIMIT,
        ),
    )(x_pad, w2d, bias)


def conv3x3_res_gap_fc(x_pad, w2d, bias, res_pad, w_fc, b_fc):
    """Final residual conv with fused skip-add, ReLU, GAP and Linear(C, 1)."""
    n, hp, wp, cin = x_pad.shape
    h, w = hp - 2, wp - 2
    cout = bias.shape[-1]
    tile_h = _pick_tile_h(h, w)

    return pl.pallas_call(
        functools.partial(_conv_res_gap_fc_kernel, tile_h=tile_h,
                          inv_hw=1.0 / float(h * w)),
        out_shape=jax.ShapeDtypeStruct((n, 1), jnp.float32),
        grid=(n, h // tile_h),
        in_specs=[
            pl.BlockSpec((1, hp, wp, cin), lambda i, j: (i, 0, 0, 0)),
            pl.BlockSpec(w2d.shape, lambda i, j: (0, 0)),
            pl.BlockSpec(bias.shape, lambda i, j: (0, 0)),
            pl.BlockSpec((1, hp, wp, cout), lambda i, j: (i, 0, 0, 0)),
            pl.BlockSpec(w_fc.shape, lambda i, j: (0, 0)),
            pl.BlockSpec(b_fc.shape, lambda i, j: (0, 0)),
        ],
        # One (N, 1) logits block resident across the whole grid; each image writes
        # its row at its last row-tile step -> keep the batch axis sequential.
        out_specs=pl.BlockSpec((n, 1), lambda i, j: (0, 0)),
        scratch_shapes=[pltpu.VMEM((1, cout), jnp.float32)],
        compiler_params=pltpu.CompilerParams(
            dimension_semantics=("arbitrary", "arbitrary"),
            vmem_limit_bytes=VMEM_LIMIT,
        ),
    )(x_pad, w2d, bias, res_pad, w_fc, b_fc)


# -------------------------------- Model params ------------------------------- #

def init_params(key, c_in=3, c_feat=32):
    ks = jax.random.split(key, 4)
    return {
        # stem: conv 3x3 c_in -> c_feat (+BN)
        "w_stem": jax.random.normal(ks[0], (3, 3, c_in, c_feat), jnp.float32) * 0.05,
        "s_stem": 1.0 + 0.01 * jnp.arange(c_feat, dtype=jnp.float32),
        "b_stem": 0.01 * jnp.arange(c_feat, dtype=jnp.float32),
        # residual basic block conv1 / conv2 (+BN)
        "w_rb1": jax.random.normal(ks[1], (3, 3, c_feat, c_feat), jnp.float32) * 0.05,
        "s_rb1": jnp.ones((c_feat,), jnp.float32),
        "b_rb1": jnp.zeros((c_feat,), jnp.float32),
        "w_rb2": jax.random.normal(ks[2], (3, 3, c_feat, c_feat), jnp.float32) * 0.05,
        "s_rb2": jnp.ones((c_feat,), jnp.float32),
        "b_rb2": jnp.zeros((c_feat,), jnp.float32),
        # binary head: Linear(c_feat, 1)
        "w_fc": jax.random.normal(ks[3], (c_feat, 1), jnp.float32) * 0.05,
        "b_fc": jnp.zeros((1,), jnp.float32),
    }


def prepare_params(p):
    """One-time weight transform (not a per-forward op): fold BN scale into conv
    weights, reshape to tap-major (9*Cin, Cout), cast MXU inputs to bf16.  Only
    the stem Cin is padded (3 -> CIN_PAD) so K is a sublane multiple; feature maps
    keep their real 32 channels everywhere (no 128-lane channel padding).
    TODO(synk): real pretrained BN needs gamma/sqrt(var+eps) folded into weights
                and beta - mean*gamma/sqrt(var+eps) into the bias."""
    def conv(w, scale, bias, cin_pad=None):
        kh, kw, cin, cout = w.shape
        cin_pad = cin if cin_pad is None else cin_pad
        wf = w * scale                                          # fold BN scale
        w_pad = jnp.zeros((kh, kw, cin_pad, cout), jnp.float32)
        w_pad = w_pad.at[:, :, :cin, :].set(wf)
        w2d = w_pad.reshape(kh * kw * cin_pad, cout).astype(jnp.bfloat16)
        return w2d, bias.reshape(1, cout).astype(jnp.float32)

    w_stem, b_stem = conv(p["w_stem"], p["s_stem"], p["b_stem"], cin_pad=CIN_PAD)
    w_rb1, b_rb1 = conv(p["w_rb1"], p["s_rb1"], p["b_rb1"])
    w_rb2, b_rb2 = conv(p["w_rb2"], p["s_rb2"], p["b_rb2"])
    w_fc = p["w_fc"][:, 0].reshape(1, -1).astype(jnp.float32)       # (1, C)
    b_fc = p["b_fc"].reshape(1, 1).astype(jnp.float32)
    return {
        "w_stem": w_stem, "b_stem": b_stem,
        "w_rb1": w_rb1, "b_rb1": b_rb1,
        "w_rb2": w_rb2, "b_rb2": b_rb2,
        "w_fc": w_fc, "b_fc": b_fc,
    }


@jax.jit
def model_forward(prep, x_nchw):
    """Forward pass. x_nchw: (N, C, H, W) float32 (PyTorch convention)."""
    x = jnp.transpose(x_nchw, (0, 2, 3, 1))                       # NCHW -> NHWC
    n, h, w, c = x.shape
    # One input pad only (1-px spatial halo + stem Cin -> CIN_PAD); every later
    # layer consumes the previous conv's already-padded output directly.
    x = jnp.pad(x, ((0, 0), (1, 1), (1, 1), (0, CIN_PAD - c))).astype(jnp.bfloat16)

    h0 = conv3x3_bn_relu_pad(x, prep["w_stem"], prep["b_stem"])   # stem (padded out)
    h1 = conv3x3_bn_relu_pad(h0, prep["w_rb1"], prep["b_rb1"])    # rb conv1
    # rb conv2 + skip(h0) + ReLU + GAP + Linear(C,1), fused: only logits hit HBM
    return conv3x3_res_gap_fc(h1, prep["w_rb2"], prep["b_rb2"], h0,
                              prep["w_fc"], prep["b_fc"])


def reference_forward(p, x_nchw):
    """Pure-JAX (XLA) f32 reference for the same synthetic network."""
    x = jnp.transpose(x_nchw, (0, 2, 3, 1))

    def conv(t, w, s, b):
        y = jax.lax.conv_general_dilated(
            t, w * s, window_strides=(1, 1), padding="SAME",
            dimension_numbers=("NHWC", "HWIO", "NHWC"))
        return y + b

    h0 = jax.nn.relu(conv(x, p["w_stem"], p["s_stem"], p["b_stem"]))
    h1 = jax.nn.relu(conv(h0, p["w_rb1"], p["s_rb1"], p["b_rb1"]))
    h2 = jax.nn.relu(conv(h1, p["w_rb2"], p["s_rb2"], p["b_rb2"]) + h0)
    pooled = jnp.mean(h2, axis=(1, 2))
    return pooled @ p["w_fc"] + p["b_fc"]


# ------------------------------------ main ----------------------------------- #

if __name__ == "__main__":
    key = jax.random.PRNGKey(0)
    k_param, k_input = jax.random.split(key)

    params = init_params(k_param, c_in=3, c_feat=32)
    prep = prepare_params(params)

    # Small image batch: N=2, C=3 (RGB), 16x16 spatial (stand-in for 224x224).
    x = jax.random.normal(k_input, (2, 3, 16, 16), jnp.float32)

    logits = model_forward(prep, x)
    jax.block_until_ready(logits)

    assert logits.shape == (2, 1), logits.shape
    assert logits.dtype == jnp.float32

    # bf16 activations/MXU weights vs f32 XLA reference: agree to ~1e-2.
    ref = reference_forward(params, x)
    assert jnp.allclose(logits, ref, rtol=5e-2, atol=2e-2), (logits, ref)

    print("KERNEL_OK")
</pallas_src>

<mosaic_0001>
module attributes {stable_mosaic.version = 11 : i64} {
  func.func @_conv_bn_relu_pad_kernel(%arg0: i32, %arg1: i32, %arg2: memref<1x18x18x8xbf16, #tpu.memory_space<vmem>>, %arg3: memref<72x32xbf16, #tpu.memory_space<vmem>>, %arg4: memref<1x32xf32, #tpu.memory_space<vmem>>, %arg5: memref<1x18x18x32xbf16, #tpu.memory_space<vmem>>) attributes {dimension_semantics = [#tpu.dimension_semantics<parallel>, #tpu.dimension_semantics<arbitrary>], iteration_bounds = array<i64: 2, 2>, scalar_prefetch = 0 : i64, scratch_operands = 0 : i64, tpu.core_type = #tpu.core_type<tc>, window_params = [{transform_indices = @transform_0, window_bounds = array<i64: 1, 18, 18, 8>}, {pipeline_mode = #tpu.pipeline_mode<synchronous>, transform_indices = @transform_1, window_bounds = array<i64: 72, 32>}, {pipeline_mode = #tpu.pipeline_mode<synchronous>, transform_indices = @transform_2, window_bounds = array<i64: 1, 32>}, {transform_indices = @transform_3, window_bounds = array<i64: 1, 18, 18, 32>}]} {
    %c0_i32 = arith.constant 0 : i32
    %0 = arith.cmpi eq, %arg1, %c0_i32 : i32
    %1 = arith.extui %0 : i1 to i32
    %c0_i32_0 = arith.constant 0 : i32
    %2 = arith.cmpi ne, %1, %c0_i32_0 : i32
    scf.if %2 {
      %cst_10 = arith.constant 0.000000e+00 : bf16
      %36 = vector.broadcast %cst_10 : bf16 to vector<1x18x18x32xbf16>
      %c0_11 = arith.constant 0 : index
      %c0_12 = arith.constant 0 : index
      %c0_13 = arith.constant 0 : index
      %c0_14 = arith.constant 0 : index
      %37 = vector.load %arg5[%c0_11, %c0_12, %c0_13, %c0_14] : memref<1x18x18x32xbf16, #tpu.memory_space<vmem>>, vector<1x18x18x32xbf16>
      tpu.vector_store %arg5[%c0_11, %c0_12, %c0_13, %c0_14], %36 {strides = array<i32>} : memref<1x18x18x32xbf16, #tpu.memory_space<vmem>>, vector<1x18x18x32xbf16>,
    } else {
    }
    %c8_i32 = arith.constant 8 : i32
    %3 = arith.muli %arg1, %c8_i32 : i32
    %4 = tpu.assume_multiple %3, 8 : i32
    %c0 = arith.constant 0 : index
    %5 = arith.index_cast %4 : i32 to index
    %c0_1 = arith.constant 0 : index
    %c0_2 = arith.constant 0 : index
    %6 = vector.load %arg2[%c0, %5, %c0_1, %c0_2] : memref<1x18x18x8xbf16, #tpu.memory_space<vmem>>, vector<1x10x18x8xbf16>
    %7 = vector.shape_cast %6 : vector<1x10x18x8xbf16> to vector<10x18x8xbf16>
    %8 = vector.extract_strided_slice %7 {offsets = [0, 0, 0], sizes = [8, 18, 8], strides = [1, 1, 1]} : vector<10x18x8xbf16> to vector<8x18x8xbf16>
    %9 = vector.extract_strided_slice %8 {offsets = [0, 0, 0], sizes = [8, 16, 8], strides = [1, 1, 1]} : vector<8x18x8xbf16> to vector<8x16x8xbf16>
    %10 = vector.extract_strided_slice %8 {offsets = [0, 1, 0], sizes = [8, 16, 8], strides = [1, 1, 1]} : vector<8x18x8xbf16> to vector<8x16x8xbf16>
    %11 = vector.extract_strided_slice %8 {offsets = [0, 2, 0], sizes = [8, 16, 8], strides = [1, 1, 1]} : vector<8x18x8xbf16> to vector<8x16x8xbf16>
    %12 = vector.extract_strided_slice %7 {offsets = [1, 0, 0], sizes = [8, 18, 8], strides = [1, 1, 1]} : vector<10x18x8xbf16> to vector<8x18x8xbf16>
    %13 = vector.extract_strided_slice %12 {offsets = [0, 0, 0], sizes = [8, 16, 8], strides = [1, 1, 1]} : vector<8x18x8xbf16> to vector<8x16x8xbf16>
    %14 = vector.extract_strided_slice %12 {offsets = [0, 1, 0], sizes = [8, 16, 8], strides = [1, 1, 1]} : vector<8x18x8xbf16> to vector<8x16x8xbf16>
    %15 = vector.extract_strided_slice %12 {offsets = [0, 2, 0], sizes = [8, 16, 8], strides = [1, 1, 1]} : vector<8x18x8xbf16> to vector<8x16x8xbf16>
    %16 = vector.extract_strided_slice %7 {offsets = [2, 0, 0], sizes = [8, 18, 8], strides = [1, 1, 1]} : vector<10x18x8xbf16> to vector<8x18x8xbf16>
    %17 = vector.extract_strided_slice %16 {offsets = [0, 0, 0], sizes = [8, 16, 8], strides = [1, 1, 1]} : vector<8x18x8xbf16> to vector<8x16x8xbf16>
    %18 = vector.extract_strided_slice %16 {offsets = [0, 1, 0], sizes = [8, 16, 8], strides = [1, 1, 1]} : vector<8x18x8xbf16> to vector<8x16x8xbf16>
    %19 = vector.extract_strided_slice %16 {offsets = [0, 2, 0], sizes = [8, 16, 8], strides = [1, 1, 1]} : vector<8x18x8xbf16> to vector<8x16x8xbf16>
    %20 = tpu.concatenate %9, %10, %11, %13, %14, %15, %17, %18, %19 in 2 : vector<8x16x8xbf16>, vector<8x16x8xbf16>, vector<8x16x8xbf16>, vector<8x16x8xbf16>, vector<8x16x8xbf16>, vector<8x16x8xbf16>, vector<8x16x8xbf16>, vector<8x16x8xbf16>, vector<8x16x8xbf16> -> vector<8x16x72xbf16>
    %21 = vector.shape_cast %20 : vector<8x16x72xbf16> to vector<128x72xbf16>
    %c0_3 = arith.constant 0 : index
    %c0_4 = arith.constant 0 : index
    %22 = vector.load %arg3[%c0_3, %c0_4] : memref<72x32xbf16, #tpu.memory_space<vmem>>, vector<72x32xbf16>
    %cst = arith.constant dense<0.000000e+00> : vector<128x32xf32>
    %23 = tpu.matmul %21, %22, %cst {dimension_numbers = #tpu.dot_dimension_numbers<[1], [0], [0], [1], [0, 0, 1, 1], [], []>} : vector<128x72xbf16>, vector<72x32xbf16>, vector<128x32xf32> -> vector<128x32xf32>
    %c0_5 = arith.constant 0 : index
    %c0_6 = arith.constant 0 : index
    %24 = vector.load %arg4[%c0_5, %c0_6] : memref<1x32xf32, #tpu.memory_space<vmem>>, vector<1x32xf32>
    %25 = vector.broadcast %24 : vector<1x32xf32> to vector<128x32xf32>
    %26 = arith.addf %23, %25 : vector<128x32xf32>
    %cst_7 = arith.constant 0.000000e+00 : f32
    %27 = vector.broadcast %cst_7 : f32 to vector<128x32xf32>
    %28 = arith.maximumf %26, %27 : vector<128x32xf32>
    %29 = vector.shape_cast %28 : vector<128x32xf32> to vector<8x16x32xf32>
    %30 = arith.truncf %29 : vector<8x16x32xf32> to vector<8x16x32xbf16>
    %c1_i32 = arith.constant 1 : i32
    %31 = arith.addi %4, %c1_i32 : i32
    %c0_8 = arith.constant 0 : index
    %32 = arith.index_cast %31 : i32 to index
    %c1 = arith.constant 1 : index
    %c0_9 = arith.constant 0 : index
    %33 = vector.load %arg5[%c0_8, %32, %c1, %c0_9] : memref<1x18x18x32xbf16, #tpu.memory_space<vmem>>, vector<1x8x16x32xbf16>
    %34 = vector.shape_cast %33 : vector<1x8x16x32xbf16> to vector<8x16x32xbf16>
    %35 = vector.shape_cast %30 : vector<8x16x32xbf16> to vector<1x8x16x32xbf16>
    tpu.vector_store %arg5[%c0_8, %32, %c1, %c0_9], %35 {strides = array<i32>} : memref<1x18x18x32xbf16, #tpu.memory_space<vmem>>, vector<1x8x16x32xbf16>,
    return
  }
  func.func @transform_0(%arg0: i32, %arg1: i32) -> (i32, i32, i32, i32) {
    %c0_i32 = arith.constant 0 : i32
    %c0_i32_0 = arith.constant 0 : i32
    %c0_i32_1 = arith.constant 0 : i32
    %c0_i32_2 = arith.constant 0 : i32
    return %arg0, %c0_i32, %c0_i32_0, %c0_i32_1 : i32, i32, i32, i32
  }
  func.func @transform_1(%arg0: i32, %arg1: i32) -> (i32, i32) {
    %c0_i32 = arith.constant 0 : i32
    %c0_i32_0 = arith.constant 0 : i32
    %c0_i32_1 = arith.constant 0 : i32
    return %c0_i32, %c0_i32_0 : i32, i32
  }
  func.func @transform_2(%arg0: i32, %arg1: i32) -> (i32, i32) {
    %c0_i32 = arith.constant 0 : i32
    %c0_i32_0 = arith.constant 0 : i32
    %c0_i32_1 = arith.constant 0 : i32
    return %c0_i32, %c0_i32_0 : i32, i32
  }
  func.func @transform_3(%arg0: i32, %arg1: i32) -> (i32, i32, i32, i32) {
    %c0_i32 = arith.constant 0 : i32
    %c0_i32_0 = arith.constant 0 : i32
    %c0_i32_1 = arith.constant 0 : i32
    %c0_i32_2 = arith.constant 0 : i32
    return %arg0, %c0_i32, %c0_i32_0, %c0_i32_1 : i32, i32, i32, i32
  }
}

module attributes {stable_mosaic.version = 11 : i64} {
  func.func @_conv_res_gap_fc_kernel(%arg0: i32, %arg1: i32, %arg2: memref<1x18x18x32xbf16, #tpu.memory_space<vmem>>, %arg3: memref<288x32xbf16, #tpu.memory_space<vmem>>, %arg4: memref<1x32xf32, #tpu.memory_space<vmem>>, %arg5: memref<1x18x18x32xbf16, #tpu.memory_space<vmem>>, %arg6: memref<1x32xf32, #tpu.memory_space<vmem>>, %arg7: memref<1x1xf32, #tpu.memory_space<vmem>>, %arg8: memref<2x1xf32, #tpu.memory_space<vmem>>, %arg9: memref<1x32xf32, #tpu.memory_space<vmem>>) attributes {dimension_semantics = [#tpu.dimension_semantics<arbitrary>, #tpu.dimension_semantics<arbitrary>], iteration_bounds = array<i64: 2, 2>, scalar_prefetch = 0 : i64, scratch_operands = 1 : i64, tpu.core_type = #tpu.core_type<tc>, window_params = [{transform_indices = @transform_0, window_bounds = array<i64: 1, 18, 18, 32>}, {pipeline_mode = #tpu.pipeline_mode<synchronous>, transform_indices = @transform_1, window_bounds = array<i64: 288, 32>}, {pipeline_mode = #tpu.pipeline_mode<synchronous>, transform_indices = @transform_2, window_bounds = array<i64: 1, 32>}, {transform_indices = @transform_3, window_bounds = array<i64: 1, 18, 18, 32>}, {pipeline_mode = #tpu.pipeline_mode<synchronous>, transform_indices = @transform_4, window_bounds = array<i64: 1, 32>}, {pipeline_mode = #tpu.pipeline_mode<synchronous>, transform_indices = @transform_5, window_bounds = array<i64: 1, 1>}, {pipeline_mode = #tpu.pipeline_mode<synchronous>, transform_indices = @transform_6, window_bounds = array<i64: 2, 1>}]} {
    %c0_i32 = arith.constant 0 : i32
    %0 = arith.cmpi eq, %arg0, %c0_i32 : i32
    %c0_i32_0 = arith.constant 0 : i32
    %1 = arith.cmpi eq, %arg1, %c0_i32_0 : i32
    %2 = arith.andi %0, %1 : i1
    %3 = arith.extui %2 : i1 to i32
    %c0_i32_1 = arith.constant 0 : i32
    %4 = arith.cmpi ne, %3, %c0_i32_1 : i32
    scf.if %4 {
      %cst_21 = arith.constant 0.000000e+00 : f32
      %50 = vector.broadcast %cst_21 : f32 to vector<2x1xf32>
      %c0_22 = arith.constant 0 : index
      %c0_23 = arith.constant 0 : index
      %51 = vector.load %arg8[%c0_22, %c0_23] : memref<2x1xf32, #tpu.memory_space<vmem>>, vector<2x1xf32>
      tpu.vector_store %arg8[%c0_22, %c0_23], %50 {strides = array<i32>} : memref<2x1xf32, #tpu.memory_space<vmem>>, vector<2x1xf32>,
    } else {
    }
    %c0_i32_2 = arith.constant 0 : i32
    %5 = arith.cmpi eq, %arg1, %c0_i32_2 : i32
    %6 = arith.extui %5 : i1 to i32
    %c0_i32_3 = arith.constant 0 : i32
    %7 = arith.cmpi ne, %6, %c0_i32_3 : i32
    scf.if %7 {
      %cst_21 = arith.constant 0.000000e+00 : f32
      %50 = vector.broadcast %cst_21 : f32 to vector<1x32xf32>
      %c0_22 = arith.constant 0 : index
      %c0_23 = arith.constant 0 : index
      %51 = vector.load %arg9[%c0_22, %c0_23] : memref<1x32xf32, #tpu.memory_space<vmem>>, vector<1x32xf32>
      tpu.vector_store %arg9[%c0_22, %c0_23], %50 {strides = array<i32>} : memref<1x32xf32, #tpu.memory_space<vmem>>, vector<1x32xf32>,
    } else {
    }
    %c8_i32 = arith.constant 8 : i32
    %8 = arith.muli %arg1, %c8_i32 : i32
    %9 = tpu.assume_multiple %8, 8 : i32
    %c0 = arith.constant 0 : index
    %10 = arith.index_cast %9 : i32 to index
    %c0_4 = arith.constant 0 : index
    %c0_5 = arith.constant 0 : index
    %11 = vector.load %arg2[%c0, %10, %c0_4, %c0_5] : memref<1x18x18x32xbf16, #tpu.memory_space<vmem>>, vector<1x10x18x32xbf16>
    %12 = vector.shape_cast %11 : vector<1x10x18x32xbf16> to vector<10x18x32xbf16>
    %13 = vector.extract_strided_slice %12 {offsets = [0, 0, 0], sizes = [8, 18, 32], strides = [1, 1, 1]} : vector<10x18x32xbf16> to vector<8x18x32xbf16>
    %14 = vector.extract_strided_slice %13 {offsets = [0, 0, 0], sizes = [8, 16, 32], strides = [1, 1, 1]} : vector<8x18x32xbf16> to vector<8x16x32xbf16>
    %15 = vector.extract_strided_slice %13 {offsets = [0, 1, 0], sizes = [8, 16, 32], strides = [1, 1, 1]} : vector<8x18x32xbf16> to vector<8x16x32xbf16>
    %16 = vector.extract_strided_slice %13 {offsets = [0, 2, 0], sizes = [8, 16, 32], strides = [1, 1, 1]} : vector<8x18x32xbf16> to vector<8x16x32xbf16>
    %17 = vector.extract_strided_slice %12 {offsets = [1, 0, 0], sizes = [8, 18, 32], strides = [1, 1, 1]} : vector<10x18x32xbf16> to vector<8x18x32xbf16>
    %18 = vector.extract_strided_slice %17 {offsets = [0, 0, 0], sizes = [8, 16, 32], strides = [1, 1, 1]} : vector<8x18x32xbf16> to vector<8x16x32xbf16>
    %19 = vector.extract_strided_slice %17 {offsets = [0, 1, 0], sizes = [8, 16, 32], strides = [1, 1, 1]} : vector<8x18x32xbf16> to vector<8x16x32xbf16>
    %20 = vector.extract_strided_slice %17 {offsets = [0, 2, 0], sizes = [8, 16, 32], strides = [1, 1, 1]} : vector<8x18x32xbf16> to vector<8x16x32xbf16>
    %21 = vector.extract_strided_slice %12 {offsets = [2, 0, 0], sizes = [8, 18, 32], strides = [1, 1, 1]} : vector<10x18x32xbf16> to vector<8x18x32xbf16>
    %22 = vector.extract_strided_slice %21 {offsets = [0, 0, 0], sizes = [8, 16, 32], strides = [1, 1, 1]} : vector<8x18x32xbf16> to vector<8x16x32xbf16>
    %23 = vector.extract_strided_slice %21 {offsets = [0, 1, 0], sizes = [8, 16, 32], strides = [1, 1, 1]} : vector<8x18x32xbf16> to vector<8x16x32xbf16>
    %24 = vector.extract_strided_slice %21 {offsets = [0, 2, 0], sizes = [8, 16, 32], strides = [1, 1, 1]} : vector<8x18x32xbf16> to vector<8x16x32xbf16>
    %25 = tpu.concatenate %14, %15, %16, %18, %19, %20, %22, %23, %24 in 2 : vector<8x16x32xbf16>, vector<8x16x32xbf16>, vector<8x16x32xbf16>, vector<8x16x32xbf16>, vector<8x16x32xbf16>, vector<8x16x32xbf16>, vector<8x16x32xbf16>, vector<8x16x32xbf16>, vector<8x16x32xbf16> -> vector<8x16x288xbf16>
    %26 = vector.shape_cast %25 : vector<8x16x288xbf16> to vector<128x288xbf16>
    %c0_6 = arith.constant 0 : index
    %c0_7 = arith.constant 0 : index
    %27 = vector.load %arg3[%c0_6, %c0_7] : memref<288x32xbf16, #tpu.memory_space<vmem>>, vector<288x32xbf16>
    %cst = arith.constant dense<0.000000e+00> : vector<128x32xf32>
    %28 = tpu.matmul %26, %27, %cst {dimension_numbers = #tpu.dot_dimension_numbers<[1], [0], [0], [1], [0, 0, 1, 1], [], []>} : vector<128x288xbf16>, vector<288x32xbf16>, vector<128x32xf32> -> vector<128x32xf32>
    %c1_i32 = arith.constant 1 : i32
    %29 = arith.addi %9, %c1_i32 : i32
    %c0_8 = arith.constant 0 : index
    %30 = arith.index_cast %29 : i32 to index
    %c0_9 = arith.constant 0 : index
    %c0_10 = arith.constant 0 : index
    %31 = vector.load %arg5[%c0_8, %30, %c0_9, %c0_10] : memref<1x18x18x32xbf16, #tpu.memory_space<vmem>>, vector<1x8x18x32xbf16>
    %32 = vector.shape_cast %31 : vector<1x8x18x32xbf16> to vector<8x18x32xbf16>
    %33 = vector.extract_strided_slice %32 {offsets = [0, 1, 0], sizes = [8, 16, 32], strides = [1, 1, 1]} : vector<8x18x32xbf16> to vector<8x16x32xbf16>
    %34 = vector.shape_cast %33 : vector<8x16x32xbf16> to vector<128x32xbf16>
    %35 = arith.extf %34 : vector<128x32xbf16> to vector<128x32xf32>
    %c0_11 = arith.constant 0 : index
    %c0_12 = arith.constant 0 : index
    %36 = vector.load %arg4[%c0_11, %c0_12] : memref<1x32xf32, #tpu.memory_space<vmem>>, vector<1x32xf32>
    %37 = vector.broadcast %36 : vector<1x32xf32> to vector<128x32xf32>
    %38 = arith.addf %28, %37 : vector<128x32xf32>
    %39 = arith.addf %38, %35 : vector<128x32xf32>
    %cst_13 = arith.constant 0.000000e+00 : f32
    %40 = vector.broadcast %cst_13 : f32 to vector<128x32xf32>
    %41 = arith.maximumf %39, %40 : vector<128x32xf32>
    %c0_14 = arith.constant 0 : index
    %c0_15 = arith.constant 0 : index
    %42 = vector.load %arg9[%c0_14, %c0_15] : memref<1x32xf32, #tpu.memory_space<vmem>>, vector<1x32xf32>
    %cst_16 = arith.constant dense<0.000000e+00> : vector<32xf32>
    %43 = vector.multi_reduction <add>, %41, %cst_16 [0] : vector<128x32xf32> to vector<32xf32>
    %44 = vector.shape_cast %43 : vector<32xf32> to vector<1x32xf32>
    %45 = arith.addf %42, %44 : vector<1x32xf32>
    %c0_17 = arith.constant 0 : index
    %c0_18 = arith.constant 0 : index
    %46 = vector.load %arg9[%c0_17, %c0_18] : memref<1x32xf32, #tpu.memory_space<vmem>>, vector<1x32xf32>
    tpu.vector_store %arg9[%c0_17, %c0_18], %45 {strides = array<i32>} : memref<1x32xf32, #tpu.memory_space<vmem>>, vector<1x32xf32>,
    %c1_i32_19 = arith.constant 1 : i32
    %47 = arith.cmpi eq, %arg1, %c1_i32_19 : i32
    %48 = arith.extui %47 : i1 to i32
    %c0_i32_20 = arith.constant 0 : i32
    %49 = arith.cmpi ne, %48, %c0_i32_20 : i32
    scf.if %49 {
      %c0_21 = arith.constant 0 : index
      %c0_22 = arith.constant 0 : index
      %50 = vector.load %arg9[%c0_21, %c0_22] : memref<1x32xf32, #tpu.memory_space<vmem>>, vector<1x32xf32>
      %cst_23 = arith.constant 3.906250e-03 : f32
      %51 = vector.broadcast %cst_23 : f32 to vector<1x32xf32>
      %52 = arith.mulf %50, %51 : vector<1x32xf32>
      %c0_24 = arith.constant 0 : index
      %c0_25 = arith.constant 0 : index
      %53 = vector.load %arg6[%c0_24, %c0_25] : memref<1x32xf32, #tpu.memory_space<vmem>>, vector<1x32xf32>
      %54 = arith.mulf %52, %53 : vector<1x32xf32>
      %cst_26 = arith.constant dense<0.000000e+00> : vector<1xf32>
      %55 = vector.multi_reduction <add>, %54, %cst_26 [1] : vector<1x32xf32> to vector<1xf32>
      %56 = vector.shape_cast %55 : vector<1xf32> to vector<1x1xf32>
      %c0_27 = arith.constant 0 : index
      %c0_28 = arith.constant 0 : index
      %57 = vector.load %arg7[%c0_27, %c0_28] : memref<1x1xf32, #tpu.memory_space<vmem>>, vector<1x1xf32>
      %58 = arith.addf %56, %57 : vector<1x1xf32>
      %59 = tpu.iota {dimensions = array<i32: 0>} : vector<2x1xi32>
      %c0_29 = arith.constant 0 : index
      %c0_30 = arith.constant 0 : index
      %60 = vector.load %arg8[%c0_29, %c0_30] : memref<2x1xf32, #tpu.memory_space<vmem>>, vector<2x1xf32>
      %61 = vector.broadcast %arg0 : i32 to vector<2x1xi32>
      %62 = arith.cmpi eq, %59, %61 : vector<2x1xi32>
      %cst_31 = arith.constant 0.000000e+00 : f32
      %63 = vector.shape_cast %58 : vector<1x1xf32> to vector<1x1xf32>
      %64 = vector.broadcast %63 : vector<1x1xf32> to vector<2x1xf32>
      %65 = vector.broadcast %cst_31 : f32 to vector<2x1xf32>
      %66 = arith.select %62, %64, %65 : vector<2x1xi1>, vector<2x1xf32>
      %67 = arith.addf %60, %66 : vector<2x1xf32>
      %c0_32 = arith.constant 0 : index
      %c0_33 = arith.constant 0 : index
      %68 = vector.load %arg8[%c0_32, %c0_33] : memref<2x1xf32, #tpu.memory_space<vmem>>, vector<2x1xf32>
      tpu.vector_store %arg8[%c0_32, %c0_33], %67 {strides = array<i32>} : memref<2x1xf32, #tpu.memory_space<vmem>>, vector<2x1xf32>,
    } else {
    }
    return
  }
  func.func @transform_0(%arg0: i32, %arg1: i32) -> (i32, i32, i32, i32) {
    %c0_i32 = arith.constant 0 : i32
    %c0_i32_0 = arith.constant 0 : i32
    %c0_i32_1 = arith.constant 0 : i32
    %c0_i32_2 = arith.constant 0 : i32
    return %arg0, %c0_i32, %c0_i32_0, %c0_i32_1 : i32, i32, i32, i32
  }
  func.func @transform_1(%arg0: i32, %arg1: i32) -> (i32, i32) {
    %c0_i32 = arith.constant 0 : i32
    %c0_i32_0 = arith.constant 0 : i32
    %c0_i32_1 = arith.constant 0 : i32
    return %c0_i32, %c0_i32_0 : i32, i32
  }
  func.func @transform_2(%arg0: i32, %arg1: i32) -> (i32, i32) {
    %c0_i32 = arith.constant 0 : i32
    %c0_i32_0 = arith.constant 0 : i32
    %c0_i32_1 = arith.constant 0 : i32
    return %c0_i32, %c0_i32_0 : i32, i32
  }
  func.func @transform_3(%arg0: i32, %arg1: i32) -> (i32, i32, i32, i32) {
    %c0_i32 = arith.constant 0 : i32
    %c0_i32_0 = arith.constant 0 : i32
    %c0_i32_1 = arith.constant 0 : i32
    %c0_i32_2 = arith.constant 0 : i32
    return %arg0, %c0_i32, %c0_i32_0, %c0_i32_1 : i32, i32, i32, i32
  }
  func.func @transform_4(%arg0: i32, %arg1: i32) -> (i32, i32) {
    %c0_i32 = arith.constant 0 : i32
    %c0_i32_0 = arith.constant 0 : i32
    %c0_i32_1 = arith.constant 0 : i32
    return %c0_i32, %c0_i32_0 : i32, i32
  }
  func.func @transform_5(%arg0: i32, %arg1: i32) -> (i32, i32) {
    %c0_i32 = arith.constant 0 : i32
    %c0_i32_0 = arith.constant 0 : i32
    %c0_i32_1 = arith.constant 0 : i32
    return %c0_i32, %c0_i32_0 : i32, i32
  }
  func.func @transform_6(%arg0: i32, %arg1: i32) -> (i32, i32) {
    %c0_i32 = arith.constant 0 : i32
    %c0_i32_0 = arith.constant 0 : i32
    %c0_i32_1 = arith.constant 0 : i32
    return %c0_i32, %c0_i32_0 : i32, i32
  }
}

module attributes {stable_mosaic.version = 11 : i64} {
  func.func @_conv_bn_relu_pad_kernel(%arg0: i32, %arg1: i32, %arg2: memref<1x18x18x32xbf16, #tpu.memory_space<vmem>>, %arg3: memref<288x32xbf16, #tpu.memory_space<vmem>>, %arg4: memref<1x32xf32, #tpu.memory_space<vmem>>, %arg5: memref<1x18x18x32xbf16, #tpu.memory_space<vmem>>) attributes {dimension_semantics = [#tpu.dimension_semantics<parallel>, #tpu.dimension_semantics<arbitrary>], iteration_bounds = array<i64: 2, 2>, scalar_prefetch = 0 : i64, scratch_operands = 0 : i64, tpu.core_type = #tpu.core_type<tc>, window_params = [{transform_indices = @transform_0, window_bounds = array<i64: 1, 18, 18, 32>}, {pipeline_mode = #tpu.pipeline_mode<synchronous>, transform_indices = @transform_1, window_bounds = array<i64: 288, 32>}, {pipeline_mode = #tpu.pipeline_mode<synchronous>, transform_indices = @transform_2, window_bounds = array<i64: 1, 32>}, {transform_indices = @transform_3, window_bounds = array<i64: 1, 18, 18, 32>}]} {
    %c0_i32 = arith.constant 0 : i32
    %0 = arith.cmpi eq, %arg1, %c0_i32 : i32
    %1 = arith.extui %0 : i1 to i32
    %c0_i32_0 = arith.constant 0 : i32
    %2 = arith.cmpi ne, %1, %c0_i32_0 : i32
    scf.if %2 {
      %cst_10 = arith.constant 0.000000e+00 : bf16
      %36 = vector.broadcast %cst_10 : bf16 to vector<1x18x18x32xbf16>
      %c0_11 = arith.constant 0 : index
      %c0_12 = arith.constant 0 : index
      %c0_13 = arith.constant 0 : index
      %c0_14 = arith.constant 0 : index
      %37 = vector.load %arg5[%c0_11, %c0_12, %c0_13, %c0_14] : memref<1x18x18x32xbf16, #tpu.memory_space<vmem>>, vector<1x18x18x32xbf16>
      tpu.vector_store %arg5[%c0_11, %c0_12, %c0_13, %c0_14], %36 {strides = array<i32>} : memref<1x18x18x32xbf16, #tpu.memory_space<vmem>>, vector<1x18x18x32xbf16>,
    } else {
    }
    %c8_i32 = arith.constant 8 : i32
    %3 = arith.muli %arg1, %c8_i32 : i32
    %4 = tpu.assume_multiple %3, 8 : i32
    %c0 = arith.constant 0 : index
    %5 = arith.index_cast %4 : i32 to index
    %c0_1 = arith.constant 0 : index
    %c0_2 = arith.constant 0 : index
    %6 = vector.load %arg2[%c0, %5, %c0_1, %c0_2] : memref<1x18x18x32xbf16, #tpu.memory_space<vmem>>, vector<1x10x18x32xbf16>
    %7 = vector.shape_cast %6 : vector<1x10x18x32xbf16> to vector<10x18x32xbf16>
    %8 = vector.extract_strided_slice %7 {offsets = [0, 0, 0], sizes = [8, 18, 32], strides = [1, 1, 1]} : vector<10x18x32xbf16> to vector<8x18x32xbf16>
    %9 = vector.extract_strided_slice %8 {offsets = [0, 0, 0], sizes = [8, 16, 32], strides = [1, 1, 1]} : vector<8x18x32xbf16> to vector<8x16x32xbf16>
    %10 = vector.extract_strided_slice %8 {offsets = [0, 1, 0], sizes = [8, 16, 32], strides = [1, 1, 1]} : vector<8x18x32xbf16> to vector<8x16x32xbf16>
    %11 = vector.extract_strided_slice %8 {offsets = [0, 2, 0], sizes = [8, 16, 32], strides = [1, 1, 1]} : vector<8x18x32xbf16> to vector<8x16x32xbf16>
    %12 = vector.extract_strided_slice %7 {offsets = [1, 0, 0], sizes = [8, 18, 32], strides = [1, 1, 1]} : vector<10x18x32xbf16> to vector<8x18x32xbf16>
    %13 = vector.extract_strided_slice %12 {offsets = [0, 0, 0], sizes = [8, 16, 32], strides = [1, 1, 1]} : vector<8x18x32xbf16> to vector<8x16x32xbf16>
    %14 = vector.extract_strided_slice %12 {offsets = [0, 1, 0], sizes = [8, 16, 32], strides = [1, 1, 1]} : vector<8x18x32xbf16> to vector<8x16x32xbf16>
    %15 = vector.extract_strided_slice %12 {offsets = [0, 2, 0], sizes = [8, 16, 32], strides = [1, 1, 1]} : vector<8x18x32xbf16> to vector<8x16x32xbf16>
    %16 = vector.extract_strided_slice %7 {offsets = [2, 0, 0], sizes = [8, 18, 32], strides = [1, 1, 1]} : vector<10x18x32xbf16> to vector<8x18x32xbf16>
    %17 = vector.extract_strided_slice %16 {offsets = [0, 0, 0], sizes = [8, 16, 32], strides = [1, 1, 1]} : vector<8x18x32xbf16> to vector<8x16x32xbf16>
    %18 = vector.extract_strided_slice %16 {offsets = [0, 1, 0], sizes = [8, 16, 32], strides = [1, 1, 1]} : vector<8x18x32xbf16> to vector<8x16x32xbf16>
    %19 = vector.extract_strided_slice %16 {offsets = [0, 2, 0], sizes = [8, 16, 32], strides = [1, 1, 1]} : vector<8x18x32xbf16> to vector<8x16x32xbf16>
    %20 = tpu.concatenate %9, %10, %11, %13, %14, %15, %17, %18, %19 in 2 : vector<8x16x32xbf16>, vector<8x16x32xbf16>, vector<8x16x32xbf16>, vector<8x16x32xbf16>, vector<8x16x32xbf16>, vector<8x16x32xbf16>, vector<8x16x32xbf16>, vector<8x16x32xbf16>, vector<8x16x32xbf16> -> vector<8x16x288xbf16>
    %21 = vector.shape_cast %20 : vector<8x16x288xbf16> to vector<128x288xbf16>
    %c0_3 = arith.constant 0 : index
    %c0_4 = arith.constant 0 : index
    %22 = vector.load %arg3[%c0_3, %c0_4] : memref<288x32xbf16, #tpu.memory_space<vmem>>, vector<288x32xbf16>
    %cst = arith.constant dense<0.000000e+00> : vector<128x32xf32>
    %23 = tpu.matmul %21, %22, %cst {dimension_numbers = #tpu.dot_dimension_numbers<[1], [0], [0], [1], [0, 0, 1, 1], [], []>} : vector<128x288xbf16>, vector<288x32xbf16>, vector<128x32xf32> -> vector<128x32xf32>
    %c0_5 = arith.constant 0 : index
    %c0_6 = arith.constant 0 : index
    %24 = vector.load %arg4[%c0_5, %c0_6] : memref<1x32xf32, #tpu.memory_space<vmem>>, vector<1x32xf32>
    %25 = vector.broadcast %24 : vector<1x32xf32> to vector<128x32xf32>
    %26 = arith.addf %23, %25 : vector<128x32xf32>
    %cst_7 = arith.constant 0.000000e+00 : f32
    %27 = vector.broadcast %cst_7 : f32 to vector<128x32xf32>
    %28 = arith.maximumf %26, %27 : vector<128x32xf32>
    %29 = vector.shape_cast %28 : vector<128x32xf32> to vector<8x16x32xf32>
    %30 = arith.truncf %29 : vector<8x16x32xf32> to vector<8x16x32xbf16>
    %c1_i32 = arith.constant 1 : i32
    %31 = arith.addi %4, %c1_i32 : i32
    %c0_8 = arith.constant 0 : index
    %32 = arith.index_cast %31 : i32 to index
    %c1 = arith.constant 1 : index
    %c0_9 = arith.constant 0 : index
    %33 = vector.load %arg5[%c0_8, %32, %c1, %c0_9] : memref<1x18x18x32xbf16, #tpu.memory_space<vmem>>, vector<1x8x16x32xbf16>
    %34 = vector.shape_cast %33 : vector<1x8x16x32xbf16> to vector<8x16x32xbf16>
    %35 = vector.shape_cast %30 : vector<8x16x32xbf16> to vector<1x8x16x32xbf16>
    tpu.vector_store %arg5[%c0_8, %32, %c1, %c0_9], %35 {strides = array<i32>} : memref<1x18x18x32xbf16, #tpu.memory_space<vmem>>, vector<1x8x16x32xbf16>,
    return
  }
  func.func @transform_0(%arg0: i32, %arg1: i32) -> (i32, i32, i32, i32) {
    %c0_i32 = arith.constant 0 : i32
    %c0_i32_0 = arith.constant 0 : i32
    %c0_i32_1 = arith.constant 0 : i32
    %c0_i32_2 = arith.constant 0 : i32
    return %arg0, %c0_i32, %c0_i32_0, %c0_i32_1 : i32, i32, i32, i32
  }
  func.func @transform_1(%arg0: i32, %arg1: i32) -> (i32, i32) {
    %c0_i32 = arith.constant 0 : i32
    %c0_i32_0 = arith.constant 0 : i32
    %c0_i32_1 = arith.constant 0 : i32
    return %c0_i32, %c0_i32_0 : i32, i32
  }
  func.func @transform_2(%arg0: i32, %arg1: i32) -> (i32, i32) {
    %c0_i32 = arith.constant 0 : i32
    %c0_i32_0 = arith.constant 0 : i32
    %c0_i32_1 = arith.constant 0 : i32
    return %c0_i32, %c0_i32_0 : i32, i32
  }
  func.func @transform_3(%arg0: i32, %arg1: i32) -> (i32, i32, i32, i32) {
    %c0_i32 = arith.constant 0 : i32
    %c0_i32_0 = arith.constant 0 : i32
    %c0_i32_1 = arith.constant 0 : i32
    %c0_i32_2 = arith.constant 0 : i32
    return %arg0, %c0_i32, %c0_i32_0, %c0_i32_1 : i32, i32, i32, i32
  }
}

</mosaic_0001>

<bundles_post_ra>
// kernel: model_forward.3
= control target key start
LH: loop header
LB: loop body
LE: loop exit
PB: predicated region body
PF: predicated region fallthrough
CT: control target
= control target key end

     0   :  { %s1617_s12 = smov 0   ;;  %s1619_s13 = smov 0   ;;  %s2263_s0 = inlined_call_operand.vmem [shape: bf16[2,18,18,8], index: 0, kind: input, shape index: {}]   ;;  %s2264_s1 = inlined_call_operand.vmem [shape: bf16[72,32], index: 1, kind: input, shape index: {}]   ;;  %s2265_s2 = inlined_call_operand.vmem [shape: f32[1,32], index: 2, kind: input, shape index: {}]   ;;  %s2266_s3 = inlined_call_operand.vmem [shape: bf16[2,18,18,32], index: 3, kind: output, shape index: {}]  }
   0x1   :  { %s1621_s14 = smov 0   ;;  %s1623_s15 = smov 0  }
   0x2   :  { %s1625_s16 = smov 0  }
   0x3 LB: > { %s22_s17 = sadd.s32 1, %s1578_s14  ;;  %s25_s18 = sadd.s32 1, %s1582_s15  ;;  %s1586_s16 = sphi %s1625_s16, %s13_s16   ;;  %s1582_s15 = sphi %s1623_s15, %s2276_s15   ;;  %s1578_s14 = sphi %s1621_s14, %s2275_s14   ;;  %s1574_s13 = sphi %s1619_s13, %s2274_s13   ;;  %s1570_s12 = sphi %s1617_s12, %s2273_s12  }
   0x4   : > { %p23_p0 = scmp.ge.s32.totalorder %s22_s17, 2  ;;  %p1304_p1 = scmp.ge.s32.totalorder %s1586_s16, 1 }
   0x5   : > { %p149_p2 = scmp.lt.s32.totalorder %s1586_s16, 5 }
   0x6   : > { %s2278_s17 = smov (%p23_p0, %s22_s17), 0  ;;  %s2280_s18 = smov (!%p23_p0, %s25_s18), %s1582_s15 }
   0x7   : > { %p150_p3 = pnand %p1304_p1, %p149_p2  ;;  %p27_p4 = scmp.ge.s32.totalorder %s2280_s18, 2 }
   0x8   : > { %p173_p5 = scmp.lt.s32.totalorder (!%p150_p3), %s1574_s13, 1  ;;  %p1307_p6 = scmp.ne.s32.totalorder (!%p150_p3), %s1570_s12, 0 }
   0x9   : > { %s2282_s18 = smov (%p27_p4, %s2280_s18), 0  ;;  %153 = sbr.rel (%p150_p3) target bundleno = 531 (0x213), region = 32 }
  0x10   : > { %s2284_s13 = smov (!%p173_p5, %s1574_s13), 1  ;;  %187 = sbr.rel (%p1307_p6) target bundleno = 47 (0x2f), region = 36 }
  0x11   : > { %s1473_s19 = smul.u32 216, %s2284_s13  ;;  %vm188_vm0 = vcmask (!%p1307_p6), 257024   ;;  %vm191_vm1 = vcmask (!%p1307_p6), 253952   ;;  %v1588_v0 = vmov (!%p1307_p6), 0  }
  0x13   : > { %s1652_s22 = scalar_lea.vmem %s2263_s0, %s1473_s19  ;;  %s1657_s25 = scalar_lea.vmem %s2266_s3, %s1473_s19 }
  0x14   : > { %189 = vst.msk [vmem:[%s1657_s25] sm:$0xf] (!%p1307_p6), %vm188_vm0, %v1588_v0  ;;  %190 = vst.msk [vmem:[%s1657_s25 + $0x4] sm:$0xf] (!%p1307_p6), %vm188_vm0, %v1588_v0 }
  0x15   : > { %193 = vst.msk [vmem:[%s1657_s25 + $0xc] sm:$0xf] (!%p1307_p6), %vm188_vm0, %v1588_v0  ;;  %194 = vst.msk [vmem:[%s1657_s25 + $0x10] sm:$0xf] (!%p1307_p6), %vm188_vm0, %v1588_v0 }
  0x16   : > { %196 = vst.msk [vmem:[%s1657_s25 + $0x18] sm:$0xf] (!%p1307_p6), %vm188_vm0, %v1588_v0  ;;  %197 = vst.msk [vmem:[%s1657_s25 + $0x1c] sm:$0xf] (!%p1307_p6), %vm188_vm0, %v1588_v0 }
  0x17   : > { %199 = vst.msk [vmem:[%s1657_s25 + $0x24] sm:$0xf] %vm188_vm0, %v1588_v0  ;;  %200 = vst.msk [vmem:[%s1657_s25 + $0x28] sm:$0xf] %vm188_vm0, %v1588_v0 }
  0x18   : > { %202 = vst.msk [vmem:[%s1657_s25 + $0x30] sm:$0xf] %vm188_vm0, %v1588_v0  ;;  %203 = vst.msk [vmem:[%s1657_s25 + $0x34] sm:$0xf] %vm188_vm0, %v1588_v0 }
  0x19   : > { %205 = vst.msk [vmem:[%s1657_s25 + $0x3c] sm:$0xf] %vm188_vm0, %v1588_v0  ;;  %206 = vst.msk [vmem:[%s1657_s25 + $0x40] sm:$0xf] %vm188_vm0, %v1588_v0 }
  0x1a   : > { %208 = vst.msk [vmem:[%s1657_s25 + $0x48] sm:$0xf] %vm188_vm0, %v1588_v0  ;;  %209 = vst.msk [vmem:[%s1657_s25 + $0x4c] sm:$0xf] %vm188_vm0, %v1588_v0 }
  0x1b   : > { %211 = vst.msk [vmem:[%s1657_s25 + $0x54] sm:$0xf] %vm188_vm0, %v1588_v0  ;;  %212 = vst.msk [vmem:[%s1657_s25 + $0x58] sm:$0xf] %vm188_vm0, %v1588_v0 }
  0x1c   : > { %214 = vst.msk [vmem:[%s1657_s25 + $0x60] sm:$0xf] %vm188_vm0, %v1588_v0  ;;  %215 = vst.msk [vmem:[%s1657_s25 + $0x64] sm:$0xf] %vm188_vm0, %v1588_v0 }
  0x1d   : > { %217 = vst.msk [vmem:[%s1657_s25 + $0x6c] sm:$0xf] %vm188_vm0, %v1588_v0  ;;  %218 = vst.msk [vmem:[%s1657_s25 + $0x70] sm:$0xf] %vm188_vm0, %v1588_v0 }
  0x1e   : > { %220 = vst.msk [vmem:[%s1657_s25 + $0x78] sm:$0xf] %vm188_vm0, %v1588_v0  ;;  %221 = vst.msk [vmem:[%s1657_s25 + $0x7c] sm:$0xf] %vm188_vm0, %v1588_v0 }
  0x1f   : > { %223 = vst.msk [vmem:[%s1657_s25 + $0x84] sm:$0xf] %vm188_vm0, %v1588_v0  ;;  %224 = vst.msk [vmem:[%s1657_s25 + $0x88] sm:$0xf] %vm188_vm0, %v1588_v0 }
  0x20   : > { %226 = vst.msk [vmem:[%s1657_s25 + $0x90] sm:$0xf] %vm188_vm0, %v1588_v0  ;;  %227 = vst.msk [vmem:[%s1657_s25 + $0x94] sm:$0xf] %vm188_vm0, %v1588_v0 }
  0x21   : > { %229 = vst.msk [vmem:[%s1657_s25 + $0x9c] sm:$0xf] %vm188_vm0, %v1588_v0  ;;  %230 = vst.msk [vmem:[%s1657_s25 + $0xa0] sm:$0xf] %vm188_vm0, %v1588_v0 }
  0x22   : > { %232 = vst.msk [vmem:[%s1657_s25 + $0xa8] sm:$0xf] %vm188_vm0, %v1588_v0  ;;  %233 = vst.msk [vmem:[%s1657_s25 + $0xac] sm:$0xf] %vm188_vm0, %v1588_v0 }
  0x23   : > { %235 = vst.msk [vmem:[%s1657_s25 + $0xb4] sm:$0xf] %vm188_vm0, %v1588_v0  ;;  %236 = vst.msk [vmem:[%s1657_s25 + $0xb8] sm:$0xf] %vm188_vm0, %v1588_v0 }
  0x24   : > { %238 = vst.msk [vmem:[%s1657_s25 + $0xc0] sm:$0xf] %vm188_vm0, %v1588_v0  ;;  %239 = vst.msk [vmem:[%s1657_s25 + $0xc4] sm:$0xf] %vm188_vm0, %v1588_v0 }
  0x25   : > { %241 = vst.msk [vmem:[%s1657_s25 + $0xcc] sm:$0xf] %vm188_vm0, %v1588_v0  ;;  %242 = vst.msk [vmem:[%s1657_s25 + $0xd0] sm:$0xf] %vm188_vm0, %v1588_v0 }
  0x26   : > { %192 = vst.msk [vmem:[%s1657_s25 + $0x8] sm:$0x1] %vm191_vm1, %v1588_v0  ;;  %195 = vst.msk [vmem:[%s1657_s25 + $0x14] sm:$0x1] %vm191_vm1, %v1588_v0 }
  0x27   : > { %198 = vst.msk [vmem:[%s1657_s25 + $0x20] sm:$0x1] %vm191_vm1, %v1588_v0  ;;  %201 = vst.msk [vmem:[%s1657_s25 + $0x2c] sm:$0x1] %vm191_vm1, %v1588_v0 }
  0x28   : > { %204 = vst.msk [vmem:[%s1657_s25 + $0x38] sm:$0x1] %vm191_vm1, %v1588_v0  ;;  %207 = vst.msk [vmem:[%s1657_s25 + $0x44] sm:$0x1] %vm191_vm1, %v1588_v0 }
  0x29   : > { %210 = vst.msk [vmem:[%s1657_s25 + $0x50] sm:$0x1] %vm191_vm1, %v1588_v0  ;;  %213 = vst.msk [vmem:[%s1657_s25 + $0x5c] sm:$0x1] %vm191_vm1, %v1588_v0 }
  0x2a   : > { %216 = vst.msk [vmem:[%s1657_s25 + $0x68] sm:$0x1] %vm191_vm1, %v1588_v0  ;;  %219 = vst.msk [vmem:[%s1657_s25 + $0x74] sm:$0x1] %vm191_vm1, %v1588_v0 }
  0x2b   : > { %222 = vst.msk [vmem:[%s1657_s25 + $0x80] sm:$0x1] %vm191_vm1, %v1588_v0  ;;  %225 = vst.msk [vmem:[%s1657_s25 + $0x8c] sm:$0x1] %vm191_vm1, %v1588_v0 }
  0x2c   : > { %228 = vst.msk [vmem:[%s1657_s25 + $0x98] sm:$0x1] %vm191_vm1, %v1588_v0  ;;  %231 = vst.msk [vmem:[%s1657_s25 + $0xa4] sm:$0x1] %vm191_vm1, %v1588_v0 }
  0x2d   : > { %234 = vst.msk [vmem:[%s1657_s25 + $0xb0] sm:$0x1] %vm191_vm1, %v1588_v0  ;;  %237 = vst.msk [vmem:[%s1657_s25 + $0xbc] sm:$0x1] %vm191_vm1, %v1588_v0 }
  0x2e   : > { %240 = vst.msk [vmem:[%s1657_s25 + $0xc8] sm:$0x1] %vm191_vm1, %v1588_v0  ;;  %243 = vst.msk [vmem:[%s1657_s25 + $0xd4] sm:$0x1] %vm191_vm1, %v1588_v0 }
  0x2f PF: > { %s1405_s26 = smul.u32 96, %s1570_s12  ;;  %vm455_vm2 = vcmask 1046528   ;;  %vm342_vm3 = vsmask.f32 7424  ;;  %s1589_s28 = smov 16   ;;  %vm834_vm4 = vcmask 1043456  }
  0x30   : > { %s1590_s29 = smov 8   ;;  %s1591_s30 = smov 24   ;;  %vm638_vm5 = vcmask 64512   ;;  %vm655_vm6 = vcmask 130048   ;;  %vm672_vm7 = vcmask 195584   ;;  %vm689_vm8 = vcmask 261120  }
  0x31   : > { %s1772_s27 = scalar_lea.vmem %s1652_s22, %s1405_s26  ;;  %s1592_s4 = smov 32   ;;  %vm706_vm9 = vcmask 326656   ;;  %vm723_vm10 = vcmask 392192   ;;  %vm740_vm11 = vcmask 457728   ;;  %vm757_vm12 = vcmask 523264  }
  0x32   : > { %v1775_v1 = vld [vmem:[%s1772_s27 + $0x30] sm:$0xff]   ;;  %v1524_v2 = vld [vmem:[%s1772_s27 + $0x38] ss:$0 sps:$4 sm:$0x11]   ;;  %v1779_v3 = vld [vmem:[%s1772_s27] sm:$0xff]   ;;  %s1593_s7 = smov 40  }
  0x33   : > { %v468_v4 = vrot.slane %v1775_v1, 1  ;;  %v469_v5 = vrot.slane %v1524_v2, 1  ;;  %v1526_v6 = vld [vmem:[%s1772_s27 + $0x8] ss:$0 sps:$4 sm:$0x11]   ;;  %v1784_v7 = vld [vmem:[%s1772_s27 + $0x3c] sm:$0xff]  }
  0x34   : > { %v456_v8 = vrot.slane %v1779_v3, 1  ;;  %v1788_v9 = vld [vmem:[%s1772_s27 + $0xc] sm:$0xff]   ;;  %v457_v11 = vrot.slane %v1526_v6, 1  ;;  %v1528_v12 = vld [vmem:[%s1772_s27 + $0x44] ss:$0 sps:$4 sm:$0x11]  }
  0x35   : > { %v1791_v10 = vsel %vm455_vm2, %v468_v4, %v469_v5  ;;  %v471_v13 = vrot.slane %v1784_v7, 1  ;;  %v459_v14 = vrot.slane %v1788_v9, 1  ;;  %v472_v16 = vrot.slane %v1528_v12, 1  ;;  %v1530_v17 = vld [vmem:[%s1772_s27 + $0x14] ss:$0 sps:$4 sm:$0x11]  }
  0x36   : > { %488 = vrot.lane.b32.xlu1 %v1791_v10, %s1589_s28  ;;  %v458_v15 = vsel %vm455_vm2, %v456_v8, %v457_v11  ;;  %v356_v18 = vshrl.u32 %v1788_v9, 16  ;;  %v358_v19 = vshll.u32 %v1788_v9, 16  ;;  %v344_v20 = vshrl.u32 %v1779_v3, 16  ;;  %v1827_v47 = vld [vmem:[%s1772_s27 + $0x48] sm:$0xff]   ;;  %v1830_v49 = vld [vmem:[%s1772_s27 + $0x18] sm:$0xff]   ;;  %v1848_v55 = vld [vmem:[%s1772_s27 + $0x60] sm:$0xff]  }
  0x37   : > { %480 = vrot.lane.b32.xlu0 %v458_v15, %s1589_s28  ;;  %v346_v21 = vshll.u32 %v1779_v3, 16  ;;  %v1806_v22 = vsel %vm455_vm2, %v471_v13, %v472_v16  ;;  %v460_v23 = vrot.slane %v1530_v17, 1  ;;  %v363_v24 = vshll.u32 %v1530_v17, 16  ;;  %v1833_v50 = vld [vmem:[%s1772_s27 + $0x50] ss:$0 sps:$4 sm:$0x11]  }
  0x38   : > { %v351_v25 = vshll.u32 %v1526_v6, 16  ;;  %v360_v26 = vrot.slane %v358_v19, 1  ;;  %v404_v28 = vshrl.u32 %v1784_v7, 16  ;;  %v406_v29 = vshll.u32 %v1784_v7, 16  ;;  %v1859_v61 = vld [vmem:[%s1772_s27 + $0x6c] sm:$0xff]   ;;  %s1594_s13 = smov 48  }
  0x39   : > { %v348_v27 = vrot.slane %v346_v21, 1  ;;  %v1813_v30 = vsel %vm455_vm2, %v459_v14, %v460_v23  ;;  %v365_v31 = vrot.slane %v363_v24, 1  ;;  %v411_v33 = vshll.u32 %v1528_v12, 16  ;;  %v1841_v52 = vld [vmem:[%s1772_s27 + $0x20] ss:$0 sps:$4 sm:$0x11]  }
  0x3a   : > { %490 = vrot.lane.b32.xlu1 %v1806_v22, %s1589_s28  ;;  %v353_v32 = vrot.slane %v351_v25, 1  ;;  %v361_v34 = vor.u32 %v360_v26, %v356_v18  ;;  %v408_v36 = vrot.slane %v406_v29, 1  ;;  %v392_v38 = vshrl.u32 %v1775_v1, 16  ;;  %v1540_v63 = vld [vmem:[%s1772_s27 + $0x68] ss:$0 sps:$4 sm:$0x11]  }
  0x3b   : > { %482 = vrot.lane.b32.xlu0 %v1813_v30, %s1589_s28  ;;  %v349_v35 = vor.u32 %v348_v27, %v344_v20  ;;  %v413_v37 = vrot.slane %v411_v33, 1  ;;  %v394_v39 = vshll.u32 %v1775_v1, 16  ;;  %v399_v40 = vshll.u32 %v1524_v2, 16  ;;  %v1542_v14 = vld [vmem:[%s1772_s27 + $0x74] ss:$0 sps:$4 sm:$0x11]  }
  0x3c   : > { %v366_v41 = vsel %vm342_vm3, %v361_v34, %v365_v31  ;;  %v409_v43 = vor.u32 %v408_v36, %v404_v28  ;;  %v418_v53 = vshll.u32 %v1827_v47, 16  ;;  %v370_v54 = vshll.u32 %v1830_v49, 16  ;;  %s1595_s23 = smov 56   ;;  %s1596_s24 = smov 64  }
  0x3d   : > { %v354_v42 = vsel %vm342_vm3, %v349_v35, %v353_v32  ;;  %v396_v44 = vrot.slane %v394_v39, 1  ;;  %v401_v45 = vrot.slane %v399_v40, 1  ;;  %v423_v56 = vshll.u32 %v1833_v50, 16  ;;  %v1913_v40 = vld [vmem:[%s1772_s27 + $0x54] sm:$0xff]  }
  0x3e   : > { %441 = vrot.lane.b32.xlu1 %v366_v41, %s1590_s29  ;;  %v1824_v46 = vsel %vm342_vm3, %v409_v43, %v413_v37  ;;  %v375_v57 = vshll.u32 %v1841_v52, 16  ;;  %v416_v58 = vshrl.u32 %v1827_v47, 16  ;;  %v420_v59 = vrot.slane %v418_v53, 1  ;;  %v1544_v43 = vld [vmem:[%s2264_s1 + $0x8] sm:$0xff]  }
  0x3f   : > { %439 = vrot.lane.b32.xlu0 %v354_v42, %s1590_s29  ;;  %v397_v48 = vor.u32 %v396_v44, %v392_v38  ;;  %v368_v60 = vshrl.u32 %v1830_v49, 16  ;;  %v372_v62 = vrot.slane %v370_v54, 1  ;;  %v521_v0 = vshrl.u32 %v1848_v55, 16  ;;  %v1543_v38 = vld [vmem:[%s2264_s1] sm:$0xff]  }
  0x40   : > { %v523_v2 = vshll.u32 %v1848_v55, 16  ;;  %v425_v4 = vrot.slane %v423_v56, 1  ;;  %v548_v5 = vrot.slane %v1848_v55, 1  ;;  %v377_v6 = vrot.slane %v375_v57, 1  ;;  %1435 = vmatprep.subr.bf16.mxu0 %v1543_v38  ;;  %v1919_v42 = vld [vmem:[%s1772_s27 + $0x24] sm:$0xff]   ;;  %1461 = vmatprep.subr.bf16.mxu1 %v1543_v38 }
  0x41   : > { %v1838_v51 = vsel %vm342_vm3, %v397_v48, %v401_v45  ;;  %v528_v11 = vshll.u32 %v1540_v63, 16  ;;  %v549_v12 = vrot.slane %v1540_v63, 1  ;;  %v421_v13 = vor.u32 %v420_v59, %v416_v58  ;;  %1436 = vmatpush3.bf16.msra.mxu0 %v1543_v38  ;;  %1466 = vmatpush3.bf16.msra.mxu1 %v1543_v38  ;;  %v1538_v45 = vld [vmem:[%s1772_s27 + $0x2c] ss:$0 sps:$4 sm:$0x11]   ;;  %v1546_v59 = vld [vmem:[%s2264_s1 + $0x18] sm:$0xff]  }
  0x42   : > { %449 = vrot.lane.b32.xlu1 %v1824_v46, %s1590_s29  ;;  %v525_v8 = vrot.slane %v523_v2, 1  ;;  %v592_v15 = vshrl.u32 %v1859_v61, 16  ;;  %v594_v16 = vshll.u32 %v1859_v61, 16  ;;  %v619_v17 = vrot.slane %v1859_v61, 1  ;;  %1437 = vmatprep.subr.bf16.mxu0 %v1544_v43  ;;  %v1547_v2 = vld [vmem:[%s2264_s1 + $0x20] ss:$0 sps:$4 sm:$0xff]  }
  0x43   : > { %447 = vrot.lane.b32.xlu0 %v1838_v51, %s1590_s29  ;;  %v373_v18 = vor.u32 %v372_v62, %v368_v60  ;;  %v530_v20 = vrot.slane %v528_v11, 1  ;;  %v1874_v21 = vsel %vm455_vm2, %v548_v5, %v549_v12  ;;  %v599_v24 = vshll.u32 %v1542_v14, 16  ;;  %1462 = vmatprep.subr.bf16.mxu1 %v1544_v43 }
  0x44   : > { %v526_v19 = vor.u32 %v525_v8, %v521_v0  ;;  %v596_v23 = vrot.slane %v594_v16, 1  ;;  %v620_v25 = vrot.slane %v1542_v14, 1  ;;  %v1883_v27 = vsel %vm342_vm3, %v421_v13, %v425_v4 }
  0x45   : > { %v601_v29 = vrot.slane %v599_v24, 1  ;;  %v1889_v32 = vsel %vm342_vm3, %v373_v18, %v377_v6  ;;  %v474_v34 = vrot.slane %v1827_v47, 1  ;;  %v475_v35 = vrot.slane %v1833_v50, 1  ;;  %1438 = vmatpush3.bf16.msra.mxu0 %v1544_v43  ;;  %1467 = vmatpush3.bf16.msra.mxu1 %v1544_v43  ;;  %v1545_v50 = vld [vmem:[%s2264_s1 + $0x10] sm:$0xff]  }
  0x46   : > { %509 = vrot.lane.b32.xlu1 %v1784_v7, %s1591_s30  ;;  %v1879_v26 = vsel %vm342_vm3, %v526_v19, %v530_v20  ;;  %v597_v28 = vor.u32 %v596_v23, %v592_v15  ;;  %v1886_v31 = vsel %vm455_vm2, %v619_v17, %v620_v25  ;;  %v462_v36 = vrot.slane %v1830_v49, 1  ;;  %1439 = vmatprep.subr.bf16.mxu0 %v1545_v50 }
  0x47   : > { %501 = vrot.lane.b32.xlu0 %v1788_v9, %s1591_s30  ;;  %v463_v37 = vrot.slane %v1841_v52, 1  ;;  %v1910_v39 = vsel %vm455_vm2, %v474_v34, %v475_v35  ;;  %v430_v44 = vshll.u32 %v1913_v40, 16  ;;  %v382_v48 = vshll.u32 %v1919_v42, 16  ;;  %1463 = vmatprep.subr.bf16.mxu1 %v1545_v50 }
  0x48   : > { %v1892_v33 = vsel %vm342_vm3, %v597_v28, %v601_v29  ;;  %v428_v52 = vshrl.u32 %v1913_v40, 16  ;;  %v380_v56 = vshrl.u32 %v1919_v42, 16  ;;  %v387_v58 = vshll.u32 %v1538_v45, 16 }
  0x49   : > { %v432_v53 = vrot.slane %v430_v44, 1  ;;  %v384_v57 = vrot.slane %v382_v48, 1  ;;  %1440 = vmatpush3.bf16.msra.mxu0 %v1545_v50  ;;  %1468 = vmatpush3.bf16.msra.mxu1 %v1545_v50  ;;  %v836_v5 = vsel %vm834_vm4, %v1547_v2, 0  ;;  %v477_v8 = vrot.slane %v1913_v40, 1 }
  0x4a   : > { %511 = vrot.lane.b32.xlu1 %v1827_v47, %s1591_s30  ;;  %1441 = vmatprep.subr.bf16.mxu0 %v1546_v59  ;;  %v389_v0 = vrot.slane %v387_v58, 1  ;;  %v465_v12 = vrot.slane %v1919_v42, 1  ;;  %v466_v13 = vrot.slane %v1538_v45, 1  ;;  %vm817_vm13 = vcmask 588800  }
  0x4b   : > { %503 = vrot.lane.b32.xlu0 %v1830_v49, %s1591_s30  ;;  %v433_v60 = vor.u32 %v432_v53, %v428_v52  ;;  %v385_v63 = vor.u32 %v384_v57, %v380_v56  ;;  %1464 = vmatprep.subr.bf16.mxu1 %v1546_v59  ;;  %vm1166_vm14 = vcmask 257024   ;;  %vm1167_vm15 = vsmask.f32 7938 }
  0x4c   : > { %v467_v15 = vsel %vm455_vm2, %v465_v12, %v466_v13  ;;  %vm1000_vm0 = vsmask.f32 256  ;;  %vm1174_vm1 = vcmask 253952  }
  0x4d   : > { %1442 = vmatpush3.bf16.msra.mxu0 %v1546_v59  ;;  %1469 = vmatpush3.bf16.msra.mxu1 %v1546_v59  ;;  %v390_v6 = vsel %vm342_vm3, %v385_v63, %v389_v0 }
  0x4e   : > { %540 = vrot.lane.b32.xlu1 %v1824_v46, %s1592_s4  ;;  %1471 = vmatprep.subr.msk.bf16.mxu0 %vm834_vm4, %v1547_v2 }
  0x4f   : > { %532 = vrot.lane.b32.xlu0 %v366_v41, %s1592_s4  ;;  %v1916_v41 = vsel %vm455_vm2, %v462_v36, %v463_v37  ;;  %1472 = vmatprep.subr.msk.bf16.mxu1 %vm834_vm4, %v1547_v2  ;;  %vm2145_vm4 = vmand %vm1174_vm1, %vm1000_vm0 }
  0x51   : > { %1444 = vmatpush3.bf16.msra.mxu0 %v836_v5  ;;  %1470 = vmatpush3.bf16.msra.mxu1 %v836_v5 }
  0x52   : > { %542 = vrot.lane.b32.xlu1 %v1883_v27, %s1592_s4 }
  0x53   : > { %534 = vrot.lane.b32.xlu0 %v1889_v32, %s1592_s4 }
  0x56   : > { %559 = vrot.lane.b32.xlu1 %v1806_v22, %s1593_s7 }
  0x57   : > { %551 = vrot.lane.b32.xlu0 %v1813_v30, %s1593_s7  ;;  %v1537_v30 = vld [vmem:[%s1772_s27 + $0x5c] ss:$0 sps:$4 sm:$0x11]  }
  0x58   : > { %v435_v54 = vshll.u32 %v1537_v30, 16  ;;  %v478_v11 = vrot.slane %v1537_v30, 1 }
  0x5a   : > { %561 = vrot.lane.b32.xlu1 %v1910_v39, %s1593_s7  ;;  %v437_v62 = vrot.slane %v435_v54, 1  ;;  %v479_v14 = vsel %vm455_vm2, %v477_v8, %v478_v11  ;;  %vm2129_vm2 = vmand %vm1166_vm14, %vm1167_vm15 }
  0x5b   : > { %553 = vrot.lane.b32.xlu0 %v1916_v41, %s1593_s7 }
  0x5c   : > { %v438_v4 = vsel %vm342_vm3, %v433_v60, %v437_v62  ;;  %vm1001_vm3 = vsmask.f32 4368 }
  0x5e   : > { %580 = vrot.lane.b32.xlu1 %v1827_v47, %s1594_s13 }
  0x5f   : > { %572 = vrot.lane.b32.xlu0 %v1830_v49, %s1594_s13 }
  0x62   : > { %582 = vrot.lane.b32.xlu1 %v1913_v40, %s1594_s13 }
  0x63   : > { %574 = vrot.lane.b32.xlu0 %v1919_v42, %s1594_s13 }
  0x66   : > { %611 = vrot.lane.b32.xlu1 %v1883_v27, %s1595_s23 }
  0x67   : > { %603 = vrot.lane.b32.xlu0 %v1889_v32, %s1595_s23 }
  0x6a   : > { %613 = vrot.lane.b32.xlu1 %v438_v4, %s1595_s23 }
  0x6b   : > { %605 = vrot.lane.b32.xlu0 %v390_v6, %s1595_s23 }
  0x6e   : > { %630 = vrot.lane.b32.xlu1 %v1910_v39, %s1596_s24 }
  0x6f   : > { %622 = vrot.lane.b32.xlu0 %v1916_v41, %s1596_s24 }
  0x72   : > { %451 = vrot.lane.b32.xlu1 %v1883_v27, %s1590_s29 }
  0x73   : > { %443 = vrot.lane.b32.xlu0 %v1889_v32, %s1590_s29 }
  0x76   : > { %632 = vrot.lane.b32.xlu1 %v479_v14, %s1596_s24 }
  0x77   : > { %624 = vrot.lane.b32.xlu0 %v467_v15, %s1596_s24 }
  0x7a   : > { %453 = vrot.lane.b32.xlu1 %v438_v4, %s1590_s29 }
  0x7b   : > { %445 = vrot.lane.b32.xlu0 %v390_v6, %s1590_s29  ;;  %s2123_s29 = scalar_lea.vmem %s1657_s25, %s1405_s26 }
  0x7e   : > { %492 = vrot.lane.b32.xlu1 %v1910_v39, %s1589_s28 }
  0x7f   : > { %484 = vrot.lane.b32.xlu0 %v1916_v41, %s1589_s28 }
  0x82   : > { %494 = vrot.lane.b32.xlu1 %v479_v14, %s1589_s28 }
  0x83   : > { %486 = vrot.lane.b32.xlu0 %v467_v15, %s1589_s28 }
  0x86   : > { %513 = vrot.lane.b32.xlu1 %v1913_v40, %s1591_s30 }
  0x87   : > { %505 = vrot.lane.b32.xlu0 %v1919_v42, %s1591_s30 }
  0x8a   : > { %515 = vrot.lane.b32.xlu1 %v1848_v55, %s1591_s30 }
  0x8b   : > { %507 = vrot.lane.b32.xlu0 %v1775_v1, %s1591_s30 }
  0x8e   : > { %544 = vrot.lane.b32.xlu1 %v438_v4, %s1592_s4 }
  0x8f   : > { %536 = vrot.lane.b32.xlu0 %v390_v6, %s1592_s4 }
  0x92   : > { %546 = vrot.lane.b32.xlu1 %v1879_v26, %s1592_s4 }
  0x93   : > { %538 = vrot.lane.b32.xlu0 %v1838_v51, %s1592_s4 }
  0x96   : > { %563 = vrot.lane.b32.xlu1 %v479_v14, %s1593_s7 }
  0x97   : > { %555 = vrot.lane.b32.xlu0 %v467_v15, %s1593_s7 }
  0x9a   : > { %565 = vrot.lane.b32.xlu1 %v1874_v21, %s1593_s7 }
  0x9b   : > { %557 = vrot.lane.b32.xlu0 %v1791_v10, %s1593_s7 }
  0x9e   : > { %584 = vrot.lane.b32.xlu1 %v1848_v55, %s1594_s13 }
  0x9f   : > { %576 = vrot.lane.b32.xlu0 %v1775_v1, %s1594_s13 }
  0xa2   : > { %586 = vrot.lane.b32.xlu1 %v1859_v61, %s1594_s13 }
  0xa3   : > { %578 = vrot.lane.b32.xlu0 %v1784_v7, %s1594_s13 }
  0xa6   : > { %615 = vrot.lane.b32.xlu1 %v1879_v26, %s1595_s23 }
  0xa7   : > { %607 = vrot.lane.b32.xlu0 %v1838_v51, %s1595_s23 }
  0xa8   : > { %v489_v16 = vpop.permute.xlu1 %488 }
  0xa9   : > { %v481_v17 = vpop.permute.xlu0 %480 }
  0xaa   : > { %617 = vrot.lane.b32.xlu1 %v1892_v33, %s1595_s23 }
  0xab   : > { %609 = vrot.lane.b32.xlu0 %v1824_v46, %s1595_s23 }
  0xac   : > { %v491_v55 = vpop.permute.xlu1 %490 }
  0xad   : > { %v2017_v18 = vpop.permute.xlu0 %482 }
  0xae   : > { %634 = vrot.lane.b32.xlu1 %v1874_v21, %s1596_s24 }
  0xaf   : > { %626 = vrot.lane.b32.xlu0 %v1791_v10, %s1596_s24 }
  0xb0   : > { %v442_v61 = vpop.permute.xlu1 %441 }
  0xb1   : > { %v440_v19 = vpop.permute.xlu0 %439  ;;  %v642_v59 = vsel %vm638_vm5, %v1788_v9, %v442_v61 }
  0xb2   : > { %636 = vrot.lane.b32.xlu1 %v1886_v31, %s1596_s24  ;;  %v640_v38 = vsel %vm638_vm5, %v1779_v3, %v440_v19  ;;  %v659_v4 = vsel %vm655_vm6, %v642_v59, %v2017_v18 }
  0xb3   : > { %628 = vrot.lane.b32.xlu0 %v1806_v22, %s1596_s24  ;;  %v657_v30 = vsel %vm655_vm6, %v640_v38, %v481_v17 }
  0xb4   : > { %v450_v51 = vpop.permute.xlu1 %449 }
  0xb5   : > { %v448_v20 = vpop.permute.xlu0 %447  ;;  %v650_v54 = vsel %vm638_vm5, %v1784_v7, %v450_v51 }
  0xb6   : > { %v648_v22 = vsel %vm638_vm5, %v1775_v1, %v448_v20  ;;  %v667_v2 = vsel %vm655_vm6, %v650_v54, %v491_v55 }
  0xb7   : > { %v665_v41 = vsel %vm655_vm6, %v648_v22, %v489_v16 }
  0xb8   : > { %v510_v46 = vpop.permute.xlu1 %509 }
  0xb9   : > { %v502_v23 = vpop.permute.xlu0 %501  ;;  %v682_v43 = vsel %vm672_vm7, %v665_v41, %v510_v46 }
  0xba   : > { %v674_v45 = vsel %vm672_vm7, %v657_v30, %v502_v23 }
  0xbc   : > { %v512_v24 = vpop.permute.xlu1 %511 }
  0xbd   : > { %v504_v25 = vpop.permute.xlu0 %503  ;;  %v684_v7 = vsel %vm672_vm7, %v667_v2, %v512_v24 }
  0xbe   : > { %v676_v9 = vsel %vm672_vm7, %v659_v4, %v504_v25 }
  0xc0   : > { %v541_v26 = vpop.permute.xlu1 %540 }
  0xc1   : > { %v533_v27 = vpop.permute.xlu0 %532  ;;  %v699_v1 = vsel %vm689_vm8, %v682_v43, %v541_v26 }
  0xc2   : > { %v691_v3 = vsel %vm689_vm8, %v674_v45, %v533_v27 }
  0xc4   : > { %v543_v21 = vpop.permute.xlu1 %542 }
  0xc5   : > { %v535_v28 = vpop.permute.xlu0 %534  ;;  %v701_v6 = vsel %vm689_vm8, %v684_v7, %v543_v21 }
  0xc6   : > { %v693_v11 = vsel %vm689_vm8, %v676_v9, %v535_v28 }
  0xc8   : > { %v560_v29 = vpop.permute.xlu1 %559 }
  0xc9   : > { %v552_v10 = vpop.permute.xlu0 %551  ;;  %v716_v50 = vsel %vm706_vm9, %v699_v1, %v560_v29 }
  0xca   : > { %v708_v52 = vsel %vm706_vm9, %v691_v3, %v552_v10 }
  0xcc   : > { %v562_v32 = vpop.permute.xlu1 %561 }
  0xcd   : > { %v554_v33 = vpop.permute.xlu0 %553  ;;  %v718_v12 = vsel %vm706_vm9, %v701_v6, %v562_v32 }
  0xce   : > { %v710_v13 = vsel %vm706_vm9, %v693_v11, %v554_v33 }
  0xd0   : > { %v581_v34 = vpop.permute.xlu1 %580 }
  0xd1   : > { %v573_v35 = vpop.permute.xlu0 %572  ;;  %v733_v53 = vsel %vm723_vm10, %v716_v50, %v581_v34 }
  0xd2   : > { %v725_v56 = vsel %vm723_vm10, %v708_v52, %v573_v35 }
  0xd4   : > { %v583_v31 = vpop.permute.xlu1 %582 }
  0xd5   : > { %v575_v36 = vpop.permute.xlu0 %574  ;;  %v735_v14 = vsel %vm723_vm10, %v718_v12, %v583_v31 }
  0xd6   : > { %v727_v15 = vsel %vm723_vm10, %v710_v13, %v575_v36 }
  0xd8   : > { %v612_v37 = vpop.permute.xlu1 %611 }
  0xd9   : > { %v604_v39 = vpop.permute.xlu0 %603  ;;  %v750_v57 = vsel %vm740_vm11, %v733_v53, %v612_v37 }
  0xda   : > { %v742_v60 = vsel %vm740_vm11, %v725_v56, %v604_v39 }
  0xdc   : > { %v614_v44 = vpop.permute.xlu1 %613 }
  0xdd   : > { %v606_v48 = vpop.permute.xlu0 %605  ;;  %v752_v16 = vsel %vm740_vm11, %v735_v14, %v614_v44 }
  0xde   : > { %v744_v55 = vsel %vm740_vm11, %v727_v15, %v606_v48 }
  0xe0   : > { %v631_v58 = vpop.permute.xlu1 %630 }
  0xe1   : > { %v623_v62 = vpop.permute.xlu0 %622  ;;  %v767_v63 = vsel %vm757_vm12, %v750_v57, %v631_v58 }
  0xe2   : > { %v759_v0 = vsel %vm757_vm12, %v742_v60, %v623_v62  ;;  %1453 = vmatprep.mubr.msk.bf16.mxu1 %vm817_vm13, %v767_v63 }
  0xe3   : > { %1445 = vmatprep.mubr.msk.bf16.mxu0 %vm817_vm13, %v759_v0 }
  0xe4   : > { %v452_v5 = vpop.permute.xlu1 %451 }
  0xe5   : > { %v444_v8 = vpop.permute.xlu0 %443  ;;  %v652_v30 = vsel %vm638_vm5, %v1827_v47, %v452_v5 }
  0xe6   : > { %v644_v44 = vsel %vm638_vm5, %v1830_v49, %v444_v8 }
  0xe8   : > { %v633_v17 = vpop.permute.xlu1 %632 }
  0xe9   : > { %v769_v18 = vsel %vm757_vm12, %v752_v16, %v633_v17  ;;  %v625_v61 = vpop.permute.xlu0 %624 }
  0xea   : > { %v761_v19 = vsel %vm757_vm12, %v744_v55, %v625_v61  ;;  %1454 = vmatmul.mubr.msk.bf16.vlgmr.msra.gmra.mrb[0].mxu1 %vm817_vm13, %v769_v18  ;;  %v2111_v61 = vld [vmem:[%s2265_s2] ss:$0 sm:$0xff] }
  0xeb   : > { %1446 = vmatmul.mubr.msk.bf16.vlgmr.msra.gmra.mrb[0].mxu0 %vm817_vm13, %v761_v19 }
  0xec   : > { %v454_v51 = vpop.permute.xlu1 %453 }
  0xed   : > { %v446_v20 = vpop.permute.xlu0 %445  ;;  %v654_v54 = vsel %vm638_vm5, %v1913_v40, %v454_v51 }
  0xee   : > { %v646_v49 = vsel %vm638_vm5, %v1919_v42, %v446_v20  ;;  %vm2156_vm5 = vmor %vm1000_vm0, %vm1001_vm3 }
  0xf0   : > { %v493_v46 = vpop.permute.xlu1 %492 }
  0xf1   : > { %v485_v23 = vpop.permute.xlu0 %484  ;;  %v669_v45 = vsel %vm655_vm6, %v652_v30, %v493_v46 }
  0xf2   : > { %v661_v1 = vsel %vm655_vm6, %v644_v44, %v485_v23 }
  0xf4   : > { %v495_v24 = vpop.permute.xlu1 %494 }
  0xf5   : > { %v487_v25 = vpop.permute.xlu0 %486  ;;  %v671_v57 = vsel %vm655_vm6, %v654_v54, %v495_v24 }
  0xf6   : > { %v663_v60 = vsel %vm655_vm6, %v646_v49, %v487_v25 }
  0xf8   : > { %v514_v26 = vpop.permute.xlu1 %513 }
  0xf9   : > { %v506_v27 = vpop.permute.xlu0 %505  ;;  %v686_v48 = vsel %vm672_vm7, %v669_v45, %v514_v26 }
  0xfa   : > { %v678_v50 = vsel %vm672_vm7, %v661_v1, %v506_v27 }
  0xfc   : > { %v516_v21 = vpop.permute.xlu1 %515 }
  0xfd   : > { %v508_v28 = vpop.permute.xlu0 %507  ;;  %v688_v62 = vsel %vm672_vm7, %v671_v57, %v516_v21 }
  0xfe   : > { %v680_v2 = vsel %vm672_vm7, %v663_v60, %v508_v28 }
 0x100   : > { %v545_v29 = vpop.permute.xlu1 %544 }
 0x101   : > { %v537_v10 = vpop.permute.xlu0 %536  ;;  %v703_v52 = vsel %vm689_vm8, %v686_v48, %v545_v29 }
 0x102   : > { %v695_v47 = vsel %vm689_vm8, %v678_v50, %v537_v10 }
 0x104   : > { %v547_v32 = vpop.permute.xlu1 %546 }
 0x105   : > { %v539_v33 = vpop.permute.xlu0 %538  ;;  %v705_v7 = vsel %vm689_vm8, %v688_v62, %v547_v32 }
 0x106   : > { %v697_v9 = vsel %vm689_vm8, %v680_v2, %v539_v33  ;;  %v1383_v2 = vld [vmem:[%s2123_s29 + $0x3c] sm:$0xf] }
 0x108   : > { %v564_v34 = vpop.permute.xlu1 %563 }
 0x109   : > { %v556_v35 = vpop.permute.xlu0 %555  ;;  %v720_v56 = vsel %vm706_vm9, %v703_v52, %v564_v34 }
 0x10a   : > { %v712_v58 = vsel %vm706_vm9, %v695_v47, %v556_v35 }
 0x10c   : > { %v566_v31 = vpop.permute.xlu1 %565 }
 0x10d   : > { %v558_v36 = vpop.permute.xlu0 %557  ;;  %v722_v6 = vsel %vm706_vm9, %v705_v7, %v566_v31 }
 0x10e   : > { %v714_v11 = vsel %vm706_vm9, %v697_v9, %v558_v36 }
 0x110   : > { %v585_v22 = vpop.permute.xlu1 %584 }
 0x111   : > { %v577_v37 = vpop.permute.xlu0 %576  ;;  %v737_v59 = vsel %vm723_vm10, %v720_v56, %v585_v22 }
 0x112   : > { %v729_v63 = vsel %vm723_vm10, %v712_v58, %v577_v37  ;;  %v1388_v58 = vld [vmem:[%s2123_s29 + $0x48] sm:$0xf] }
 0x114   : > { %v587_v38 = vpop.permute.xlu1 %586 }
 0x115   : > { %v579_v39 = vpop.permute.xlu0 %578  ;;  %v739_v12 = vsel %vm723_vm10, %v722_v6, %v587_v38 }
 0x116   : > { %v731_v13 = vsel %vm723_vm10, %v714_v11, %v579_v39 }
 0x118   : > { %v616_v41 = vpop.permute.xlu1 %615 }
 0x119   : > { %v608_v43 = vpop.permute.xlu0 %607  ;;  %v754_v40 = vsel %vm740_vm11, %v737_v59, %v616_v41 }
 0x11a   : > { %v746_v42 = vsel %vm740_vm11, %v729_v63, %v608_v43 }
 0x11c   : > { %v618_v3 = vpop.permute.xlu1 %617 }
 0x11d   : > { %v610_v53 = vpop.permute.xlu0 %609  ;;  %v756_v14 = vsel %vm740_vm11, %v739_v12, %v618_v3 }
 0x11e   : > { %v748_v16 = vsel %vm740_vm11, %v731_v13, %v610_v53  ;;  %v1368_v53 = vld [vmem:[%s2123_s29 + $0x18] sm:$0xf] }
 0x120   : > { %v635_v0 = vpop.permute.xlu1 %634 }
 0x121   : > { %v771_v4 = vsel %vm757_vm12, %v754_v40, %v635_v0  ;;  %v627_v5 = vpop.permute.xlu0 %626 }
 0x122   : > { %v763_v8 = vsel %vm757_vm12, %v746_v42, %v627_v5  ;;  %1457 = vmatprep.mubr.msk.bf16.mxu1 %vm817_vm13, %v771_v4  ;;  %v1363_v4 = vld [vmem:[%s2123_s29 + $0xc] sm:$0xf] }
 0x123   : > { %1449 = vmatprep.mubr.msk.bf16.mxu0 %vm817_vm13, %v763_v8 }
 0x124   : > { %v637_v15 = vpop.permute.xlu1 %636 }
 0x125   : > { %v773_v17 = vsel %vm757_vm12, %v756_v14, %v637_v15  ;;  %v629_v55 = vpop.permute.xlu0 %628 }
 0x126   : > { %v765_v18 = vsel %vm757_vm12, %v748_v16, %v629_v55  ;;  %1458 = vmatmul.mubr.msk.bf16.gmra.mrb[4].mxu1 %vm817_vm13, %v773_v17  ;;  %v1371_v17 = vld [vmem:[%s2123_s29 + $0x20] sm:$0x1] }
 0x127   : > { %1450 = vmatmul.mubr.msk.bf16.gmra.mrb[4].mxu0 %vm817_vm13, %v765_v18 }
 0x1bd   : > { %v1455_v19 = vpop.f32.mrb[0].mxu1 }
 0x1be   : > { %v1447_v51 = vpop.f32.mrb[0].mxu0  ;;  %v913_v20 = vadd.f32 %v1455_v19, %v2111_v61  ;;  %v904_v46 = vpop.f32.mrb[1].mxu1 }
 0x1bf   : > { %v881_v23 = vadd.f32 %v1447_v51, %v2111_v61  ;;  %v872_v24 = vpop.f32.mrb[1].mxu0  ;;  %v905_v25 = vadd.f32 %v2111_v61, %v904_v46  ;;  %v1456_v26 = vpop.f32.mrb[2].mxu1 }
 0x1c0   : > { %v945_v27 = vmax.f32 %v913_v20, 0.0  ;;  %v873_v21 = vadd.f32 %v2111_v61, %v872_v24  ;;  %v1448_v28 = vpop.f32.mrb[2].mxu0  ;;  %v916_v29 = vadd.f32 %v1456_v26, %v2111_v61  ;;  %v907_v10 = vpop.f32.mrb[3].mxu1  ;;  %v1391_v20 = vld [vmem:[%s2123_s29 + $0x50] sm:$0x1] }
 0x1c1   : > { %v937_v32 = vmax.f32 %v881_v23, 0.0  ;;  %v943_v33 = vmax.f32 %v905_v25, 0.0  ;;  %v884_v34 = vadd.f32 %v1448_v28, %v2111_v61  ;;  %v875_v35 = vpop.f32.mrb[3].mxu0  ;;  %v908_v31 = vadd.f32 %v2111_v61, %v907_v10 }
 0x1c2   : > { %v1416_v36 = vpack.c.bf16 %v945_v27, %v945_v27  ;;  %v935_v22 = vmax.f32 %v873_v21, 0.0  ;;  %v946_v37 = vmax.f32 %v916_v29, 0.0  ;;  %v876_v45 = vadd.f32 %v2111_v61, %v875_v35 }
 0x1c3   : > { %v1408_v38 = vpack.c.bf16 %v937_v32, %v937_v32  ;;  %v1414_v39 = vpack.c.bf16 %v943_v33, %v943_v33  ;;  %v938_v41 = vmax.f32 %v884_v34, 0.0  ;;  %v944_v50 = vmax.f32 %v908_v31, 0.0 }
 0x1c4   : > { %v1089_v43 = vshrl.u32 %v1416_v36, 16  ;;  %v1406_v30 = vpack.c.bf16 %v935_v22, %v935_v22  ;;  %v1417_v44 = vpack.c.bf16 %v946_v37, %v946_v37  ;;  %v1092_v48 = vshll.u32 %v1416_v36, 16  ;;  %v1386_v22 = vld [vmem:[%s2123_s29 + $0x44] sm:$0x1] }
 0x1c5   : > { %v1021_v1 = vshrl.u32 %v1408_v38, 16  ;;  %v1072_v3 = vshrl.u32 %v1414_v39, 16  ;;  %v1024_v52 = vshll.u32 %v1408_v38, 16  ;;  %v1409_v56 = vpack.c.bf16 %v938_v41, %v938_v41 }
 0x1c6   : > { %v1091_v54 = vrot.slane %v1089_v43, 7  ;;  %v1004_v47 = vshrl.u32 %v1406_v30, 16  ;;  %v1075_v60 = vshll.u32 %v1414_v39, 16  ;;  %v1097_v62 = vshrl.u32 %v1417_v44, 16 }
 0x1c7   : > { %v1023_v49 = vrot.slane %v1021_v1, 7  ;;  %v1074_v59 = vrot.slane %v1072_v3, 7  ;;  %v1007_v0 = vshll.u32 %v1406_v30, 16  ;;  %v1029_v7 = vshrl.u32 %v1409_v56, 16  ;;  %v1366_v30 = vld [vmem:[%s2123_s29 + $0x14] sm:$0x1] }
 0x1c8   : > { %v1094_v63 = vor.u32 %v1092_v48, %v1091_v54  ;;  %v1006_v40 = vrot.slane %v1004_v47, 7  ;;  %v1100_v9 = vshll.u32 %v1417_v44, 16  ;;  %v1095_v6 = vrot.slane %v1091_v54, 4 }
 0x1c9   : > { %v1026_v42 = vor.u32 %v1024_v52, %v1023_v49  ;;  %v1077_v5 = vor.u32 %v1075_v60, %v1074_v59  ;;  %v1031_v12 = vrot.slane %v1029_v7, 7  ;;  %v1032_v15 = vshll.u32 %v1409_v56, 16 }
 0x1ca   : > { %v1208_v8 = vsel %vm2129_vm2, %v1094_v63, %v1388_v58  ;;  %v1009_v11 = vor.u32 %v1007_v0, %v1006_v40  ;;  %v1099_v55 = vrot.slane %v1097_v62, 7  ;;  %v936_v46 = vmax.f32 %v876_v45, 0.0 }
 0x1cb   : > { %v1180_v13 = vsel %vm2129_vm2, %v1026_v42, %v1368_v53  ;;  %1389 = vst [vmem:[%s2123_s29 + $0x48] sm:$0xf] %v1208_v8  ;;  %v1201_v14 = vsel %vm2129_vm2, %v1077_v5, %v1383_v2  ;;  %v1036_v51 = vrot.slane %v1031_v12, 4  ;;  %v1415_v23 = vpack.c.bf16 %v944_v50, %v944_v50 }
 0x1cc   : > { %1369 = vst [vmem:[%s2123_s29 + $0x18] sm:$0xf] %v1180_v13  ;;  %v1170_v18 = vsel %vm2129_vm2, %v1009_v11, %v1363_v4  ;;  %1384 = vst [vmem:[%s2123_s29 + $0x3c] sm:$0xf] %v1201_v14  ;;  %v1027_v24 = vrot.slane %v1023_v49, 4  ;;  %v1034_v25 = vor.u32 %v1032_v15, %v1031_v12  ;;  %v1102_v26 = vor.u32 %v1100_v9, %v1099_v55 }
 0x1cd   : > { %1364 = vst [vmem:[%s2123_s29 + $0xc] sm:$0xf] %v1170_v18  ;;  %v1104_v27 = vrot.slane %v1099_v55, 4  ;;  %v1184_v21 = vsel %vm2145_vm4, %v1036_v51, %v1371_v17  ;;  %v1407_v28 = vpack.c.bf16 %v936_v46, %v936_v46  ;;  %v1080_v29 = vshrl.u32 %v1415_v23, 16 }
 0x1ce   : > { %v1035_v10 = vsel %vm2156_vm5, %v1027_v24, %v1034_v25  ;;  %1372 = vst [vmem:[%s2123_s29 + $0x20] sm:$0x1] %v1184_v21  ;;  %v1103_v32 = vsel %vm2156_vm5, %v1095_v6, %v1102_v26  ;;  %v1083_v31 = vshll.u32 %v1415_v23, 16  ;;  %v1078_v36 = vrot.slane %v1074_v59, 4  ;;  %v1378_v24 = vld [vmem:[%s2123_s29 + $0x30] sm:$0xf] }
 0x1cf   : > { %v1212_v33 = vsel %vm2145_vm4, %v1104_v27, %v1391_v20  ;;  %1370 = vst.msk [vmem:[%s2123_s29 + $0x1c] sm:$0xf] %vm1166_vm14, %v1035_v10  ;;  %1390 = vst.msk [vmem:[%s2123_s29 + $0x4c] sm:$0xf] %vm1166_vm14, %v1103_v32  ;;  %v1012_v34 = vshrl.u32 %v1407_v28, 16  ;;  %v1082_v35 = vrot.slane %v1080_v29, 7 }
 0x1d0   : > { %1392 = vst [vmem:[%s2123_s29 + $0x50] sm:$0x1] %v1212_v33  ;;  %v1015_v38 = vshll.u32 %v1407_v28, 16  ;;  %v1010_v43 = vrot.slane %v1006_v40, 4 }
 0x1d1   : > { %v1014_v37 = vrot.slane %v1012_v34, 7  ;;  %v1085_v39 = vor.u32 %v1083_v31, %v1082_v35  ;;  %v1087_v41 = vrot.slane %v1082_v35, 4  ;;  %v1393_v35 = vld [vmem:[%s2123_s29 + $0x54] sm:$0xf] }
 0x1d3   : > { %v1017_v44 = vor.u32 %v1015_v38, %v1014_v37  ;;  %v1019_v45 = vrot.slane %v1014_v37, 4  ;;  %v1086_v1 = vsel %vm2156_vm5, %v1078_v36, %v1085_v39  ;;  %v1205_v48 = vsel %vm2145_vm4, %v1087_v41, %v1386_v22  ;;  %v1373_v22 = vld [vmem:[%s2123_s29 + $0x24] sm:$0xf] }
 0x1d4   : > { %1385 = vst.msk [vmem:[%s2123_s29 + $0x40] sm:$0xf] %vm1166_vm14, %v1086_v1  ;;  %1387 = vst [vmem:[%s2123_s29 + $0x44] sm:$0x1] %v1205_v48  ;;  %v1381_v48 = vld [vmem:[%s2123_s29 + $0x38] sm:$0x1] }
 0x1d5   : > { %v1018_v3 = vsel %vm2156_vm5, %v1010_v43, %v1017_v44  ;;  %v1177_v50 = vsel %vm2145_vm4, %v1019_v45, %v1366_v30 }
 0x1d6   : > { %1365 = vst.msk [vmem:[%s2123_s29 + $0x10] sm:$0xf] %vm1166_vm14, %v1018_v3  ;;  %1367 = vst [vmem:[%s2123_s29 + $0x14] sm:$0x1] %v1177_v50 }
 0x1f9   : > { %v1459_v52 = vpop.f32.mrb[4].mxu1 }
 0x1fa   : > { %v1451_v53 = vpop.f32.mrb[4].mxu0  ;;  %v929_v54 = vadd.f32 %v1459_v52, %v2111_v61  ;;  %v920_v47 = vpop.f32.mrb[5].mxu1 }
 0x1fb   : > { %v897_v56 = vadd.f32 %v1451_v53, %v2111_v61  ;;  %v888_v49 = vpop.f32.mrb[5].mxu0  ;;  %v921_v58 = vadd.f32 %v2111_v61, %v920_v47  ;;  %v1460_v59 = vpop.f32.mrb[6].mxu1  ;;  %v1401_v53 = vld [vmem:[%s2123_s29 + $0x68] sm:$0x1] }
 0x1fc   : > { %v949_v60 = vmax.f32 %v929_v54, 0.0  ;;  %v889_v62 = vadd.f32 %v2111_v61, %v888_v49  ;;  %v1452_v63 = vpop.f32.mrb[6].mxu0  ;;  %v932_v40 = vadd.f32 %v1460_v59, %v2111_v61  ;;  %v923_v0 = vpop.f32.mrb[7].mxu1 }
 0x1fd   : > { %v941_v2 = vmax.f32 %v897_v56, 0.0  ;;  %v947_v7 = vmax.f32 %v921_v58, 0.0  ;;  %v900_v42 = vadd.f32 %v1452_v63, %v2111_v61  ;;  %v891_v4 = vpop.f32.mrb[7].mxu0  ;;  %v924_v5 = vadd.f32 %v2111_v61, %v923_v0 }
 0x1fe   : > { %v1420_v9 = vpack.c.bf16 %v949_v60, %v949_v60  ;;  %v939_v6 = vmax.f32 %v889_v62, 0.0  ;;  %v950_v8 = vmax.f32 %v932_v40, 0.0  ;;  %v892_v11 = vadd.f32 %v2111_v61, %v891_v4  ;;  %v1398_v61 = vld [vmem:[%s2123_s29 + $0x60] sm:$0xf] }
 0x1ff   : > { %v1412_v12 = vpack.c.bf16 %v941_v2, %v941_v2  ;;  %v1418_v13 = vpack.c.bf16 %v947_v7, %v947_v7  ;;  %v942_v14 = vmax.f32 %v900_v42, 0.0  ;;  %v948_v46 = vmax.f32 %v924_v5, 0.0  ;;  %v1396_v5 = vld [vmem:[%s2123_s29 + $0x5c] sm:$0x1] }
 0x200   : > { %v1123_v15 = vshrl.u32 %v1420_v9, 16  ;;  %v1410_v17 = vpack.c.bf16 %v939_v6, %v939_v6  ;;  %v1421_v55 = vpack.c.bf16 %v950_v8, %v950_v8  ;;  %v1126_v51 = vshll.u32 %v1420_v9, 16 }
 0x201   : > { %v1055_v18 = vshrl.u32 %v1412_v12, 16  ;;  %v1106_v20 = vshrl.u32 %v1418_v13, 16  ;;  %v1058_v23 = vshll.u32 %v1412_v12, 16  ;;  %v1413_v27 = vpack.c.bf16 %v942_v14, %v942_v14 }
 0x202   : > { %v1125_v25 = vrot.slane %v1123_v15, 7  ;;  %v1038_v26 = vshrl.u32 %v1410_v17, 16  ;;  %v1109_v29 = vshll.u32 %v1418_v13, 16  ;;  %v1131_v10 = vshrl.u32 %v1421_v55, 16  ;;  %v1376_v13 = vld [vmem:[%s2123_s29 + $0x2c] sm:$0x1] }
 0x203   : > { %v1057_v21 = vrot.slane %v1055_v18, 7  ;;  %v1108_v28 = vrot.slane %v1106_v20, 7  ;;  %v1041_v34 = vshll.u32 %v1410_v17, 16  ;;  %v1063_v31 = vshrl.u32 %v1413_v27, 16 }
 0x204   : > { %v1128_v32 = vor.u32 %v1126_v51, %v1125_v25  ;;  %v1040_v33 = vrot.slane %v1038_v26, 7  ;;  %v1134_v38 = vshll.u32 %v1421_v55, 16  ;;  %v1129_v39 = vrot.slane %v1125_v25, 4 }
 0x205   : > { %v1060_v36 = vor.u32 %v1058_v23, %v1057_v21  ;;  %v1111_v37 = vor.u32 %v1109_v29, %v1108_v28  ;;  %v1065_v30 = vrot.slane %v1063_v31, 7  ;;  %v1066_v1 = vshll.u32 %v1413_v27, 16 }
 0x206   : > { %v1222_v41 = vsel %vm2129_vm2, %v1128_v32, %v1398_v61  ;;  %v1043_v43 = vor.u32 %v1041_v34, %v1040_v33  ;;  %v1133_v3 = vrot.slane %v1131_v10, 7  ;;  %v940_v54 = vmax.f32 %v892_v11, 0.0 }
 0x207   : > { %v1194_v44 = vsel %vm2129_vm2, %v1060_v36, %v1378_v24  ;;  %1399 = vst [vmem:[%s2123_s29 + $0x60] sm:$0xf] %v1222_v41  ;;  %v1215_v45 = vsel %vm2129_vm2, %v1111_v37, %v1393_v35  ;;  %v1070_v52 = vrot.slane %v1065_v30, 4  ;;  %v1419_v47 = vpack.c.bf16 %v948_v46, %v948_v46 }
 0x208   : > { %1379 = vst [vmem:[%s2123_s29 + $0x30] sm:$0xf] %v1194_v44  ;;  %v1187_v50 = vsel %vm2129_vm2, %v1043_v43, %v1373_v22  ;;  %1394 = vst [vmem:[%s2123_s29 + $0x54] sm:$0xf] %v1215_v45  ;;  %v1061_v56 = vrot.slane %v1057_v21, 4  ;;  %v1068_v49 = vor.u32 %v1066_v1, %v1065_v30  ;;  %v1136_v58 = vor.u32 %v1134_v38, %v1133_v3 }
 0x209   : > { %1374 = vst [vmem:[%s2123_s29 + $0x24] sm:$0xf] %v1187_v50  ;;  %v1138_v59 = vrot.slane %v1133_v3, 4  ;;  %v1198_v60 = vsel %vm2145_vm4, %v1070_v52, %v1381_v48  ;;  %v1411_v57 = vpack.c.bf16 %v940_v54, %v940_v54  ;;  %v1114_v62 = vshrl.u32 %v1419_v47, 16 }
 0x20a   : > { %v1069_v63 = vsel %vm2156_vm5, %v1061_v56, %v1068_v49  ;;  %1382 = vst [vmem:[%s2123_s29 + $0x38] sm:$0x1] %v1198_v60  ;;  %v1137_v40 = vsel %vm2156_vm5, %v1129_v39, %v1136_v58  ;;  %v1117_v42 = vshll.u32 %v1419_v47, 16  ;;  %v1112_v4 = vrot.slane %v1108_v28, 4 }
 0x20b   : > { %v1226_v0 = vsel %vm2145_vm4, %v1138_v59, %v1401_v53  ;;  %1380 = vst.msk [vmem:[%s2123_s29 + $0x34] sm:$0xf] %vm1166_vm14, %v1069_v63  ;;  %1400 = vst.msk [vmem:[%s2123_s29 + $0x64] sm:$0xf] %vm1166_vm14, %v1137_v40  ;;  %v1046_v2 = vshrl.u32 %v1411_v57, 16  ;;  %v1116_v7 = vrot.slane %v1114_v62, 7 }
 0x20c   : > { %1402 = vst [vmem:[%s2123_s29 + $0x68] sm:$0x1] %v1226_v0  ;;  %v1049_v6 = vshll.u32 %v1411_v57, 16  ;;  %v1044_v12 = vrot.slane %v1040_v33, 4 }
 0x20d   : > { %v1048_v9 = vrot.slane %v1046_v2, 7  ;;  %v1119_v8 = vor.u32 %v1117_v42, %v1116_v7  ;;  %v1121_v11 = vrot.slane %v1116_v7, 4 }
 0x20f   : > { %v1051_v14 = vor.u32 %v1049_v6, %v1048_v9  ;;  %v1053_v15 = vrot.slane %v1048_v9, 4  ;;  %v1120_v17 = vsel %vm2156_vm5, %v1112_v4, %v1119_v8  ;;  %v1219_v55 = vsel %vm2145_vm4, %v1121_v11, %v1396_v5 }
 0x210   : > { %1395 = vst.msk [vmem:[%s2123_s29 + $0x58] sm:$0xf] %vm1166_vm14, %v1120_v17  ;;  %1397 = vst [vmem:[%s2123_s29 + $0x5c] sm:$0x1] %v1219_v55 }
 0x211   : > { %v1052_v18 = vsel %vm2156_vm5, %v1044_v12, %v1051_v14  ;;  %v1191_v51 = vsel %vm2145_vm4, %v1053_v15, %v1376_v13 }
 0x212   : > { %1375 = vst.msk [vmem:[%s2123_s29 + $0x28] sm:$0xf] %vm1166_vm14, %v1052_v18  ;;  %1377 = vst [vmem:[%s2123_s29 + $0x2c] sm:$0x1] %v1191_v51 }
 0x213 PF: > { %s13_s16 = sadd.s32 1, %s1586_s16   ;;  %s2273_s12 = smov %s1578_s14 }
 0x214   : > { %p10_p7 = scmp.ge.s32.totalorder %s13_s16, 6   ;;  %s2274_s13 = smov %s1582_s15 }
 0x215   : > { %s2275_s14 = smov %s2278_s17  ;;  %s2276_s15 = smov %s2282_s18 }
 0x216   :  { %12 = sbr.rel (!%p10_p7) target bundleno = 3 (0x3), region = 68 }

// kernel: model_forward.5
= control target key start
LH: loop header
LB: loop body
LE: loop exit
PB: predicated region body
PF: predicated region fallthrough
CT: control target
= control target key end

     0   :  { %s1914_s23 = smov 0   ;;  %s1916_s24 = smov 0   ;;  %s2545_s0 = inlined_call_operand.vmem [shape: bf16[2,18,18,32], index: 0, kind: input, shape index: {}]   ;;  %s2546_s1 = inlined_call_operand.vmem [shape: bf16[288,32], index: 1, kind: input, shape index: {}]   ;;  %s2547_s2 = inlined_call_operand.vmem [shape: f32[1,32], index: 2, kind: input, shape index: {}]   ;;  %s2548_s3 = inlined_call_operand.vmem [shape: bf16[2,18,18,32], index: 3, kind: input, shape index: {}]   ;;  %s2549_s4 = inlined_call_operand.vmem [shape: f32[1,32], index: 4, kind: input, shape index: {}]   ;;  %s2550_s5 = inlined_call_operand.<no memory space> [shape: f32[1,1], index: 5, kind: input, shape index: {}]   ;;  %s2551_s6 = inlined_call_operand.vmem [shape: f32[2,1], index: 6, kind: output, shape index: {}]  }
   0x1   :  { %v11_v0 = vstv %s2550_s5  ;;  %s1918_s25 = smov 0   ;;  %s1920_s26 = smov 0  }
   0x2   :  { %12 = vst [vmem:[#allocation3] sm:$0x1] %v11_v0  ;;  %s1922_s27 = smov 0  }
   0x3 LB: > { %s27_s5 = sadd.s32 1, %s1861_s25  ;;  %s30_s28 = sadd.s32 1, %s1865_s26  ;;  %s1869_s27 = sphi %s1922_s27, %s18_s27   ;;  %s1865_s26 = sphi %s1920_s26, %s2557_s26   ;;  %s1861_s25 = sphi %s1918_s25, %s2556_s25   ;;  %s1857_s24 = sphi %s1916_s24, %s2555_s24   ;;  %s1853_s23 = sphi %s1914_s23, %s2554_s23  }
   0x4   : > { %p28_p0 = scmp.ge.s32.totalorder %s27_s5, 2  ;;  %p1553_p1 = scmp.ge.s32.totalorder %s1869_s27, 1 }
   0x5   : > { %p231_p2 = scmp.lt.s32.totalorder %s1869_s27, 5 }
   0x6   : > { %s2559_s5 = smov (%p28_p0, %s27_s5), 0  ;;  %s2561_s28 = smov (!%p28_p0, %s30_s28), %s1865_s26 }
   0x7   : > { %p232_p3 = pnand %p1553_p1, %p231_p2  ;;  %p32_p4 = scmp.ge.s32.totalorder %s2561_s28, 2 }
   0x8   : > { %p261_p5 = scmp.lt.s32.totalorder (!%p232_p3), %s1857_s24, 1  ;;  %p272_p6 = scmp.eq.s32.totalorder (!%p232_p3), %s1857_s24, 0 }
   0x9   : > { %s2563_s28 = smov (%p32_p4, %s2561_s28), 0  ;;  %235 = sbr.rel (%p232_p3) target bundleno = 662 (0x296), region = 44 }
   0xa   : > { %p273_p7 = scmp.eq.s32.totalorder (!%p232_p3), %s1853_s23, 0 }
   0xc   : > { %p274_p8 = pnand (!%p232_p3), %p273_p7, %p272_p6 }
  0x10   : > { %s262_s29 = scalar_select %p261_p5, %s1857_s24, 1 }
  0x11   : > { %277 = sbr.rel (%p274_p8) target bundleno = 24 (0x18), region = 48  ;;  %vm278_vm0 = vcmask (!%p274_p8), 1024   ;;  %v1871_v1 = vmov (!%p274_p8), 0.0  }
  0x12   : > { %s1747_s30 = smul.u32 216, %s262_s29  ;;  %279 = vst.msk [vmem:[%s2551_s6] sm:$0x3] (!%p274_p8), %vm278_vm0, %v1871_v1 }
  0x14   : > { %s265_s9 = scalar_lea.vmem %s2545_s0, %s1747_s30  ;;  %s1958_s12 = scalar_lea.vmem %s2548_s3, %s1747_s30 }
  0x18 PF: > { %p1556_p9 = scmp.ne.s32.totalorder %s1853_s23, 0 }
  0x19   : > { %vm283_vm1 = vcmask (!%p1556_p9), 253952   ;;  %v1872_v2 = vmov (!%p1556_p9), 0.0  }
  0x1a   : > { %282 = sbr.rel (%p1556_p9) target bundleno = 33 (0x21), region = 52  ;;  %284 = vst.msk [vmem:[#allocation2] sm:$0x1] (!%p1556_p9), %vm283_vm1, %v1872_v2 }
  0x21 PF: > { %s1636_s15 = smul.u32 96, %s1853_s23  ;;  %v1813_v3 = vld [vmem:[%s2546_s1 + $0x40] sm:$0xff]   ;;  %vm496_vm2 = vcmask 1046528   ;;  %s1873_s21 = smov 64   ;;  %vm383_vm3 = vsmask.f32 7424 }
  0x22   : > { %1637 = vmatprep.subr.bf16.mxu0 %v1813_v3  ;;  %v1814_v4 = vld [vmem:[%s2546_s1] sm:$0xff]   ;;  %1731 = vmatprep.subr.bf16.mxu1 %v1813_v3  ;;  %s1874_s22 = smov 96   ;;  %s1875_s29 = smov 32   ;;  %v1815_v2 = vld [vmem:[%s2546_s1 + $0x48] sm:$0xff]   ;;  %vm647_vm4 = vcmask 261120   ;;  %vm664_vm5 = vcmask 523264  }
  0x23   : > { %s1970_s18 = scalar_lea.vmem %s265_s9, %s1636_s15  ;;  %1638 = vmatpush3.bf16.msra.mxu0 %v1814_v4  ;;  %1739 = vmatpush3.bf16.msra.mxu1 %v1814_v4  ;;  %v1816_v3 = vld [vmem:[%s2546_s1 + $0x8] sm:$0xff]   ;;  %vm681_vm6 = vcmask 785408   ;;  %vm834_vm7 = vsmask.f32 3328  ;;  %vm835_vm8 = vsmask.f32 7440 }
  0x24   : > { %v1976_v5 = vld [vmem:[%s1970_s18 + $0x18] sm:$0xff]   ;;  %v1981_v6 = vld [vmem:[%s1970_s18 + $0xc] sm:$0xff]   ;;  %v1795_v7 = vld [vmem:[%s1970_s18 + $0x14] ss:$0 sps:$4 sm:$0x11]   ;;  %1639 = vmatprep.subr.bf16.mxu0 %v1815_v2  ;;  %1732 = vmatprep.subr.bf16.mxu1 %v1815_v2  ;;  %vm1465_vm10 = vcmask 253952  }
  0x25   : > { %597 = vrot.lane.b32.xlu1 %v1976_v5, %s1873_s21  ;;  %v1796_v8 = vld [vmem:[%s1970_s18 + $0x20] ss:$0 sps:$4 sm:$0x11]   ;;  %v503_v9 = vrot.slane %v1976_v5, 1  ;;  %v500_v10 = vrot.slane %v1981_v6, 1  ;;  %v501_v11 = vrot.slane %v1795_v7, 1  ;;  %vm2372_vm9 = vmor %vm834_vm7, %vm835_vm8 }
  0x26   : > { %v504_v12 = vrot.slane %v1796_v8, 1  ;;  %v1988_v13 = vld [vmem:[%s1970_s18] sm:$0xff]   ;;  %v1798_v14 = vld [vmem:[%s1970_s18 + $0x8] ss:$0 sps:$4 sm:$0x11]   ;;  %v1992_v15 = vld [vmem:[%s1970_s18 + $0x54] sm:$0xff]  }
  0x27   : > { %v1995_v16 = vsel %vm496_vm2, %v500_v10, %v501_v11  ;;  %v497_v18 = vrot.slane %v1988_v13, 1  ;;  %v498_v19 = vrot.slane %v1798_v14, 1  ;;  %v385_v20 = vshrl.u32 %v1988_v13, 16  ;;  %v2007_v21 = vld [vmem:[%s1970_s18 + $0x5c] ss:$0 sps:$4 sm:$0x11]   ;;  %1640 = vmatpush3.bf16.msra.mxu0 %v1816_v3  ;;  %1740 = vmatpush3.bf16.msra.mxu1 %v1816_v3 }
  0x28   : > { %576 = vrot.lane.b32.xlu0 %v1995_v16, %s1875_s29  ;;  %v2002_v17 = vsel %vm496_vm2, %v503_v9, %v504_v12  ;;  %v387_v22 = vshll.u32 %v1988_v13, 16  ;;  %v392_v23 = vshll.u32 %v1798_v14, 16  ;;  %v518_v24 = vrot.slane %v1992_v15, 1  ;;  %v2016_v30 = vld [vmem:[%s1970_s18 + $0x48] sm:$0xff]   ;;  %v2030_v44 = vld [vmem:[%s1970_s18 + $0x60] sm:$0xff]   ;;  %v1818_v14 = vld [vmem:[%s2546_s1 + $0x10] sm:$0xff]  }
  0x29   : > { %542 = vrot.lane.b32.xlu1 %v1981_v6, %s1874_s22  ;;  %v409_v25 = vshrl.u32 %v1976_v5, 16  ;;  %v499_v26 = vsel %vm496_vm2, %v497_v18, %v498_v19  ;;  %v519_v27 = vrot.slane %v2007_v21, 1  ;;  %v411_v28 = vshll.u32 %v1976_v5, 16  ;;  %v1802_v38 = vld [vmem:[%s1970_s18 + $0x50] ss:$0 sps:$4 sm:$0x11]  }
  0x2a   : > { %v416_v29 = vshll.u32 %v1796_v8, 16  ;;  %v389_v31 = vrot.slane %v387_v22, 1  ;;  %v394_v32 = vrot.slane %v392_v23, 1  ;;  %v397_v33 = vshrl.u32 %v1981_v6, 16  ;;  %v2043_v55 = vld [vmem:[%s1970_s18 + $0x24] sm:$0xff]   ;;  %v1817_v8 = vld [vmem:[%s2546_s1 + $0x50] sm:$0xff]  }
  0x2b   : > { %v399_v34 = vshll.u32 %v1981_v6, 16  ;;  %v2024_v35 = vsel %vm496_vm2, %v518_v24, %v519_v27  ;;  %v413_v36 = vrot.slane %v411_v28, 1  ;;  %v457_v39 = vshrl.u32 %v2016_v30, 16  ;;  %v2037_v52 = vld [vmem:[%s1970_s18 + $0x68] ss:$0 sps:$4 sm:$0x11]   ;;  %1641 = vmatprep.subr.bf16.mxu0 %v1817_v8  ;;  %1733 = vmatprep.subr.bf16.mxu1 %v1817_v8 }
  0x2c   : > { %578 = vrot.lane.b32.xlu0 %v2002_v17, %s1875_s29  ;;  %v418_v37 = vrot.slane %v416_v29, 1  ;;  %v390_v40 = vor.u32 %v389_v31, %v385_v20  ;;  %v459_v41 = vshll.u32 %v2016_v30, 16  ;;  %v404_v43 = vshll.u32 %v1795_v7, 16  ;;  %v2058_v61 = vld [vmem:[%s1970_s18 + $0x2c] ss:$0 sps:$4 sm:$0x11]   ;;  %1642 = vmatpush3.bf16.msra.mxu0 %v1818_v14 }
  0x2d   : > { %521 = vrot.lane.b32.xlu1 %v499_v26, %s1873_s21  ;;  %v401_v42 = vrot.slane %v399_v34, 1  ;;  %v414_v45 = vor.u32 %v413_v36, %v409_v25  ;;  %v464_v46 = vshll.u32 %v1802_v38, 16  ;;  %v564_v56 = vshll.u32 %v2030_v44, 16  ;;  %v1819_v23 = vld [vmem:[%s2546_s1 + $0x58] sm:$0xff]   ;;  %1741 = vmatpush3.bf16.msra.mxu1 %v1818_v14  ;;  %v1822_v34 = vld [vmem:[%s2546_s1 + $0x20] sm:$0xff]   ;;  %p1633_p10 = scmp.ne.s32.totalorder %s1853_s23, 1 }
  0x2e   : > { %v395_v47 = vsel %vm383_vm3, %v390_v40, %v394_v32  ;;  %v461_v48 = vrot.slane %v459_v41, 1  ;;  %v406_v51 = vrot.slane %v404_v43, 1  ;;  %v515_v58 = vrot.slane %v2016_v30, 1  ;;  %v1820_v27 = vld [vmem:[%s2546_s1 + $0x18] sm:$0xff]   ;;  %1643 = vmatprep.subr.bf16.mxu0 %v1819_v23  ;;  %1734 = vmatprep.subr.bf16.mxu1 %v1819_v23  ;;  %v2110_v32 = vld [vmem:[%s1970_s18 + $0x6c] sm:$0xff]  }
  0x2f   : > { %v466_v49 = vrot.slane %v464_v46, 1  ;;  %v402_v50 = vor.u32 %v401_v42, %v397_v33  ;;  %v2040_v53 = vsel %vm383_vm3, %v414_v45, %v418_v37  ;;  %v516_v60 = vrot.slane %v1802_v38, 1  ;;  %v1821_v33 = vld [vmem:[%s2546_s1 + $0x60] sm:$0xff]   ;;  %v1824_v40 = vld [vmem:[%s2546_s1 + $0x28] sm:$0xff]   ;;  %v2134_v41 = vld [vmem:[%s1970_s18 + $0x30] sm:$0xff]  }
  0x30   : > { %480 = vrot.lane.b32.xlu0 %v395_v47, %s1875_s29  ;;  %v462_v54 = vor.u32 %v461_v48, %v457_v39  ;;  %v562_v62 = vshrl.u32 %v2030_v44, 16  ;;  %v566_v63 = vrot.slane %v564_v56, 1  ;;  %v569_v0 = vshll.u32 %v2037_v52, 16  ;;  %1644 = vmatpush3.bf16.msra.mxu0 %v1820_v27  ;;  %v1823_v39 = vld [vmem:[%s2546_s1 + $0x68] sm:$0xff]   ;;  %v1825_v42 = vld [vmem:[%s2546_s1 + $0x70] sm:$0xff]  }
  0x31   : > { %588 = vrot.lane.b32.xlu1 %v2024_v35, %s1875_s29  ;;  %v2055_v59 = vsel %vm383_vm3, %v402_v50, %v406_v51  ;;  %v423_v1 = vshll.u32 %v2043_v55, 16  ;;  %v2074_v4 = vsel %vm496_vm2, %v515_v58, %v516_v60  ;;  %v421_v7 = vshrl.u32 %v2043_v55, 16  ;;  %1742 = vmatpush3.bf16.msra.mxu1 %v1820_v27  ;;  %v2144_v43 = vld [vmem:[%s1970_s18 + $0x74] ss:$0 sps:$4 sm:$0x11]   ;;  %v1828_v58 = vld [vmem:[%s2546_s1 + $0x38] sm:$0xff]  }
  0x32   : > { %v2047_v57 = vsel %vm383_vm3, %v462_v54, %v466_v49  ;;  %v567_v9 = vor.u32 %v566_v63, %v562_v62  ;;  %v571_v10 = vrot.slane %v569_v0, 1  ;;  %v428_v12 = vshll.u32 %v2058_v61, 16  ;;  %1645 = vmatprep.subr.bf16.mxu0 %v1821_v33  ;;  %1735 = vmatprep.subr.bf16.mxu1 %v1821_v33  ;;  %v1826_v48 = vld [vmem:[%s2546_s1 + $0x30] sm:$0xff]   ;;  %v1827_v49 = vld [vmem:[%s2546_s1 + $0x78] sm:$0xff]   ;;  %v2173_v60 = vld [vmem:[%s2546_s1 + $0x80] sm:$0xff]  }
  0x33   : > { %v425_v11 = vrot.slane %v423_v1, 1  ;;  %v471_v18 = vshll.u32 %v1992_v15, 16  ;;  %v573_v24 = vrot.slane %v2030_v44, 1  ;;  %v574_v25 = vrot.slane %v2037_v52, 1 }
  0x34   : > { %628 = vrot.lane.b32.xlu0 %v2040_v53, %s1874_s22  ;;  %v2090_v19 = vsel %vm383_vm3, %v567_v9, %v571_v10  ;;  %v430_v22 = vrot.slane %v428_v12, 1  ;;  %v469_v26 = vshrl.u32 %v1992_v15, 16  ;;  %v476_v29 = vshll.u32 %v2007_v21, 16  ;;  %1646 = vmatpush3.bf16.msra.mxu0 %v1822_v34  ;;  %v1810_v54 = vld [vmem:[%s1970_s18 + $0x38] ss:$0 sps:$4 sm:$0x11]  }
  0x35   : > { %492 = vrot.lane.b32.xlu1 %v2047_v57, %s1875_s29  ;;  %v426_v20 = vor.u32 %v425_v11, %v421_v7  ;;  %v473_v28 = vrot.slane %v471_v18, 1  ;;  %v507_v21 = vrot.slane %v2058_v61, 1  ;;  %v2125_v36 = vsel %vm496_vm2, %v573_v24, %v574_v25  ;;  %1743 = vmatpush3.bf16.msra.mxu1 %v1822_v34  ;;  %v2193_v9 = vld [vmem:[%s1970_s18 + $0x3c] sm:$0xff]   ;;  %v1812_v12 = vld [vmem:[%s1970_s18 + $0x44] ss:$0 sps:$4 sm:$0x11]  }
  0x36   : > { %v478_v38 = vrot.slane %v476_v29, 1  ;;  %1647 = vmatprep.subr.bf16.mxu0 %v1823_v39  ;;  %1736 = vmatprep.subr.bf16.mxu1 %v1823_v39  ;;  %v619_v47 = vshll.u32 %v2110_v32, 16  ;;  %v617_v50 = vshrl.u32 %v2110_v32, 16  ;;  %v624_v52 = vshll.u32 %v2144_v43, 16 }
  0x37   : > { %v2107_v31 = vsel %vm383_vm3, %v426_v20, %v430_v22  ;;  %v474_v37 = vor.u32 %v473_v28, %v469_v26  ;;  %v435_v56 = vshll.u32 %v2134_v41, 16  ;;  %v433_v61 = vshrl.u32 %v2134_v41, 16 }
  0x38   : > { %482 = vrot.lane.b32.xlu0 %v2055_v59, %s1875_s29  ;;  %1648 = vmatpush3.bf16.msra.mxu0 %v1824_v40  ;;  %v621_v51 = vrot.slane %v619_v47, 1  ;;  %v626_v63 = vrot.slane %v624_v52, 1  ;;  %v440_v1 = vshll.u32 %v1810_v54, 16  ;;  %v509_v10 = vrot.slane %v2134_v41, 1 }
  0x39   : > { %609 = vrot.lane.b32.xlu1 %v2030_v44, %s1873_s21  ;;  %v2150_v46 = vsel %vm383_vm3, %v474_v37, %v478_v38  ;;  %1744 = vmatpush3.bf16.msra.mxu1 %v1824_v40  ;;  %v437_v0 = vrot.slane %v435_v56, 1  ;;  %v510_v11 = vrot.slane %v1810_v54, 1  ;;  %v447_v14 = vshll.u32 %v2193_v9, 16 }
  0x3a   : > { %1649 = vmatprep.subr.bf16.mxu0 %v1825_v42  ;;  %1737 = vmatprep.subr.bf16.mxu1 %v1825_v42  ;;  %v622_v62 = vor.u32 %v621_v51, %v617_v50  ;;  %v442_v7 = vrot.slane %v440_v1, 1  ;;  %v445_v20 = vshrl.u32 %v2193_v9, 16  ;;  %v452_v23 = vshll.u32 %v1812_v12, 16 }
  0x3b   : > { %v438_v3 = vor.u32 %v437_v0, %v433_v61  ;;  %v2207_v18 = vsel %vm496_vm2, %v509_v10, %v510_v11  ;;  %v449_v22 = vrot.slane %v447_v14, 1  ;;  %v512_v26 = vrot.slane %v2193_v9, 1 }
  0x3c   : > { %599 = vrot.lane.b32.xlu0 %v2043_v55, %s1873_s21  ;;  %1650 = vmatpush3.bf16.msra.mxu0 %v1826_v48  ;;  %v627_v2 = vsel %vm383_vm3, %v622_v62, %v626_v63  ;;  %v454_v24 = vrot.slane %v452_v23, 1  ;;  %v513_v27 = vrot.slane %v1812_v12, 1  ;;  %v644_v29 = vrot.slane %v2110_v32, 1 }
  0x3d   : > { %533 = vrot.lane.b32.xlu1 %v2074_v4, %s1873_s21  ;;  %1745 = vmatpush3.bf16.msra.mxu1 %v1826_v48  ;;  %v2190_v8 = vsel %vm383_vm3, %v438_v3, %v442_v7  ;;  %v645_v33 = vrot.slane %v2144_v43, 1  ;;  %vm1491_vm12 = vcmask (!%p1633_p10), 1024  }
  0x3e   : > { %1651 = vmatprep.subr.bf16.mxu0 %v1827_v49  ;;  %1738 = vmatprep.subr.bf16.mxu1 %v1827_v49  ;;  %v2227_v28 = vsel %vm496_vm2, %v512_v26, %v513_v27 }
  0x40   : > { %523 = vrot.lane.b32.xlu0 %v1995_v16, %s1873_s21  ;;  %v506_v16 = vrot.slane %v2043_v55, 1  ;;  %1652 = vmatpush3.bf16.msra.mxu0 %v1828_v58 }
  0x41   : > { %640 = vrot.lane.b32.xlu1 %v2090_v19, %s1874_s22  ;;  %1746 = vmatpush3.bf16.msra.mxu1 %v1828_v58 }
  0x42   : > { %v2147_v45 = vsel %vm496_vm2, %v506_v16, %v507_v21  ;;  %1711 = vmatprep.subr.bf16.mxu1 %v2173_v60  ;;  %v2236_v16 = vsel %vm496_vm2, %v644_v29, %v645_v33 }
  0x44   : > { %630 = vrot.lane.b32.xlu0 %v2107_v31, %s1874_s22 }
  0x45   : > { %554 = vrot.lane.b32.xlu1 %v1992_v15, %s1874_s22 }
  0x48   : > { %544 = vrot.lane.b32.xlu0 %v1976_v5, %s1874_s22 }
  0x49   : > { %590 = vrot.lane.b32.xlu1 %v2125_v36, %s1875_s29 }
  0x4c   : > { %580 = vrot.lane.b32.xlu0 %v2147_v45, %s1875_s29 }
  0x4d   : > { %494 = vrot.lane.b32.xlu1 %v2150_v46, %s1875_s29 }
  0x50   : > { %484 = vrot.lane.b32.xlu0 %v2040_v53, %s1875_s29 }
  0x51   : > { %611 = vrot.lane.b32.xlu1 %v2110_v32, %s1873_s21 }
  0x54   : > { %601 = vrot.lane.b32.xlu0 %v2134_v41, %s1873_s21 }
  0x55   : > { %535 = vrot.lane.b32.xlu1 %v2024_v35, %s1873_s21 }
  0x58   : > { %525 = vrot.lane.b32.xlu0 %v2002_v17, %s1873_s21 }
  0x59   : > { %642 = vrot.lane.b32.xlu1 %v627_v2, %s1874_s22 }
  0x5c   : > { %632 = vrot.lane.b32.xlu0 %v2190_v8, %s1874_s22 }
  0x5d   : > { %556 = vrot.lane.b32.xlu1 %v2030_v44, %s1874_s22  ;;  %v450_v44 = vor.u32 %v449_v22, %v445_v20 }
  0x5f   : > { %v2219_v25 = vsel %vm383_vm3, %v450_v44, %v454_v24 }
  0x60   : > { %546 = vrot.lane.b32.xlu0 %v2043_v55, %s1874_s22 }
  0x61   : > { %486 = vrot.lane.b32.xlu1 %v2107_v31, %s1875_s29 }
  0x64   : > { %582 = vrot.lane.b32.xlu0 %v2207_v18, %s1875_s29 }
  0x65   : > { %527 = vrot.lane.b32.xlu1 %v2147_v45, %s1873_s21 }
  0x68   : > { %603 = vrot.lane.b32.xlu0 %v2193_v9, %s1873_s21 }
  0x69   : > { %548 = vrot.lane.b32.xlu1 %v2134_v41, %s1874_s22 }
  0x6c   : > { %634 = vrot.lane.b32.xlu0 %v2219_v25, %s1874_s22 }
  0x6d   : > { %488 = vrot.lane.b32.xlu1 %v2190_v8, %s1875_s29 }
  0x70   : > { %584 = vrot.lane.b32.xlu0 %v2227_v28, %s1875_s29 }
  0x71   : > { %529 = vrot.lane.b32.xlu1 %v2207_v18, %s1873_s21 }
  0x74   : > { %605 = vrot.lane.b32.xlu0 %v2016_v30, %s1873_s21 }
  0x75   : > { %550 = vrot.lane.b32.xlu1 %v2193_v9, %s1874_s22 }
  0x78   : > { %636 = vrot.lane.b32.xlu0 %v2047_v57, %s1874_s22 }
  0x79   : > { %490 = vrot.lane.b32.xlu1 %v2219_v25, %s1875_s29 }
  0x7c   : > { %586 = vrot.lane.b32.xlu0 %v2074_v4, %s1875_s29 }
  0x7d   : > { %531 = vrot.lane.b32.xlu1 %v2227_v28, %s1873_s21 }
  0x80   : > { %607 = vrot.lane.b32.xlu0 %v1992_v15, %s1873_s21 }
  0x81   : > { %552 = vrot.lane.b32.xlu1 %v2016_v30, %s1874_s22 }
  0x84   : > { %638 = vrot.lane.b32.xlu0 %v2150_v46, %s1874_s22  ;;  %s2347_s22 = scalar_lea.vmem %s1958_s12, %s1636_s15 }
  0x97   : > { %v598_v32 = vpop.permute.xlu1 %597 }
  0x9a   : > { %v577_v34 = vpop.permute.xlu0 %576 }
  0x9b   : > { %v543_v21 = vpop.permute.xlu1 %542  ;;  %v708_v42 = vsel %vm647_vm4, %v2055_v59, %v577_v34 }
  0x9c   : > { %v731_v50 = vsel %vm664_vm5, %v708_v42, %v598_v32 }
  0x9e   : > { %v579_v38 = vpop.permute.xlu0 %578 }
  0x9f   : > { %v522_v37 = vpop.permute.xlu1 %521  ;;  %v711_v1 = vsel %vm647_vm4, %v2040_v53, %v579_v38 }
  0xa2   : > { %v481_v40 = vpop.permute.xlu0 %480 }
  0xa3   : > { %v589_v39 = vpop.permute.xlu1 %588  ;;  %v649_v43 = vsel %vm647_vm4, %v1988_v13, %v481_v40 }
  0xa4   : > { %v666_v47 = vsel %vm664_vm5, %v649_v43, %v522_v37  ;;  %v726_v13 = vsel %vm647_vm4, %v2150_v46, %v589_v39  ;;  %v1830_v46 = vld [vmem:[%s2546_s1 + $0x88] sm:$0xff]  }
  0xa5   : > { %v683_v52 = vsel %vm681_vm6, %v666_v47, %v543_v21 }
  0xa6   : > { %v629_v48 = vpop.permute.xlu0 %628 }
  0xa7   : > { %v493_v49 = vpop.permute.xlu1 %492  ;;  %v747_v51 = vsel %vm681_vm6, %v731_v50, %v629_v48 }
  0xa8   : > { %1232 = vmatprep.mubr.bf16.mxu0 %v747_v51  ;;  %v661_v2 = vsel %vm647_vm4, %v2016_v30, %v493_v49 }
  0xa9   : > { %1233 = vmatmul.mubr.bf16.vlgmr.msra.gmra.mrb[0].mxu0 %v683_v52 }
  0xaa   : > { %v483_v54 = vpop.permute.xlu0 %482 }
  0xab   : > { %v610_v56 = vpop.permute.xlu1 %609  ;;  %v651_v53 = vsel %vm647_vm4, %v1981_v6, %v483_v54 }
  0xac   : > { %v743_v61 = vsel %vm664_vm5, %v726_v13, %v610_v56 }
  0xae   : > { %v600_v59 = vpop.permute.xlu0 %599 }
  0xaf   : > { %v534_v58 = vpop.permute.xlu1 %533  ;;  %v733_v3 = vsel %vm664_vm5, %v711_v1, %v600_v59 }
  0xb0   : > { %v678_v7 = vsel %vm664_vm5, %v661_v2, %v534_v58 }
  0xb2   : > { %v524_v62 = vpop.permute.xlu0 %523 }
  0xb3   : > { %v641_v63 = vpop.permute.xlu1 %640  ;;  %v668_v30 = vsel %vm664_vm5, %v651_v53, %v524_v62 }
  0xb4   : > { %v765_v0 = vsel %vm681_vm6, %v743_v61, %v641_v63 }
  0xb5   : > { %1280 = vmatprep.mubr.bf16.mxu1 %v765_v0 }
  0xb6   : > { %v631_v10 = vpop.permute.xlu0 %630 }
  0xb7   : > { %v555_v11 = vpop.permute.xlu1 %554  ;;  %v750_v12 = vsel %vm681_vm6, %v733_v3, %v631_v10 }
  0xb8   : > { %v701_v14 = vsel %vm681_vm6, %v678_v7, %v555_v11  ;;  %1240 = vmatprep.mubr.bf16.mxu0 %v750_v12 }
  0xb9   : > { %1281 = vmatmul.mubr.bf16.vlgmr.msra.gmra.mrb[0].mxu1 %v701_v14 }
  0xba   : > { %1712 = vmatpush3.bf16.msra.mxu1 %v2173_v60  ;;  %v545_v20 = vpop.permute.xlu0 %544 }
  0xbb   : > { %v591_v22 = vpop.permute.xlu1 %590  ;;  %1713 = vmatprep.subr.bf16.mxu1 %v1830_v46  ;;  %v686_v23 = vsel %vm681_vm6, %v668_v30, %v545_v20 }
  0xbc   : > { %1241 = vmatmul.mubr.bf16.gmra.mrb[4].mxu0 %v686_v23  ;;  %v729_v6 = vsel %vm647_vm4, %v2090_v19, %v591_v22 }
  0xbe   : > { %1714 = vmatpush3.bf16.msra.mxu1 %v1830_v46  ;;  %v581_v44 = vpop.permute.xlu0 %580 }
  0xbf   : > { %v495_v24 = vpop.permute.xlu1 %494  ;;  %v714_v37 = vsel %vm647_vm4, %v2107_v31, %v581_v44 }
  0xc0   : > { %v663_v38 = vsel %vm647_vm4, %v1992_v15, %v495_v24 }
  0xc2   : > { %v485_v26 = vpop.permute.xlu0 %484 }
  0xc3   : > { %v612_v27 = vpop.permute.xlu1 %611  ;;  %v653_v48 = vsel %vm647_vm4, %v1976_v5, %v485_v26 }
  0xc4   : > { %v745_v60 = vsel %vm664_vm5, %v729_v6, %v612_v27 }
  0xc6   : > { %v602_v29 = vpop.permute.xlu0 %601 }
  0xc7   : > { %v536_v33 = vpop.permute.xlu1 %535  ;;  %v735_v39 = vsel %vm664_vm5, %v714_v37, %v602_v29 }
  0xc8   : > { %v680_v40 = vsel %vm664_vm5, %v663_v38, %v536_v33 }
  0xca   : > { %v526_v32 = vpop.permute.xlu0 %525 }
  0xcb   : > { %v643_v21 = vpop.permute.xlu1 %642  ;;  %v670_v15 = vsel %vm664_vm5, %v653_v48, %v526_v32  ;;  %v1585_v32 = vld [vmem:[%s2347_s22 + $0x18] sm:$0xf] }
  0xcc   : > { %v768_v34 = vsel %vm681_vm6, %v745_v60, %v643_v21 }
  0xcd   : > { %1288 = vmatprep.mubr.bf16.mxu1 %v768_v34  ;;  %v1582_v34 = vld [vmem:[%s2347_s22 + $0xc] sm:$0xf] }
  0xce   : > { %v633_v42 = vpop.permute.xlu0 %632  ;;  %v841_v48 = vshll.u32 %v1582_v34, 16 }
  0xcf   : > { %v557_v43 = vpop.permute.xlu1 %556  ;;  %v753_v19 = vsel %vm681_vm6, %v735_v39, %v633_v42  ;;  %v865_v42 = vshll.u32 %v1585_v32, 16 }
  0xd0   : > { %v704_v47 = vsel %vm681_vm6, %v680_v40, %v557_v43  ;;  %1248 = vmatprep.mubr.bf16.mxu0 %v753_v19  ;;  %v862_v40 = vshrl.u32 %v1585_v32, 16  ;;  %v1586_v19 = vld [vmem:[%s2347_s22 + $0x1c] sm:$0xf] }
  0xd1   : > { %1289 = vmatmul.mubr.bf16.gmra.mrb[4].mxu1 %v704_v47  ;;  %v838_v47 = vshrl.u32 %v1582_v34, 16 }
  0xd2   : > { %1715 = vmatprep.mubr.msk.bf16.mxu1 %vm647_vm4, %v2002_v17  ;;  %v547_v31 = vpop.permute.xlu0 %546 }
  0xd3   : > { %v487_v49 = vpop.permute.xlu1 %486  ;;  %v689_v50 = vsel %vm681_vm6, %v670_v15, %v547_v31  ;;  %v1583_v15 = vld [vmem:[%s2347_s22 + $0x10] sm:$0xf]  ;;  %v864_v31 = vrot.slane %v862_v40, 4 }
  0xd4   : > { %1249 = vmatmul.mubr.bf16.gmra.mrb[8].mxu0 %v689_v50  ;;  %v655_v17 = vsel %vm647_vm4, %v2043_v55, %v487_v49  ;;  %v867_v49 = vrot.slane %v865_v42, 5  ;;  %v871_v50 = vshll.u32 %v1586_v19, 16 }
  0xd6   : > { %v583_v51 = vpop.permute.xlu0 %582 }
  0xd7   : > { %v528_v52 = vpop.permute.xlu1 %527  ;;  %v717_v56 = vsel %vm647_vm4, %v2190_v8, %v583_v51  ;;  %v875_v51 = vshrl.u32 %v1586_v19, 16 }
  0xd8   : > { %v672_v61 = vsel %vm664_vm5, %v655_v17, %v528_v52  ;;  %v1588_v52 = vld [vmem:[%s2347_s22 + $0x24] sm:$0xf]  ;;  %v847_v17 = vshll.u32 %v1583_v15, 16 }
  0xd9   : > { %1716 = vmatmul.mubr.msk.bf16.vlgmr.msra.gmra.mrb[8].mxu1 %vm647_vm4, %v2147_v45 }
  0xda   : > { %1719 = vmatprep.mubr.msk.bf16.mxu1 %vm647_vm4, %v2207_v18  ;;  %v604_v54 = vpop.permute.xlu0 %603 }
  0xdb   : > { %v549_v5 = vpop.permute.xlu1 %548  ;;  %v737_v59 = vsel %vm664_vm5, %v717_v56, %v604_v54  ;;  %v840_v54 = vrot.slane %v838_v47, 4  ;;  %v851_v56 = vshrl.u32 %v1583_v15, 16 }
  0xdc   : > { %v692_v45 = vsel %vm681_vm6, %v672_v61, %v549_v5  ;;  %v843_v5 = vrot.slane %v841_v48, 5  ;;  %v889_v61 = vshll.u32 %v1588_v52, 16 }
  0xde   : > { %v635_v58 = vpop.permute.xlu0 %634 }
  0xdf   : > { %v489_v13 = vpop.permute.xlu1 %488  ;;  %v756_v62 = vsel %vm681_vm6, %v737_v59, %v635_v58  ;;  %v1589_v59 = vld [vmem:[%s2347_s22 + $0x28] sm:$0xf]  ;;  %v1591_v58 = vld [vmem:[%s2347_s22 + $0x30] sm:$0xf] }
  0xe0   : > { %1256 = vmatprep.mubr.bf16.mxu0 %v756_v62  ;;  %v657_v0 = vsel %vm647_vm4, %v2134_v41, %v489_v13  ;;  %v886_v13 = vshrl.u32 %v1588_v52, 16  ;;  %v868_v62 = vor.u32 %v867_v49, %v864_v31 }
  0xe1   : > { %1720 = vmatmul.mubr.msk.bf16.gmra.mrb[12].mxu1 %vm647_vm4, %v2227_v28  ;;  %1257 = vmatmul.mubr.bf16.gmra.mrb[12].mxu0 %v692_v45  ;;  %v873_v45 = vrot.slane %v871_v50, 5 }
  0xe2   : > { %1723 = vmatprep.mubr.msk.bf16.mxu1 %vm647_vm4, %v2074_v4  ;;  %v585_v55 = vpop.permute.xlu0 %584 }
  0xe3   : > { %v530_v8 = vpop.permute.xlu1 %529  ;;  %v720_v1 = vsel %vm647_vm4, %v2219_v25, %v585_v55  ;;  %v1592_v55 = vld [vmem:[%s2347_s22 + $0x34] sm:$0xf] }
  0xe4   : > { %v674_v3 = vsel %vm664_vm5, %v657_v0, %v530_v8  ;;  %v895_v8 = vshll.u32 %v1589_v59, 16  ;;  %v849_v0 = vrot.slane %v847_v17, 5 }
  0xe6   : > { %v606_v18 = vpop.permute.xlu0 %605 }
  0xe7   : > { %v551_v63 = vpop.permute.xlu1 %550  ;;  %v739_v28 = vsel %vm664_vm5, %v720_v1, %v606_v18  ;;  %v899_v18 = vshrl.u32 %v1589_v59, 16  ;;  %v1587_v1 = vld [vmem:[%s2347_s22 + $0x20] sm:$0x1] }
  0xe8   : > { %v695_v41 = vsel %vm681_vm6, %v674_v3, %v551_v63  ;;  %v844_v63 = vor.u32 %v843_v5, %v840_v54  ;;  %v913_v3 = vshll.u32 %v1591_v58, 16 }
  0xe9   : > { %1724 = vmatmul.mubr.msk.bf16.gmra.mrb[16].mxu1 %vm647_vm4, %v2024_v35 }
  0xea   : > { %1727 = vmatprep.mubr.msk.bf16.mxu1 %vm647_vm4, %v2125_v36  ;;  %v637_v2 = vpop.permute.xlu0 %636 }
  0xeb   : > { %v491_v4 = vpop.permute.xlu1 %490  ;;  %v759_v7 = vsel %vm681_vm6, %v739_v28, %v637_v2  ;;  %v877_v28 = vrot.slane %v875_v51, 4  ;;  %v853_v2 = vrot.slane %v851_v56, 4 }
  0xec   : > { %1264 = vmatprep.mubr.bf16.mxu0 %v759_v7  ;;  %v659_v36 = vsel %vm647_vm4, %v2193_v9, %v491_v4  ;;  %v910_v4 = vshrl.u32 %v1591_v58, 16  ;;  %v1584_v7 = vld [vmem:[%s2347_s22 + $0x14] sm:$0x1]  ;;  %v1594_v58 = vld [vmem:[%s2347_s22 + $0x3c] sm:$0xf] }
  0xed   : > { %1265 = vmatmul.mubr.bf16.gmra.mrb[16].mxu0 %v695_v41  ;;  %v919_v41 = vshll.u32 %v1592_v55, 16 }
  0xee   : > { %v587_v10 = vpop.permute.xlu0 %586 }
  0xef   : > { %v532_v35 = vpop.permute.xlu1 %531  ;;  %v723_v11 = vsel %vm647_vm4, %v2047_v57, %v587_v10  ;;  %v923_v10 = vshrl.u32 %v1592_v55, 16 }
  0xf0   : > { %v676_v53 = vsel %vm664_vm5, %v659_v36, %v532_v35  ;;  %v888_v35 = vrot.slane %v886_v13, 4  ;;  %v2367_v36 = vrot.slane %v895_v8, 5 }
  0xf1   : > { %1728 = vmatmul.mubr.msk.bf16.gmra.mrb[20].mxu1 %vm647_vm4, %v2236_v16 }
  0xf2   : > { %v608_v25 = vpop.permute.xlu0 %607 }
  0xf3   : > { %v553_v46 = vpop.permute.xlu1 %552  ;;  %v741_v12 = vsel %vm664_vm5, %v723_v11, %v608_v25  ;;  %v891_v25 = vrot.slane %v889_v61, 5  ;;  %v901_v11 = vrot.slane %v899_v18, 4 }
  0xf4   : > { %v698_v16 = vsel %vm681_vm6, %v676_v53, %v553_v46  ;;  %v869_v46 = vrot.slane %v868_v62, 4  ;;  %v881_v53 = vshll.u32 %v1587_v1, 16  ;;  %v2395_v62 = vld [vmem:[%s2547_s2] ss:$0 sm:$0xff] }
  0xf6   : > { %v639_v14 = vpop.permute.xlu0 %638  ;;  %v874_v34 = vsel %vm2372_vm9, %v869_v46, %v873_v45  ;;  %v937_v46 = vshll.u32 %v1594_v58, 16 }
  0xf7   : > { %v762_v30 = vsel %vm681_vm6, %v741_v12, %v639_v14  ;;  %v845_v12 = vrot.slane %v844_v63, 4  ;;  %v878_v14 = vor.u32 %v877_v28, %v873_v45  ;;  %v1047_v61 = vunpack.c.l.bf16 %v874_v34 }
  0xf8   : > { %1272 = vmatprep.mubr.bf16.mxu0 %v762_v30  ;;  %v1590_v30 = vld [vmem:[%s2347_s22 + $0x2c] sm:$0x1] }
  0xf9   : > { %1273 = vmatmul.mubr.bf16.gmra.mrb[20].mxu0 %v698_v16  ;;  %v905_v32 = vshll.u32 %v1590_v30, 16  ;;  %v850_v42 = vsel %vm2372_vm9, %v845_v12, %v849_v0 }
  0xfa   : > { %v1045_v45 = vunpack.c.l.bf16 %v850_v42 }
  0xfb   : > { %v907_v5 = vrot.slane %v905_v32, 5 }
 0x17c   : > { %v1653_v20 = vpop.f32.mrb[0].mxu0 }
 0x17d   : > { %v1654_v22 = vpop.f32.mrb[1].mxu0 }
 0x17e   : > { %v2340_v9 = vadd.f32 %v1654_v22, %v1653_v20  ;;  %v1656_v23 = vpop.f32.mrb[2].mxu0  ;;  %v854_v20 = vor.u32 %v853_v2, %v849_v0  ;;  %v857_v22 = vshll.u32 %v1584_v7, 16 }
 0x17f   : > { %v1657_v57 = vpop.f32.mrb[3].mxu0 }
 0x180   : > { %v2342_v44 = vadd.f32 %v1657_v57, %v1656_v23  ;;  %v912_v23 = vrot.slane %v910_v4, 4  ;;  %v915_v57 = vrot.slane %v913_v3, 5  ;;  %v855_v19 = vrot.slane %v854_v20, 4 }
 0x181   : > { %v859_v47 = vrot.slane %v857_v22, 5 }
 0x182   : > { %v916_v48 = vor.u32 %v915_v57, %v912_v23 }
 0x183   : > { %v860_v55 = vsel %vm2372_vm9, %v855_v19, %v859_v47 }
 0x184   : > { %v917_v8 = vrot.slane %v916_v48, 4 }
 0x18c   : > { %v1689_v24 = vpop.f32.mrb[0].mxu1 }
 0x18d   : > { %v1690_v26 = vpop.f32.mrb[1].mxu1 }
 0x18e   : > { %v2349_v27 = vadd.f32 %v1690_v26, %v1689_v24  ;;  %v1692_v29 = vpop.f32.mrb[2].mxu1  ;;  %v2376_v24 = vrot.slane %v919_v41, 5  ;;  %v892_v26 = vor.u32 %v891_v25, %v888_v35  ;;  %v934_v41 = vshrl.u32 %v1594_v58, 16 }
 0x18f   : > { %v1693_v33 = vpop.f32.mrb[3].mxu1  ;;  %v1659_v6 = vpop.f32.mrb[4].mxu0  ;;  %v1235_v25 = vadd.f32 %v2340_v9, %v2395_v62  ;;  %v1238_v9 = vadd.f32 %v2342_v44, %v2395_v62 }
 0x190   : > { %v2351_v60 = vadd.f32 %v1693_v33, %v1692_v29  ;;  %v1660_v21 = vpop.f32.mrb[5].mxu0  ;;  %v925_v29 = vrot.slane %v923_v10, 4  ;;  %v1593_v33 = vld [vmem:[%s2347_s22 + $0x38] sm:$0x1]  ;;  %v893_v49 = vrot.slane %v892_v26, 4 }
 0x191   : > { %v2355_v37 = vadd.f32 %v1660_v21, %v1659_v6  ;;  %v1662_v38 = vpop.f32.mrb[6].mxu0  ;;  %v902_v6 = vor.u32 %v901_v11, %v2367_v36  ;;  %v929_v51 = vshll.u32 %v1593_v33, 16  ;;  %v1046_v11 = vunpack.c.l.bf16 %v860_v55  ;;  %v1595_v26 = vld [vmem:[%s2347_s22 + $0x40] sm:$0xf] }
 0x192   : > { %v1663_v39 = vpop.f32.mrb[7].mxu0  ;;  %v926_v50 = vor.u32 %v925_v29, %v2376_v24  ;;  %v898_v0 = vsel %vm2372_vm9, %v893_v49, %v2367_v36  ;;  %v1603_v36 = vld [vmem:[%s2347_s22 + $0x60] sm:$0xf]  ;;  %v943_v44 = vshll.u32 %v1595_v26, 16  ;;  %v947_v47 = vshrl.u32 %v1595_v26, 16 }
 0x193   : > { %v2357_v43 = vadd.f32 %v1663_v39, %v1662_v38  ;;  %v879_v38 = vrot.slane %v878_v14, 4  ;;  %v883_v39 = vrot.slane %v881_v53, 5  ;;  %v903_v54 = vrot.slane %v902_v6, 4 }
 0x194   : > { %v927_v1 = vrot.slane %v926_v50, 4  ;;  %v931_v28 = vrot.slane %v929_v51, 5  ;;  %v1243_v4 = vadd.f32 %v2355_v37, %v2395_v62  ;;  %v922_v53 = vsel %vm2372_vm9, %v917_v8, %v2376_v24 }
 0x195   : > { %v884_v59 = vsel %vm2372_vm9, %v879_v38, %v883_v39  ;;  %v908_v7 = vsel %vm2372_vm9, %v903_v54, %v907_v5  ;;  %v1246_v37 = vadd.f32 %v2357_v43, %v2395_v62  ;;  %v1049_v30 = vunpack.c.l.bf16 %v898_v0 }
 0x196   : > { %v1048_v3 = vunpack.c.l.bf16 %v884_v59  ;;  %v932_v23 = vsel %vm2372_vm9, %v927_v1, %v931_v28  ;;  %v1050_v57 = vunpack.c.l.bf16 %v908_v7  ;;  %v936_v6 = vrot.slane %v934_v41, 4 }
 0x197   : > { %v1006_v43 = vshrl.u32 %v1603_v36, 16  ;;  %v1009_v32 = vshll.u32 %v1603_v36, 16  ;;  %v939_v39 = vrot.slane %v937_v46, 5  ;;  %v1051_v42 = vunpack.c.l.bf16 %v922_v53  ;;  %v1596_v46 = vld [vmem:[%s2347_s22 + $0x44] sm:$0x1] }
 0x198   : > { %v2423_v19 = vunpack.c.l.bf16 %v932_v23  ;;  %v949_v0 = vrot.slane %v947_v47, 4 }
 0x199   : > { %v2425_v51 = vrot.slane %v1006_v43, 4 }
 0x1a4   : > { %v1695_v21 = vpop.f32.mrb[4].mxu1 }
 0x1a5   : > { %v1696_v40 = vpop.f32.mrb[5].mxu1 }
 0x1a6   : > { %v2384_v15 = vadd.f32 %v1696_v40, %v1695_v21  ;;  %v1698_v31 = vpop.f32.mrb[6].mxu1  ;;  %v1600_v21 = vld [vmem:[%s2347_s22 + $0x54] sm:$0xf]  ;;  %v2421_v40 = vld [vmem:[%s2347_s22 + $0x64] sm:$0xf] }
 0x1a7   : > { %v1699_v52 = vpop.f32.mrb[7].mxu1  ;;  %v1665_v17 = vpop.f32.mrb[8].mxu0  ;;  %v982_v50 = vshrl.u32 %v1600_v21, 16  ;;  %v1015_v54 = vshll.u32 %v2421_v40, 16  ;;  %v985_v5 = vshll.u32 %v1600_v21, 16  ;;  %v1019_v1 = vshrl.u32 %v2421_v40, 16 }
 0x1a8   : > { %v2387_v56 = vadd.f32 %v1699_v52, %v1698_v31  ;;  %v1666_v13 = vpop.f32.mrb[9].mxu0  ;;  %v2427_v52 = vrot.slane %v1009_v32, 5  ;;  %v953_v32 = vshll.u32 %v1596_v46, 16 }
 0x1a9   : > { %v1667_v18 = vadd.f32 %v1666_v13, %v1665_v17  ;;  %v1668_v63 = vpop.f32.mrb[10].mxu0  ;;  %v2440_v36 = vrot.slane %v982_v50, 4 }
 0x1aa   : > { %v1669_v2 = vpop.f32.mrb[11].mxu0 }
 0x1ab   : > { %v1670_v10 = vadd.f32 %v1669_v2, %v1668_v63  ;;  %v1251_v13 = vadd.f32 %v1667_v18, %v2395_v62  ;;  %v2432_v63 = vrot.slane %v943_v44, 5 }
 0x1ac   : > { %v1717_v35 = vpop.f32.mrb[8].mxu1 }
 0x1ad   : > { %v1340_v12 = vadd.f32 %v1717_v35, %v1243_v4  ;;  %v1331_v14 = vpop.f32.mrb[9].mxu1  ;;  %v1254_v8 = vadd.f32 %v1670_v10, %v2395_v62  ;;  %v2438_v10 = vrot.slane %v1015_v54, 5  ;;  %v950_v26 = vor.u32 %v949_v0, %v2432_v63 }
 0x1ae   : > { %v1332_v20 = vadd.f32 %v1331_v14, %v1235_v25  ;;  %v1718_v22 = vpop.f32.mrb[10].mxu1 }
 0x1af   : > { %v1343_v29 = vadd.f32 %v1718_v22, %v1246_v37  ;;  %v1334_v33 = vpop.f32.mrb[11].mxu1  ;;  %v1396_v34 = vadd.f32 %v1340_v12, %v1047_v61  ;;  %v940_v61 = vor.u32 %v939_v39, %v936_v6  ;;  %v951_v54 = vrot.slane %v950_v26, 4 }
 0x1b0   : > { %v1394_v24 = vadd.f32 %v1332_v20, %v1045_v45  ;;  %v1335_v38 = vadd.f32 %v1334_v33, %v1238_v9  ;;  %v1283_v26 = vadd.f32 %v2349_v27, %v2395_v62 }
 0x1b1   : > { %v1397_v31 = vadd.f32 %v1343_v29, %v1048_v3  ;;  %v1412_v17 = vmax.f32 %v1396_v34, 0.0  ;;  %v941_v20 = vrot.slane %v940_v61, 4  ;;  %v1601_v29 = vld [vmem:[%s2347_s22 + $0x58] sm:$0xf] }
 0x1b2   : > { %v1410_v48 = vmax.f32 %v1394_v24, 0.0  ;;  %v1395_v49 = vadd.f32 %v1335_v38, %v1046_v11  ;;  %v2448_v24 = vrot.slane %v985_v5, 5  ;;  %v1597_v38 = vld [vmem:[%s2347_s22 + $0x48] sm:$0xf] }
 0x1b3   : > { %v1413_v2 = vmax.f32 %v1397_v31, 0.0  ;;  %v1430_v12 = vsel %vm647_vm4, %v1412_v17, 0.0  ;;  %v946_v47 = vsel %vm2372_vm9, %v941_v20, %v2432_v63  ;;  %v1598_v17 = vld [vmem:[%s2347_s22 + $0x4c] sm:$0xf]  ;;  %v961_v61 = vshll.u32 %v1597_v38, 16 }
 0x1b4   : > { %v1411_v59 = vmax.f32 %v1395_v49, 0.0  ;;  %v1721_v58 = vpop.f32.mrb[12].mxu1  ;;  %v1671_v45 = vpop.f32.mrb[12].mxu0  ;;  %v1427_v28 = vsel %vm647_vm4, %v1410_v48, 0.0  ;;  %v991_v48 = vshll.u32 %v1601_v29, 16  ;;  %v995_v63 = vshrl.u32 %v1601_v29, 16 }
 0x1b5   : > { %v1347_v55 = vpop.f32.mrb[13].mxu1  ;;  %v1672_v3 = vpop.f32.mrb[13].mxu0  ;;  %v1432_v33 = vsel %vm647_vm4, %v1413_v2, 0.0  ;;  %v967_v2 = vshll.u32 %v1598_v17, 16 }
 0x1b6   : > { %v1428_v4 = vsel %vm647_vm4, %v1411_v59, 0.0  ;;  %v1348_v7 = vadd.f32 %v1347_v55, %v1251_v13  ;;  %v1722_v41 = vpop.f32.mrb[14].mxu1  ;;  %v1673_v35 = vadd.f32 %v1672_v3, %v1671_v45  ;;  %v1674_v25 = vpop.f32.mrb[14].mxu0  ;;  %v958_v13 = vshrl.u32 %v1597_v38, 16 }
 0x1b7   : > { %v1429_v18 = vadd.f32 %v1428_v4, %v1427_v28  ;;  %v1350_v11 = vpop.f32.mrb[15].mxu1  ;;  %v1675_v37 = vpop.f32.mrb[15].mxu0  ;;  %v2464_v28 = vrot.slane %v1019_v1, 4  ;;  %v971_v4 = vshrl.u32 %v1598_v17, 16  ;;  %v997_v20 = vrot.slane %v995_v63, 4 }
 0x1b8   : > { %v1398_v14 = vadd.f32 %v1348_v7, %v1049_v30  ;;  %v1351_v53 = vadd.f32 %v1350_v11, %v1254_v8  ;;  %v1259_v9 = vadd.f32 %v1673_v35, %v2395_v62  ;;  %v1676_v23 = vadd.f32 %v1675_v37, %v1674_v25 }
 0x1b9   : > { %v1431_v22 = vadd.f32 %v1430_v12, %v1429_v18  ;;  %v1053_v18 = vunpack.c.l.bf16 %v946_v47  ;;  %v2467_v35 = vrot.slane %v991_v48, 5  ;;  %v960_v46 = vrot.slane %v958_v13, 4 }
 0x1ba   : > { %v1414_v6 = vmax.f32 %v1398_v14, 0.0  ;;  %v1399_v43 = vadd.f32 %v1351_v53, %v1050_v57  ;;  %v1356_v21 = vadd.f32 %v1721_v58, %v1259_v9  ;;  %v1262_v30 = vadd.f32 %v1676_v23, %v2395_v62  ;;  %v1602_v53 = vld [vmem:[%s2347_s22 + $0x5c] sm:$0x1] }
 0x1bb   : > { %v1433_v34 = vadd.f32 %v1432_v33, %v1431_v22  ;;  %v955_v58 = vrot.slane %v953_v32, 5  ;;  %v963_v12 = vrot.slane %v961_v61, 5  ;;  %v1291_v37 = vadd.f32 %v2384_v15, %v2395_v62 }
 0x1bc   : > { %v1434_v39 = vsel %vm647_vm4, %v1414_v6, 0.0  ;;  %v1415_v40 = vmax.f32 %v1399_v43, 0.0  ;;  %v2452_v44 = vpop.f32.mrb[16].mxu1  ;;  %v1400_v57 = vadd.f32 %v1356_v21, %v1051_v42  ;;  %v1359_v49 = vadd.f32 %v1722_v41, %v1262_v30 }
 0x1bd   : > { %v1435_v31 = vadd.f32 %v1434_v39, %v1433_v34  ;;  %v1363_v50 = vpop.f32.mrb[17].mxu1  ;;  %v988_v42 = vor.u32 %v2448_v24, %v2440_v36  ;;  %v956_v11 = vsel %vm2372_vm9, %v951_v54, %v955_v58  ;;  %v969_v29 = vrot.slane %v967_v2, 5  ;;  %v1599_v34 = vld [vmem:[%s2347_s22 + $0x50] sm:$0x1] }
 0x1be   : > { %v1436_v5 = vsel %vm647_vm4, %v1415_v40, 0.0  ;;  %v2459_v59 = vpop.f32.mrb[18].mxu1  ;;  %v1416_v45 = vmax.f32 %v1400_v57, 0.0  ;;  %v1401_v55 = vadd.f32 %v1359_v49, %v2423_v19  ;;  %v973_v33 = vrot.slane %v971_v4, 4  ;;  %v1605_v49 = vld [vmem:[%s2347_s22 + $0x68] sm:$0x1] }
 0x1bf   : > { %v1437_v8 = vadd.f32 %v1436_v5, %v1435_v31  ;;  %v1366_v0 = vpop.f32.mrb[19].mxu1  ;;  %v1294_v15 = vadd.f32 %v2387_v56, %v2395_v62  ;;  %v1001_v38 = vshll.u32 %v1602_v53, 16  ;;  %v1286_v39 = vadd.f32 %v2351_v60, %v2395_v62 }
 0x1c0   : > { %v1417_v3 = vmax.f32 %v1401_v55, 0.0  ;;  %v1438_v7 = vsel %vm647_vm4, %v1416_v45, 0.0  ;;  %v1677_v41 = vpop.f32.mrb[16].mxu0  ;;  %v964_v27 = vor.u32 %v963_v12, %v960_v46  ;;  %v1054_v47 = vunpack.c.l.bf16 %v956_v11 }
 0x1c1   : > { %v1439_v25 = vadd.f32 %v1438_v7, %v1437_v8  ;;  %v1678_v19 = vpop.f32.mrb[17].mxu0  ;;  %v998_v54 = vor.u32 %v997_v20, %v2467_v35  ;;  %v974_v5 = vor.u32 %v973_v33, %v969_v29  ;;  %v977_v56 = vshll.u32 %v1599_v34, 16 }
 0x1c2   : > { %v1679_v36 = vadd.f32 %v1678_v19, %v1677_v41  ;;  %v1440_v1 = vsel %vm647_vm4, %v1417_v3, 0.0  ;;  %v1680_v14 = vpop.f32.mrb[18].mxu0  ;;  %v1012_v61 = vor.u32 %v2427_v52, %v2425_v51  ;;  %v989_v45 = vrot.slane %v988_v42, 4 }
 0x1c3   : > { %v1441_v22 = vadd.f32 %v1440_v1, %v1439_v25  ;;  %v1681_v9 = vpop.f32.mrb[19].mxu0  ;;  %v965_v60 = vrot.slane %v964_v27, 4  ;;  %v1022_v8 = vor.u32 %v2464_v28, %v2438_v10  ;;  %v1025_v63 = vshll.u32 %v1605_v49, 16 }
 0x1c4   : > { %v1729_v23 = vpop.f32.mrb[20].mxu1  ;;  %v1267_v6 = vadd.f32 %v1679_v36, %v2395_v62  ;;  %v1682_v43 = vadd.f32 %v1681_v9, %v1680_v14  ;;  %v999_v2 = vrot.slane %v998_v54, 4  ;;  %v1003_v4 = vrot.slane %v1001_v38, 5 }
 0x1c5   : > { %v2478_v32 = vadd.f32 %v1729_v23, %v1291_v37  ;;  %v1379_v21 = vpop.f32.mrb[21].mxu1  ;;  %v975_v3 = vrot.slane %v974_v5, 4  ;;  %v979_v7 = vrot.slane %v977_v56, 5  ;;  %v1013_v19 = vrot.slane %v1012_v61, 4 }
 0x1c6   : > { %v1380_v30 = vadd.f32 %v1379_v21, %v1283_v26  ;;  %v1730_v24 = vpop.f32.mrb[22].mxu1  ;;  %v1364_v40 = vadd.f32 %v1363_v50, %v1267_v6  ;;  %v1270_v48 = vadd.f32 %v1682_v43, %v2395_v62  ;;  %v994_v51 = vsel %vm2372_vm9, %v989_v45, %v2467_v35 }
 0x1c7   : > { %v1391_v57 = vadd.f32 %v1730_v24, %v1294_v15  ;;  %v1382_v31 = vpop.f32.mrb[23].mxu1  ;;  %v970_v52 = vsel %vm2372_vm9, %v965_v60, %v969_v29  ;;  %v1023_v11 = vrot.slane %v1022_v8, 4  ;;  %v1027_v1 = vrot.slane %v1025_v63, 5  ;;  %v1426_v63 = vld [vmem:[#allocation2] sm:$0x1] }
 0x1c8   : > { %v1383_v17 = vadd.f32 %v1382_v31, %v1286_v39  ;;  %v1402_v58 = vadd.f32 %v1364_v40, %v1053_v18  ;;  %v1367_v13 = vadd.f32 %v1366_v0, %v1270_v48  ;;  %v1004_v14 = vsel %vm2372_vm9, %v999_v2, %v1003_v4 }
 0x1c9   : > { %v980_v37 = vsel %vm2372_vm9, %v975_v3, %v979_v7  ;;  %v1057_v20 = vunpack.c.l.bf16 %v994_v51  ;;  %v1055_v35 = vunpack.c.l.bf16 %v970_v52  ;;  %v1018_v23 = vsel %vm2372_vm9, %v1013_v19, %v2438_v10  ;;  %v1473_v7 = vld [vmem:[%s2549_s4] sm:$0x1] (!%p1633_p10)  ;;  %v1478_v51 = vld [vmem:[#allocation3] sm:$0x1] (!%p1633_p10) }
 0x1ca   : > { %v1418_v55 = vmax.f32 %v1402_v58, 0.0  ;;  %v1403_v50 = vadd.f32 %v1367_v13, %v1054_v47  ;;  %v1058_v26 = vunpack.c.l.bf16 %v1004_v14  ;;  %v1056_v33 = vunpack.c.l.bf16 %v980_v37 }
 0x1cb   : > { %v1028_v43 = vsel %vm2372_vm9, %v1023_v11, %v1027_v1  ;;  %v1059_v21 = vunpack.c.l.bf16 %v1018_v23  ;;  %v1406_v15 = vadd.f32 %v1380_v30, %v1057_v20  ;;  %v1483_v52 = vstv (!%p1633_p10), %s1857_s24 }
 0x1cc   : > { %v1442_v41 = vsel %vm647_vm4, %v1418_v55, 0.0  ;;  %v1419_v25 = vmax.f32 %v1403_v50, 0.0  ;;  %v1683_v18 = vpop.f32.mrb[20].mxu0  ;;  %v1060_v38 = vunpack.c.l.bf16 %v1028_v43  ;;  %v1407_v39 = vadd.f32 %v1383_v17, %v1058_v26 }
 0x1cd   : > { %v1443_v0 = vadd.f32 %v1442_v41, %v1441_v22  ;;  %v1684_v42 = vpop.f32.mrb[21].mxu0  ;;  %v1408_v10 = vadd.f32 %v2478_v32, %v1059_v21  ;;  %v1422_v47 = vmax.f32 %v1406_v15, 0.0 }
 0x1ce   : > { %v1444_v28 = vsel %vm647_vm4, %v1419_v25, 0.0  ;;  %v1685_v46 = vadd.f32 %v1684_v42, %v1683_v18  ;;  %v1686_v12 = vpop.f32.mrb[22].mxu0  ;;  %v1423_v49 = vmax.f32 %v1407_v39, 0.0 }
 0x1cf   : > { %v1445_v36 = vadd.f32 %v1444_v28, %v1443_v0  ;;  %v1687_v53 = vpop.f32.mrb[23].mxu0  ;;  %v1424_v30 = vmax.f32 %v1408_v10, 0.0  ;;  %v1450_v5 = vsel %vm647_vm4, %v1422_v47, 0.0  ;;  %v1480_v0 = vlaneseq (!%p1633_p10) }
 0x1d0   : > { %v1275_v22 = vadd.f32 %v1685_v46, %v2395_v62  ;;  %v1688_v9 = vadd.f32 %v1687_v53, %v1686_v12  ;;  %v1452_v17 = vsel %vm647_vm4, %v1423_v49, 0.0  ;;  %v1482_v46 = vld [vmem:[%s2551_s6] sm:$0x3] (!%p1633_p10) }
 0x1d1   : > { %v1454_v32 = vsel %vm647_vm4, %v1424_v30, 0.0  ;;  %v1481_v19 = vshrl.u32 (!%p1633_p10), %v1480_v0, 7 }
 0x1d2   : > { %v1372_v29 = vadd.f32 %v2452_v44, %v1275_v22  ;;  %v1278_v6 = vadd.f32 %v1688_v9, %v2395_v62  ;;  %v1409_v62 = vadd.f32 %v1391_v57, %v1060_v38 }
 0x1d3   : > { %v1487_v42 = vsub.s32 (!%p1633_p10), 0, %v1481_v19  ;;  %vm1484_vm11 = vcmp.eq.s32.totalorder (!%p1633_p10), %v1481_v19, %v1483_v52 }
 0x1d4   : > { %v1404_v34 = vadd.f32 %v1372_v29, %v1055_v35  ;;  %v1375_v24 = vadd.f32 %v2459_v59, %v1278_v6  ;;  %v1425_v56 = vmax.f32 %v1409_v62, 0.0 }
 0x1d6   : > { %v1420_v27 = vmax.f32 %v1404_v34, 0.0  ;;  %v1405_v40 = vadd.f32 %v1375_v24, %v1056_v33  ;;  %v1456_v61 = vsel %vm647_vm4, %v1425_v56, 0.0 }
 0x1d8   : > { %v1446_v44 = vsel %vm647_vm4, %v1420_v27, 0.0  ;;  %v1421_v48 = vmax.f32 %v1405_v40, 0.0 }
 0x1d9   : > { %v1447_v31 = vadd.f32 %v1446_v44, %v1445_v36 }
 0x1da   : > { %v1448_v16 = vsel %vm647_vm4, %v1421_v48, 0.0 }
 0x1db   : > { %v1449_v54 = vadd.f32 %v1448_v16, %v1447_v31 }
 0x1dd   : > { %v1451_v59 = vadd.f32 %v1450_v5, %v1449_v54 }
 0x1df   : > { %v1453_v58 = vadd.f32 %v1452_v17, %v1451_v59 }
 0x1e1   : > { %v1455_v13 = vadd.f32 %v1454_v32, %v1453_v58 }
 0x1e3   : > { %v1457_v45 = vadd.f32 %v1456_v61, %v1455_v13 }
 0x1e5   : > { %v1458_v60 = vrot.slane %v1457_v45, 4 }
 0x1e7   : > { %v1459_v57 = vadd.f32 %v1458_v60, %v1457_v45 }
 0x1e9   : > { %v1460_v55 = vrot.slane %v1459_v57, 2 }
 0x1eb   : > { %v1461_v50 = vadd.f32 %v1460_v55, %v1459_v57 }
 0x1ed   : > { %v1462_v8 = vrot.slane %v1461_v50, 1  ;;  %1470 = sbr.rel (%p1633_p10) target bundleno = 662 (0x296), region = 56 }
 0x1ef   : > { %v1463_v2 = vadd.f32 %v1462_v8, %v1461_v50 }
 0x1f1   : > { %v1464_v4 = vadd.f32 %v1463_v2, %v1426_v63 }
 0x1f3   : > { %1466 = vst.msk [vmem:[#allocation2] sm:$0x1] %vm1465_vm10, %v1464_v4 }
 0x1fa   : > { %v1471_v3 = vld [vmem:[#allocation2] sm:$0x1] }
 0x1fb   : > { %v1472_v41 = vmul.f32 0.00390625, %v1471_v3 }
 0x1fd   : > { %v1474_v25 = vmul.f32 %v1473_v7, %v1472_v41 }
 0x1ff   : > { %v1475_v18 = vsel %vm1465_vm10, %v1474_v25, 0.0 }
 0x200   : > { %1476 = vadd.xlane.f32.xlu0 %v1475_v18 }
 0x28d   : > { %v1477_v28 = vpop.xlane.xlu0 %1476 }
 0x28e   : > { %v1479_v11 = vadd.f32 %v1478_v51, %v1477_v28 }
 0x290   : > { %v1488_v12 = vrot.slane %v1479_v11, %v1487_v42 }
 0x292   : > { %v1489_v36 = vsel %vm1484_vm11, %v1488_v12, 0.0 }
 0x293   : > { %v1490_v1 = vadd.f32 %v1489_v36, %v1482_v46 }
 0x295   : > { %1492 = vst.msk [vmem:[%s2551_s6] sm:$0x3] %vm1491_vm12, %v1490_v1 }
 0x296 PF: > { %s18_s27 = sadd.s32 1, %s1869_s27   ;;  %s2554_s23 = smov %s1861_s25 }
 0x297   : > { %p15_p11 = scmp.ge.s32.totalorder %s18_s27, 6   ;;  %s2555_s24 = smov %s1865_s26 }
 0x298   : > { %s2556_s25 = smov %s2559_s5  ;;  %s2557_s26 = smov %s2563_s28 }
 0x299   :  { %17 = sbr.rel (!%p15_p11) target bundleno = 3 (0x3), region = 87 }

// kernel: model_forward.4
= control target key start
LH: loop header
LB: loop body
LE: loop exit
PB: predicated region body
PF: predicated region fallthrough
CT: control target
= control target key end

     0   :  { %s1855_s12 = smov 0   ;;  %s1857_s13 = smov 0   ;;  %s2572_s0 = inlined_call_operand.vmem [shape: bf16[2,18,18,32], index: 0, kind: input, shape index: {}]   ;;  %s2573_s1 = inlined_call_operand.vmem [shape: bf16[288,32], index: 1, kind: input, shape index: {}]   ;;  %s2574_s2 = inlined_call_operand.vmem [shape: f32[1,32], index: 2, kind: input, shape index: {}]   ;;  %s2575_s3 = inlined_call_operand.vmem [shape: bf16[2,18,18,32], index: 3, kind: output, shape index: {}]  }
   0x1   :  { %s1859_s14 = smov 0   ;;  %s1861_s15 = smov 0  }
   0x2   :  { %s1863_s16 = smov 0  }
   0x3 LB: > { %s22_s17 = sadd.s32 1, %s1821_s14  ;;  %s25_s18 = sadd.s32 1, %s1825_s15  ;;  %s1829_s16 = sphi %s1863_s16, %s13_s16   ;;  %s1825_s15 = sphi %s1861_s15, %s2585_s15   ;;  %s1821_s14 = sphi %s1859_s14, %s2584_s14   ;;  %s1817_s13 = sphi %s1857_s13, %s2583_s13   ;;  %s1813_s12 = sphi %s1855_s12, %s2582_s12  }
   0x4   : > { %p23_p0 = scmp.ge.s32.totalorder %s22_s17, 2  ;;  %p1467_p1 = scmp.ge.s32.totalorder %s1829_s16, 1 }
   0x5   : > { %p149_p2 = scmp.lt.s32.totalorder %s1829_s16, 5 }
   0x6   : > { %s2587_s17 = smov (%p23_p0, %s22_s17), 0  ;;  %s2589_s18 = smov (!%p23_p0, %s25_s18), %s1825_s15 }
   0x7   : > { %p150_p3 = pnand %p1467_p1, %p149_p2  ;;  %p27_p4 = scmp.ge.s32.totalorder %s2589_s18, 2 }
   0x8   : > { %p173_p5 = scmp.lt.s32.totalorder (!%p150_p3), %s1817_s13, 1  ;;  %p1470_p6 = scmp.ne.s32.totalorder (!%p150_p3), %s1813_s12, 0 }
   0x9   : > { %s2591_s18 = smov (%p27_p4, %s2589_s18), 0  ;;  %153 = sbr.rel (%p150_p3) target bundleno = 496 (0x1f0), region = 32 }
  0x10   : > { %s2593_s13 = smov (!%p173_p5, %s1817_s13), 1  ;;  %187 = sbr.rel (%p1470_p6) target bundleno = 47 (0x2f), region = 36 }
  0x11   : > { %s1708_s19 = smul.u32 216, %s2593_s13  ;;  %vm188_vm0 = vcmask (!%p1470_p6), 257024   ;;  %vm191_vm1 = vcmask (!%p1470_p6), 253952   ;;  %v1831_v0 = vmov (!%p1470_p6), 0  }
  0x13   : > { %s1890_s22 = scalar_lea.vmem %s2572_s0, %s1708_s19  ;;  %s1895_s25 = scalar_lea.vmem %s2575_s3, %s1708_s19 }
  0x14   : > { %189 = vst.msk [vmem:[%s1895_s25] sm:$0xf] (!%p1470_p6), %vm188_vm0, %v1831_v0  ;;  %190 = vst.msk [vmem:[%s1895_s25 + $0x4] sm:$0xf] (!%p1470_p6), %vm188_vm0, %v1831_v0 }
  0x15   : > { %193 = vst.msk [vmem:[%s1895_s25 + $0xc] sm:$0xf] (!%p1470_p6), %vm188_vm0, %v1831_v0  ;;  %194 = vst.msk [vmem:[%s1895_s25 + $0x10] sm:$0xf] (!%p1470_p6), %vm188_vm0, %v1831_v0 }
  0x16   : > { %196 = vst.msk [vmem:[%s1895_s25 + $0x18] sm:$0xf] (!%p1470_p6), %vm188_vm0, %v1831_v0  ;;  %197 = vst.msk [vmem:[%s1895_s25 + $0x1c] sm:$0xf] (!%p1470_p6), %vm188_vm0, %v1831_v0 }
  0x17   : > { %199 = vst.msk [vmem:[%s1895_s25 + $0x24] sm:$0xf] %vm188_vm0, %v1831_v0  ;;  %200 = vst.msk [vmem:[%s1895_s25 + $0x28] sm:$0xf] %vm188_vm0, %v1831_v0 }
  0x18   : > { %202 = vst.msk [vmem:[%s1895_s25 + $0x30] sm:$0xf] %vm188_vm0, %v1831_v0  ;;  %203 = vst.msk [vmem:[%s1895_s25 + $0x34] sm:$0xf] %vm188_vm0, %v1831_v0 }
  0x19   : > { %205 = vst.msk [vmem:[%s1895_s25 + $0x3c] sm:$0xf] %vm188_vm0, %v1831_v0  ;;  %206 = vst.msk [vmem:[%s1895_s25 + $0x40] sm:$0xf] %vm188_vm0, %v1831_v0 }
  0x1a   : > { %208 = vst.msk [vmem:[%s1895_s25 + $0x48] sm:$0xf] %vm188_vm0, %v1831_v0  ;;  %209 = vst.msk [vmem:[%s1895_s25 + $0x4c] sm:$0xf] %vm188_vm0, %v1831_v0 }
  0x1b   : > { %211 = vst.msk [vmem:[%s1895_s25 + $0x54] sm:$0xf] %vm188_vm0, %v1831_v0  ;;  %212 = vst.msk [vmem:[%s1895_s25 + $0x58] sm:$0xf] %vm188_vm0, %v1831_v0 }
  0x1c   : > { %214 = vst.msk [vmem:[%s1895_s25 + $0x60] sm:$0xf] %vm188_vm0, %v1831_v0  ;;  %215 = vst.msk [vmem:[%s1895_s25 + $0x64] sm:$0xf] %vm188_vm0, %v1831_v0 }
  0x1d   : > { %217 = vst.msk [vmem:[%s1895_s25 + $0x6c] sm:$0xf] %vm188_vm0, %v1831_v0  ;;  %218 = vst.msk [vmem:[%s1895_s25 + $0x70] sm:$0xf] %vm188_vm0, %v1831_v0 }
  0x1e   : > { %220 = vst.msk [vmem:[%s1895_s25 + $0x78] sm:$0xf] %vm188_vm0, %v1831_v0  ;;  %221 = vst.msk [vmem:[%s1895_s25 + $0x7c] sm:$0xf] %vm188_vm0, %v1831_v0 }
  0x1f   : > { %223 = vst.msk [vmem:[%s1895_s25 + $0x84] sm:$0xf] %vm188_vm0, %v1831_v0  ;;  %224 = vst.msk [vmem:[%s1895_s25 + $0x88] sm:$0xf] %vm188_vm0, %v1831_v0 }
  0x20   : > { %226 = vst.msk [vmem:[%s1895_s25 + $0x90] sm:$0xf] %vm188_vm0, %v1831_v0  ;;  %227 = vst.msk [vmem:[%s1895_s25 + $0x94] sm:$0xf] %vm188_vm0, %v1831_v0 }
  0x21   : > { %229 = vst.msk [vmem:[%s1895_s25 + $0x9c] sm:$0xf] %vm188_vm0, %v1831_v0  ;;  %230 = vst.msk [vmem:[%s1895_s25 + $0xa0] sm:$0xf] %vm188_vm0, %v1831_v0 }
  0x22   : > { %232 = vst.msk [vmem:[%s1895_s25 + $0xa8] sm:$0xf] %vm188_vm0, %v1831_v0  ;;  %233 = vst.msk [vmem:[%s1895_s25 + $0xac] sm:$0xf] %vm188_vm0, %v1831_v0 }
  0x23   : > { %235 = vst.msk [vmem:[%s1895_s25 + $0xb4] sm:$0xf] %vm188_vm0, %v1831_v0  ;;  %236 = vst.msk [vmem:[%s1895_s25 + $0xb8] sm:$0xf] %vm188_vm0, %v1831_v0 }
  0x24   : > { %238 = vst.msk [vmem:[%s1895_s25 + $0xc0] sm:$0xf] %vm188_vm0, %v1831_v0  ;;  %239 = vst.msk [vmem:[%s1895_s25 + $0xc4] sm:$0xf] %vm188_vm0, %v1831_v0 }
  0x25   : > { %241 = vst.msk [vmem:[%s1895_s25 + $0xcc] sm:$0xf] %vm188_vm0, %v1831_v0  ;;  %242 = vst.msk [vmem:[%s1895_s25 + $0xd0] sm:$0xf] %vm188_vm0, %v1831_v0 }
  0x26   : > { %192 = vst.msk [vmem:[%s1895_s25 + $0x8] sm:$0x1] %vm191_vm1, %v1831_v0  ;;  %195 = vst.msk [vmem:[%s1895_s25 + $0x14] sm:$0x1] %vm191_vm1, %v1831_v0 }
  0x27   : > { %198 = vst.msk [vmem:[%s1895_s25 + $0x20] sm:$0x1] %vm191_vm1, %v1831_v0  ;;  %201 = vst.msk [vmem:[%s1895_s25 + $0x2c] sm:$0x1] %vm191_vm1, %v1831_v0 }
  0x28   : > { %204 = vst.msk [vmem:[%s1895_s25 + $0x38] sm:$0x1] %vm191_vm1, %v1831_v0  ;;  %207 = vst.msk [vmem:[%s1895_s25 + $0x44] sm:$0x1] %vm191_vm1, %v1831_v0 }
  0x29   : > { %210 = vst.msk [vmem:[%s1895_s25 + $0x50] sm:$0x1] %vm191_vm1, %v1831_v0  ;;  %213 = vst.msk [vmem:[%s1895_s25 + $0x5c] sm:$0x1] %vm191_vm1, %v1831_v0 }
  0x2a   : > { %216 = vst.msk [vmem:[%s1895_s25 + $0x68] sm:$0x1] %vm191_vm1, %v1831_v0  ;;  %219 = vst.msk [vmem:[%s1895_s25 + $0x74] sm:$0x1] %vm191_vm1, %v1831_v0 }
  0x2b   : > { %222 = vst.msk [vmem:[%s1895_s25 + $0x80] sm:$0x1] %vm191_vm1, %v1831_v0  ;;  %225 = vst.msk [vmem:[%s1895_s25 + $0x8c] sm:$0x1] %vm191_vm1, %v1831_v0 }
  0x2c   : > { %228 = vst.msk [vmem:[%s1895_s25 + $0x98] sm:$0x1] %vm191_vm1, %v1831_v0  ;;  %231 = vst.msk [vmem:[%s1895_s25 + $0xa4] sm:$0x1] %vm191_vm1, %v1831_v0 }
  0x2d   : > { %234 = vst.msk [vmem:[%s1895_s25 + $0xb0] sm:$0x1] %vm191_vm1, %v1831_v0  ;;  %237 = vst.msk [vmem:[%s1895_s25 + $0xbc] sm:$0x1] %vm191_vm1, %v1831_v0 }
  0x2e   : > { %240 = vst.msk [vmem:[%s1895_s25 + $0xc8] sm:$0x1] %vm191_vm1, %v1831_v0  ;;  %243 = vst.msk [vmem:[%s1895_s25 + $0xd4] sm:$0x1] %vm191_vm1, %v1831_v0 }
  0x2f PF: > { %s1581_s26 = smul.u32 96, %s1813_s12  ;;  %v1773_v1 = vld [vmem:[%s2573_s1 + $0x40] sm:$0xff]   ;;  %vm455_vm2 = vcmask 1046528   ;;  %s1832_s5 = smov 64   ;;  %vm342_vm3 = vsmask.f32 7424 }
  0x30   : > { %1598 = vmatprep.subr.bf16.mxu0 %v1773_v1  ;;  %v1774_v2 = vld [vmem:[%s2573_s1] sm:$0xff]   ;;  %1692 = vmatprep.subr.bf16.mxu1 %v1773_v1  ;;  %s1833_s6 = smov 96   ;;  %s1834_s7 = smov 32   ;;  %v1775_v61 = vld [vmem:[%s2573_s1 + $0x48] sm:$0xff]   ;;  %vm606_vm4 = vcmask 261120   ;;  %vm623_vm5 = vcmask 523264  }
  0x31   : > { %s2013_s29 = scalar_lea.vmem %s1890_s22, %s1581_s26  ;;  %1599 = vmatpush3.bf16.msra.mxu0 %v1774_v2  ;;  %1700 = vmatpush3.bf16.msra.mxu1 %v1774_v2  ;;  %v1776_v63 = vld [vmem:[%s2573_s1 + $0x8] sm:$0xff]   ;;  %vm640_vm6 = vcmask 785408   ;;  %vm1329_vm7 = vcmask 257024   ;;  %vm1330_vm8 = vsmask.f32 7938  ;;  %s2407_s8 = scalar_lea.vmem %s1895_s25, %s1581_s26  ;;  %vm1337_vm11 = vcmask 253952  }
  0x32   : > { %v2019_v3 = vld [vmem:[%s2013_s29 + $0x18] sm:$0xff]   ;;  %v2024_v4 = vld [vmem:[%s2013_s29 + $0xc] sm:$0xff]   ;;  %v2027_v5 = vld [vmem:[%s2013_s29 + $0x14] ss:$0 sps:$4 sm:$0x11]   ;;  %1600 = vmatprep.subr.bf16.mxu0 %v1775_v61  ;;  %1693 = vmatprep.subr.bf16.mxu1 %v1775_v61 }
  0x33   : > { %556 = vrot.lane.b32.xlu1 %v2019_v3, %s1832_s5  ;;  %v2030_v6 = vld [vmem:[%s2013_s29 + $0x54] sm:$0xff]   ;;  %v368_v7 = vshrl.u32 %v2019_v3, 16  ;;  %v459_v8 = vrot.slane %v2024_v4, 1  ;;  %v460_v9 = vrot.slane %v2027_v5, 1  ;;  %v2039_v11 = vld [vmem:[%s2013_s29] sm:$0xff]   ;;  %v2043_v13 = vld [vmem:[%s2013_s29 + $0x48] sm:$0xff]  }
  0x34   : > { %v2036_v10 = vld [vmem:[%s2013_s29 + $0x5c] ss:$0 sps:$4 sm:$0x11]   ;;  %v477_v12 = vrot.slane %v2030_v6, 1  ;;  %v456_v17 = vrot.slane %v2039_v11, 1  ;;  %v344_v18 = vshrl.u32 %v2039_v11, 16  ;;  %vm2414_vm12 = vmand %vm1329_vm7, %vm1330_vm8 }
  0x35   : > { %v2046_v14 = vsel %vm455_vm2, %v459_v8, %v460_v9  ;;  %v478_v15 = vrot.slane %v2036_v10, 1  ;;  %v1759_v16 = vld [vmem:[%s2013_s29 + $0x8] ss:$0 sps:$4 sm:$0x11]   ;;  %v346_v19 = vshll.u32 %v2039_v11, 16  ;;  %v416_v20 = vshrl.u32 %v2043_v13, 16  ;;  %1601 = vmatpush3.bf16.msra.mxu0 %v1776_v63  ;;  %1701 = vmatpush3.bf16.msra.mxu1 %v1776_v63 }
  0x36   : > { %535 = vrot.lane.b32.xlu0 %v2046_v14, %s1834_s7  ;;  %v457_v22 = vrot.slane %v1759_v16, 1  ;;  %v351_v23 = vshll.u32 %v1759_v16, 16  ;;  %v1761_v25 = vld [vmem:[%s2013_s29 + $0x50] ss:$0 sps:$4 sm:$0x11]   ;;  %v418_v26 = vshll.u32 %v2043_v13, 16 }
  0x37   : > { %501 = vrot.lane.b32.xlu1 %v2024_v4, %s1833_s6  ;;  %v2059_v21 = vsel %vm455_vm2, %v477_v12, %v478_v15  ;;  %v348_v24 = vrot.slane %v346_v19, 1  ;;  %v370_v27 = vshll.u32 %v2019_v3, 16  ;;  %v1762_v30 = vld [vmem:[%s2013_s29 + $0x20] ss:$0 sps:$4 sm:$0x11]   ;;  %v423_v33 = vshll.u32 %v1761_v25, 16 }
  0x38   : > { %v458_v28 = vsel %vm455_vm2, %v456_v17, %v457_v22  ;;  %v353_v29 = vrot.slane %v351_v23, 1  ;;  %v420_v32 = vrot.slane %v418_v26, 1  ;;  %v2070_v35 = vld [vmem:[%s2013_s29 + $0x60] sm:$0xff]   ;;  %v375_v36 = vshll.u32 %v1762_v30, 16  ;;  %v1777_v9 = vld [vmem:[%s2573_s1 + $0x50] sm:$0xff]  }
  0x39   : > { %v349_v31 = vor.u32 %v348_v24, %v344_v18  ;;  %v372_v34 = vrot.slane %v370_v27, 1  ;;  %v474_v37 = vrot.slane %v2043_v13, 1  ;;  %v475_v38 = vrot.slane %v1761_v25, 1  ;;  %v2075_v43 = vld [vmem:[%s2013_s29 + $0x68] ss:$0 sps:$4 sm:$0x11]   ;;  %1602 = vmatprep.subr.bf16.mxu0 %v1777_v9  ;;  %1694 = vmatprep.subr.bf16.mxu1 %v1777_v9 }
  0x3a   : > { %547 = vrot.lane.b32.xlu0 %v2059_v21, %s1834_s7  ;;  %v421_v40 = vor.u32 %v420_v32, %v416_v20  ;;  %v425_v41 = vrot.slane %v423_v33, 1  ;;  %v377_v44 = vrot.slane %v375_v36, 1  ;;  %v523_v45 = vshll.u32 %v2070_v35, 16  ;;  %v2100_v58 = vld [vmem:[%s2013_s29 + $0x24] sm:$0xff]   ;;  %v1778_v22 = vld [vmem:[%s2573_s1 + $0x10] sm:$0xff]   ;;  %v1779_v25 = vld [vmem:[%s2573_s1 + $0x58] sm:$0xff]  }
  0x3b   : > { %480 = vrot.lane.b32.xlu1 %v458_v28, %s1832_s5  ;;  %v354_v39 = vsel %vm342_vm3, %v349_v31, %v353_v29  ;;  %v373_v42 = vor.u32 %v372_v34, %v368_v7  ;;  %v358_v47 = vshll.u32 %v2024_v4, 16  ;;  %v521_v49 = vshrl.u32 %v2070_v35, 16  ;;  %v2106_v62 = vld [vmem:[%s2013_s29 + $0x2c] ss:$0 sps:$4 sm:$0x11]   ;;  %1603 = vmatpush3.bf16.msra.mxu0 %v1778_v22  ;;  %v1780_v29 = vld [vmem:[%s2573_s1 + $0x18] sm:$0xff]  }
  0x3c   : > { %v2080_v46 = vsel %vm342_vm3, %v421_v40, %v425_v41  ;;  %v525_v50 = vrot.slane %v523_v45, 1  ;;  %v528_v51 = vshll.u32 %v2075_v43, 16  ;;  %v2091_v52 = vsel %vm455_vm2, %v474_v37, %v475_v38  ;;  %v2142_v23 = vld [vmem:[%s2013_s29 + $0x6c] sm:$0xff]   ;;  %1702 = vmatpush3.bf16.msra.mxu1 %v1778_v22  ;;  %v2152_v28 = vld [vmem:[%s2013_s29 + $0x74] ss:$0 sps:$4 sm:$0x11]   ;;  %1604 = vmatprep.subr.bf16.mxu0 %v1779_v25 }
  0x3d   : > { %v2086_v48 = vsel %vm342_vm3, %v373_v42, %v377_v44  ;;  %v356_v53 = vshrl.u32 %v2024_v4, 16  ;;  %v360_v54 = vrot.slane %v358_v47, 1  ;;  %v363_v55 = vshll.u32 %v2027_v5, 16  ;;  %1695 = vmatprep.subr.bf16.mxu1 %v1779_v25  ;;  %v1781_v31 = vld [vmem:[%s2573_s1 + $0x60] sm:$0xff]   ;;  %v1783_v36 = vld [vmem:[%s2573_s1 + $0x68] sm:$0xff]   ;;  %v1786_v44 = vld [vmem:[%s2573_s1 + $0x30] sm:$0xff]  }
  0x3e   : > { %439 = vrot.lane.b32.xlu0 %v354_v39, %s1834_s7  ;;  %v526_v56 = vor.u32 %v525_v50, %v521_v49  ;;  %v530_v57 = vrot.slane %v528_v51, 1  ;;  %v462_v1 = vrot.slane %v2019_v3, 1  ;;  %v463_v2 = vrot.slane %v1762_v30, 1  ;;  %v1782_v32 = vld [vmem:[%s2573_s1 + $0x20] sm:$0xff]   ;;  %v1784_v40 = vld [vmem:[%s2573_s1 + $0x28] sm:$0xff]   ;;  %v2202_v49 = vld [vmem:[%s2013_s29 + $0x30] sm:$0xff]  }
  0x3f   : > { %451 = vrot.lane.b32.xlu1 %v2080_v46, %s1834_s7  ;;  %v361_v59 = vor.u32 %v360_v54, %v356_v53  ;;  %v365_v60 = vrot.slane %v363_v55, 1  ;;  %v382_v5 = vshll.u32 %v2100_v58, 16  ;;  %v430_v8 = vshll.u32 %v2030_v6, 16  ;;  %1605 = vmatpush3.bf16.msra.mxu0 %v1780_v29  ;;  %v1787_v50 = vld [vmem:[%s2573_s1 + $0x78] sm:$0xff]  }
  0x40   : > { %v2116_v0 = vsel %vm342_vm3, %v526_v56, %v530_v57  ;;  %v387_v12 = vshll.u32 %v2106_v62, 16  ;;  %v2133_v15 = vsel %vm455_vm2, %v462_v1, %v463_v2  ;;  %v380_v16 = vshrl.u32 %v2100_v58, 16  ;;  %1606 = vmatprep.subr.bf16.mxu0 %v1781_v31  ;;  %1703 = vmatpush3.bf16.msra.mxu1 %v1780_v29  ;;  %v1788_v51 = vld [vmem:[%s2573_s1 + $0x38] sm:$0xff]  }
  0x41   : > { %v2121_v7 = vsel %vm342_vm3, %v361_v59, %v365_v60  ;;  %v384_v17 = vrot.slane %v382_v5, 1  ;;  %v428_v18 = vshrl.u32 %v2030_v6, 16  ;;  %v432_v19 = vrot.slane %v430_v8, 1  ;;  %1696 = vmatprep.subr.bf16.mxu1 %v1781_v31  ;;  %v1770_v56 = vld [vmem:[%s2013_s29 + $0x38] ss:$0 sps:$4 sm:$0x11]  }
  0x42   : > { %587 = vrot.lane.b32.xlu0 %v2086_v48, %s1833_s6  ;;  %v435_v20 = vshll.u32 %v2036_v10, 16  ;;  %v389_v24 = vrot.slane %v387_v12, 1  ;;  %v532_v30 = vrot.slane %v2070_v35, 1  ;;  %v578_v34 = vshll.u32 %v2142_v23, 16  ;;  %v2222_v59 = vld [vmem:[%s2573_s1 + $0x80] sm:$0xff]  }
  0x43   : > { %492 = vrot.lane.b32.xlu1 %v2091_v52, %s1832_s5  ;;  %v385_v26 = vor.u32 %v384_v17, %v380_v16  ;;  %v433_v10 = vor.u32 %v432_v19, %v428_v18  ;;  %v576_v38 = vshrl.u32 %v2142_v23, 16  ;;  %v583_v39 = vshll.u32 %v2152_v28, 16  ;;  %1607 = vmatpush3.bf16.msra.mxu0 %v1782_v32  ;;  %v2237_v2 = vld [vmem:[%s2013_s29 + $0x3c] sm:$0xff]   ;;  %v1772_v12 = vld [vmem:[%s2013_s29 + $0x44] ss:$0 sps:$4 sm:$0x11]  }
  0x44   : > { %v437_v27 = vrot.slane %v435_v20, 1  ;;  %v580_v42 = vrot.slane %v578_v34, 1  ;;  %1608 = vmatprep.subr.bf16.mxu0 %v1783_v36  ;;  %1704 = vmatpush3.bf16.msra.mxu1 %v1782_v32  ;;  %v465_v54 = vrot.slane %v2100_v58, 1  ;;  %v466_v55 = vrot.slane %v2106_v62, 1 }
  0x45   : > { %v2170_v33 = vsel %vm342_vm3, %v385_v26, %v389_v24  ;;  %1697 = vmatprep.subr.bf16.mxu1 %v1783_v36  ;;  %v585_v47 = vrot.slane %v583_v39, 1  ;;  %v394_v57 = vshll.u32 %v2202_v49, 16  ;;  %v392_v60 = vshrl.u32 %v2202_v49, 16 }
  0x46   : > { %568 = vrot.lane.b32.xlu0 %v2070_v35, %s1832_s5  ;;  %v2177_v37 = vsel %vm342_vm3, %v433_v10, %v437_v27  ;;  %v581_v45 = vor.u32 %v580_v42, %v576_v38  ;;  %v399_v62 = vshll.u32 %v1770_v56, 16  ;;  %v468_v8 = vrot.slane %v2202_v49, 1 }
  0x47   : > { %513 = vrot.lane.b32.xlu1 %v2030_v6, %s1833_s6  ;;  %1609 = vmatpush3.bf16.msra.mxu0 %v1784_v40  ;;  %v396_v61 = vrot.slane %v394_v57, 1  ;;  %v469_v9 = vrot.slane %v1770_v56, 1  ;;  %v406_v16 = vshll.u32 %v2237_v2, 16  ;;  %v404_v18 = vshrl.u32 %v2237_v2, 16 }
  0x48   : > { %1705 = vmatpush3.bf16.msra.mxu1 %v1784_v40  ;;  %v586_v53 = vsel %vm342_vm3, %v581_v45, %v585_v47  ;;  %v401_v1 = vrot.slane %v399_v62, 1  ;;  %v411_v20 = vshll.u32 %v1772_v12, 16  ;;  %v603_v25 = vrot.slane %v2142_v23, 1 }
  0x49   : > { %v397_v63 = vor.u32 %v396_v61, %v392_v60  ;;  %v2254_v17 = vsel %vm455_vm2, %v468_v8, %v469_v9  ;;  %v408_v19 = vrot.slane %v406_v16, 1  ;;  %v604_v26 = vrot.slane %v2152_v28, 1  ;;  %v1790_v61 = vld [vmem:[%s2573_s1 + $0x88] sm:$0xff]  }
  0x4a   : > { %599 = vrot.lane.b32.xlu0 %v2116_v0, %s1833_s6  ;;  %v413_v24 = vrot.slane %v411_v20, 1  ;;  %v471_v29 = vrot.slane %v2237_v2, 1  ;;  %vm1163_vm9 = vsmask.f32 256  ;;  %vm1164_vm10 = vsmask.f32 4368 }
  0x4b   : > { %441 = vrot.lane.b32.xlu1 %v2121_v7, %s1834_s7  ;;  %v2244_v5 = vsel %vm342_vm3, %v397_v63, %v401_v1  ;;  %v409_v22 = vor.u32 %v408_v19, %v404_v18  ;;  %v2266_v10 = vsel %vm455_vm2, %v603_v25, %v604_v26  ;;  %vm2425_vm13 = vmor %vm1163_vm9, %vm1164_vm10 }
  0x4c   : > { %vm2431_vm14 = vmand %vm1337_vm11, %vm1163_vm9 }
  0x4d   : > { %v2271_v27 = vsel %vm342_vm3, %v409_v22, %v413_v24 }
  0x4e   : > { %537 = vrot.lane.b32.xlu0 %v2133_v15, %s1834_s7 }
  0x4f   : > { %482 = vrot.lane.b32.xlu1 %v2046_v14, %s1832_s5  ;;  %v533_v14 = vrot.slane %v2075_v43, 1  ;;  %v1785_v43 = vld [vmem:[%s2573_s1 + $0x70] sm:$0xff]  }
  0x50   : > { %1610 = vmatprep.subr.bf16.mxu0 %v1785_v43  ;;  %1698 = vmatprep.subr.bf16.mxu1 %v1785_v43 }
  0x51   : > { %v2189_v41 = vsel %vm455_vm2, %v532_v30, %v533_v14  ;;  %1611 = vmatpush3.bf16.msra.mxu0 %v1786_v44  ;;  %1706 = vmatpush3.bf16.msra.mxu1 %v1786_v44  ;;  %v472_v30 = vrot.slane %v1772_v12, 1 }
  0x52   : > { %558 = vrot.lane.b32.xlu0 %v2100_v58, %s1832_s5  ;;  %1612 = vmatprep.subr.bf16.mxu0 %v1787_v50 }
  0x53   : > { %503 = vrot.lane.b32.xlu1 %v2019_v3, %s1833_s6  ;;  %1699 = vmatprep.subr.bf16.mxu1 %v1787_v50 }
  0x55   : > { %1613 = vmatpush3.bf16.msra.mxu0 %v1788_v51  ;;  %1707 = vmatpush3.bf16.msra.mxu1 %v1788_v51 }
  0x56   : > { %589 = vrot.lane.b32.xlu0 %v2170_v33, %s1833_s6  ;;  %1672 = vmatprep.subr.bf16.mxu1 %v2222_v59 }
  0x57   : > { %453 = vrot.lane.b32.xlu1 %v2177_v37, %s1834_s7 }
  0x5a   : > { %549 = vrot.lane.b32.xlu0 %v2189_v41, %s1834_s7 }
  0x5b   : > { %494 = vrot.lane.b32.xlu1 %v2059_v21, %s1832_s5 }
  0x5e   : > { %570 = vrot.lane.b32.xlu0 %v2142_v23, %s1832_s5  ;;  %v2279_v23 = vsel %vm455_vm2, %v471_v29, %v472_v30 }
  0x5f   : > { %515 = vrot.lane.b32.xlu1 %v2070_v35, %s1833_s6  ;;  %v2228_v35 = vsel %vm455_vm2, %v465_v54, %v466_v55 }
  0x62   : > { %601 = vrot.lane.b32.xlu0 %v586_v53, %s1833_s6 }
  0x63   : > { %443 = vrot.lane.b32.xlu1 %v2086_v48, %s1834_s7 }
  0x66   : > { %539 = vrot.lane.b32.xlu0 %v2228_v35, %s1834_s7 }
  0x67   : > { %484 = vrot.lane.b32.xlu1 %v2133_v15, %s1832_s5 }
  0x6a   : > { %560 = vrot.lane.b32.xlu0 %v2202_v49, %s1832_s5 }
  0x6b   : > { %505 = vrot.lane.b32.xlu1 %v2100_v58, %s1833_s6 }
  0x6e   : > { %591 = vrot.lane.b32.xlu0 %v2244_v5, %s1833_s6 }
  0x6f   : > { %445 = vrot.lane.b32.xlu1 %v2170_v33, %s1834_s7 }
  0x72   : > { %541 = vrot.lane.b32.xlu0 %v2254_v17, %s1834_s7 }
  0x73   : > { %486 = vrot.lane.b32.xlu1 %v2228_v35, %s1832_s5 }
  0x76   : > { %562 = vrot.lane.b32.xlu0 %v2237_v2, %s1832_s5 }
  0x77   : > { %507 = vrot.lane.b32.xlu1 %v2202_v49, %s1833_s6 }
  0x7a   : > { %593 = vrot.lane.b32.xlu0 %v2271_v27, %s1833_s6 }
  0x7b   : > { %447 = vrot.lane.b32.xlu1 %v2244_v5, %s1834_s7 }
  0x7e   : > { %543 = vrot.lane.b32.xlu0 %v2279_v23, %s1834_s7 }
  0x7f   : > { %488 = vrot.lane.b32.xlu1 %v2254_v17, %s1832_s5 }
  0x82   : > { %564 = vrot.lane.b32.xlu0 %v2043_v13, %s1832_s5 }
  0x83   : > { %509 = vrot.lane.b32.xlu1 %v2237_v2, %s1833_s6 }
  0x86   : > { %595 = vrot.lane.b32.xlu0 %v2080_v46, %s1833_s6 }
  0x87   : > { %449 = vrot.lane.b32.xlu1 %v2271_v27, %s1834_s7 }
  0x8a   : > { %545 = vrot.lane.b32.xlu0 %v2091_v52, %s1834_s7 }
  0x8b   : > { %490 = vrot.lane.b32.xlu1 %v2279_v23, %s1832_s5 }
  0x8e   : > { %566 = vrot.lane.b32.xlu0 %v2030_v6, %s1832_s5 }
  0x8f   : > { %511 = vrot.lane.b32.xlu1 %v2043_v13, %s1833_s6 }
  0x92   : > { %597 = vrot.lane.b32.xlu0 %v2177_v37, %s1833_s6 }
  0xa5   : > { %v557_v28 = vpop.permute.xlu1 %556 }
  0xa8   : > { %v536_v14 = vpop.permute.xlu0 %535 }
  0xa9   : > { %v502_v31 = vpop.permute.xlu1 %501  ;;  %v667_v38 = vsel %vm606_vm4, %v2121_v7, %v536_v14 }
  0xaa   : > { %v690_v44 = vsel %vm623_vm5, %v667_v38, %v557_v28 }
  0xac   : > { %v548_v32 = vpop.permute.xlu0 %547 }
  0xad   : > { %v481_v34 = vpop.permute.xlu1 %480  ;;  %v685_v53 = vsel %vm606_vm4, %v2177_v37, %v548_v32 }
  0xb0   : > { %v440_v36 = vpop.permute.xlu0 %439 }
  0xb1   : > { %v608_v39 = vsel %vm606_vm4, %v2039_v11, %v440_v36  ;;  %v452_v40 = vpop.permute.xlu1 %451 }
  0xb2   : > { %v625_v42 = vsel %vm623_vm5, %v608_v39, %v481_v34  ;;  %v620_v11 = vsel %vm606_vm4, %v2043_v13, %v452_v40 }
  0xb3   : > { %v642_v50 = vsel %vm640_vm6, %v625_v42, %v502_v31 }
  0xb4   : > { %v588_v43 = vpop.permute.xlu0 %587 }
  0xb5   : > { %v493_v45 = vpop.permute.xlu1 %492  ;;  %v706_v47 = vsel %vm640_vm6, %v690_v44, %v588_v43 }
  0xb6   : > { %936 = vmatprep.mubr.bf16.mxu0 %v706_v47  ;;  %v637_v56 = vsel %vm623_vm5, %v620_v11, %v493_v45 }
  0xb7   : > { %937 = vmatmul.mubr.bf16.vlgmr.msra.gmra.mrb[0].mxu0 %v642_v50 }
  0xb8   : > { %v569_v51 = vpop.permute.xlu0 %568 }
  0xb9   : > { %v514_v7 = vpop.permute.xlu1 %513  ;;  %v702_v54 = vsel %vm623_vm5, %v685_v53, %v569_v51 }
  0xba   : > { %v660_v62 = vsel %vm640_vm6, %v637_v56, %v514_v7 }
  0xbc   : > { %v600_v55 = vpop.permute.xlu0 %599 }
  0xbd   : > { %v442_v57 = vpop.permute.xlu1 %441  ;;  %v724_v60 = vsel %vm640_vm6, %v702_v54, %v600_v55 }
  0xbe   : > { %984 = vmatprep.mubr.bf16.mxu1 %v724_v60  ;;  %v610_v8 = vsel %vm606_vm4, %v2024_v4, %v442_v57 }
  0xbf   : > { %985 = vmatmul.mubr.bf16.vlgmr.msra.gmra.mrb[0].mxu1 %v660_v62 }
  0xc0   : > { %v538_v13 = vpop.permute.xlu0 %537  ;;  %1673 = vmatpush3.bf16.msra.mxu1 %v2222_v59 }
  0xc1   : > { %v483_v37 = vpop.permute.xlu1 %482  ;;  %1674 = vmatprep.subr.bf16.mxu1 %v1790_v61  ;;  %v670_v9 = vsel %vm606_vm4, %v2086_v48, %v538_v13 }
  0xc2   : > { %v627_v18 = vsel %vm623_vm5, %v610_v8, %v483_v37 }
  0xc4   : > { %v559_v63 = vpop.permute.xlu0 %558  ;;  %1675 = vmatpush3.bf16.msra.mxu1 %v1790_v61 }
  0xc5   : > { %v504_v1 = vpop.permute.xlu1 %503  ;;  %v692_v12 = vsel %vm623_vm5, %v670_v9, %v559_v63 }
  0xc6   : > { %v645_v59 = vsel %vm640_vm6, %v627_v18, %v504_v1 }
  0xc8   : > { %v590_v16 = vpop.permute.xlu0 %589 }
  0xc9   : > { %v454_v19 = vpop.permute.xlu1 %453  ;;  %v709_v20 = vsel %vm640_vm6, %v692_v12, %v590_v16 }
  0xca   : > { %944 = vmatprep.mubr.bf16.mxu0 %v709_v20  ;;  %v622_v4 = vsel %vm606_vm4, %v2030_v6, %v454_v19 }
  0xcb   : > { %945 = vmatmul.mubr.bf16.gmra.mrb[4].mxu0 %v645_v59 }
  0xcc   : > { %v550_v22 = vpop.permute.xlu0 %549 }
  0xcd   : > { %v495_v24 = vpop.permute.xlu1 %494  ;;  %v688_v48 = vsel %vm606_vm4, %v2116_v0, %v550_v22 }
  0xce   : > { %v639_v28 = vsel %vm623_vm5, %v622_v4, %v495_v24 }
  0xd0   : > { %v571_v25 = vpop.permute.xlu0 %570 }
  0xd1   : > { %v516_v26 = vpop.permute.xlu1 %515  ;;  %v704_v29 = vsel %vm623_vm5, %v688_v48, %v571_v25 }
  0xd2   : > { %v663_v32 = vsel %vm640_vm6, %v639_v28, %v516_v26 }
  0xd4   : > { %v602_v30 = vpop.permute.xlu0 %601 }
  0xd5   : > { %v444_v31 = vpop.permute.xlu1 %443  ;;  %v727_v14 = vsel %vm640_vm6, %v704_v29, %v602_v30 }
  0xd6   : > { %992 = vmatprep.mubr.bf16.mxu1 %v727_v14  ;;  %v612_v0 = vsel %vm606_vm4, %v2019_v3, %v444_v31 }
  0xd7   : > { %993 = vmatmul.mubr.bf16.gmra.mrb[4].mxu1 %v663_v32 }
  0xd8   : > { %v540_v34 = vpop.permute.xlu0 %539  ;;  %1676 = vmatprep.mubr.msk.bf16.mxu1 %vm606_vm4, %v2133_v15 }
  0xd9   : > { %v485_v6 = vpop.permute.xlu1 %484  ;;  %v673_v39 = vsel %vm606_vm4, %v2170_v33, %v540_v34 }
  0xda   : > { %v629_v15 = vsel %vm623_vm5, %v612_v0, %v485_v6 }
  0xdc   : > { %v561_v36 = vpop.permute.xlu0 %560 }
  0xdd   : > { %v506_v38 = vpop.permute.xlu1 %505  ;;  %v694_v40 = vsel %vm623_vm5, %v673_v39, %v561_v36 }
  0xde   : > { %v648_v3 = vsel %vm640_vm6, %v629_v15, %v506_v38 }
  0xdf   : > { %1677 = vmatmul.mubr.msk.bf16.vlgmr.msra.gmra.mrb[8].mxu1 %vm606_vm4, %v2228_v35 }
  0xe0   : > { %v592_v42 = vpop.permute.xlu0 %591  ;;  %1680 = vmatprep.mubr.msk.bf16.mxu1 %vm606_vm4, %v2254_v17 }
  0xe1   : > { %v446_v43 = vpop.permute.xlu1 %445  ;;  %v712_v44 = vsel %vm640_vm6, %v694_v40, %v592_v42  ;;  %v2398_v42 = vld [vmem:[%s2574_s2] ss:$0 sm:$0xff] }
  0xe2   : > { %952 = vmatprep.mubr.bf16.mxu0 %v712_v44  ;;  %v614_v17 = vsel %vm606_vm4, %v2100_v58, %v446_v43 }
  0xe3   : > { %953 = vmatmul.mubr.bf16.gmra.mrb[8].mxu0 %v648_v3 }
  0xe4   : > { %v542_v45 = vpop.permute.xlu0 %541 }
  0xe5   : > { %v487_v33 = vpop.permute.xlu1 %486  ;;  %v676_v50 = vsel %vm606_vm4, %v2244_v5, %v542_v45 }
  0xe6   : > { %v631_v11 = vsel %vm623_vm5, %v614_v17, %v487_v33 }
  0xe7   : > { %1681 = vmatmul.mubr.msk.bf16.gmra.mrb[12].mxu1 %vm606_vm4, %v2279_v23 }
  0xe8   : > { %v563_v35 = vpop.permute.xlu0 %562  ;;  %1684 = vmatprep.mubr.msk.bf16.mxu1 %vm606_vm4, %v2091_v52 }
  0xe9   : > { %v508_v47 = vpop.permute.xlu1 %507  ;;  %v696_v51 = vsel %vm623_vm5, %v676_v50, %v563_v35 }
  0xea   : > { %v651_v23 = vsel %vm640_vm6, %v631_v11, %v508_v47 }
  0xec   : > { %v594_v7 = vpop.permute.xlu0 %593 }
  0xed   : > { %v448_v53 = vpop.permute.xlu1 %447  ;;  %v715_v54 = vsel %vm640_vm6, %v696_v51, %v594_v7 }
  0xee   : > { %960 = vmatprep.mubr.bf16.mxu0 %v715_v54  ;;  %v616_v56 = vsel %vm606_vm4, %v2202_v49, %v448_v53 }
  0xef   : > { %961 = vmatmul.mubr.bf16.gmra.mrb[12].mxu0 %v651_v23  ;;  %1685 = vmatmul.mubr.msk.bf16.gmra.mrb[16].mxu1 %vm606_vm4, %v2059_v21 }
  0xf0   : > { %v544_v52 = vpop.permute.xlu0 %543  ;;  %1688 = vmatprep.mubr.msk.bf16.mxu1 %vm606_vm4, %v2189_v41 }
  0xf1   : > { %v489_v58 = vpop.permute.xlu1 %488  ;;  %v679_v57 = vsel %vm606_vm4, %v2271_v27, %v544_v52 }
  0xf2   : > { %v633_v21 = vsel %vm623_vm5, %v616_v56, %v489_v58 }
  0xf4   : > { %v565_v5 = vpop.permute.xlu0 %564 }
  0xf5   : > { %v510_v55 = vpop.permute.xlu1 %509  ;;  %v698_v60 = vsel %vm623_vm5, %v679_v57, %v565_v5 }
  0xf6   : > { %v654_v13 = vsel %vm640_vm6, %v633_v21, %v510_v55 }
  0xf7   : > { %1689 = vmatmul.mubr.msk.bf16.gmra.mrb[20].mxu1 %vm606_vm4, %v2266_v10 }
  0xf8   : > { %v596_v61 = vpop.permute.xlu0 %595 }
  0xf9   : > { %v450_v62 = vpop.permute.xlu1 %449  ;;  %v718_v41 = vsel %vm640_vm6, %v698_v60, %v596_v61 }
  0xfa   : > { %968 = vmatprep.mubr.bf16.mxu0 %v718_v41  ;;  %v618_v27 = vsel %vm606_vm4, %v2237_v2, %v450_v62 }
  0xfb   : > { %969 = vmatmul.mubr.bf16.gmra.mrb[16].mxu0 %v654_v13 }
  0xfc   : > { %v546_v37 = vpop.permute.xlu0 %545 }
  0xfd   : > { %v491_v49 = vpop.permute.xlu1 %490  ;;  %v682_v10 = vsel %vm606_vm4, %v2080_v46, %v546_v37 }
  0xfe   : > { %v635_v12 = vsel %vm623_vm5, %v618_v27, %v491_v49 }
 0x100   : > { %v567_v63 = vpop.permute.xlu0 %566 }
 0x101   : > { %v512_v1 = vpop.permute.xlu1 %511  ;;  %v700_v8 = vsel %vm623_vm5, %v682_v10, %v567_v63 }
 0x102   : > { %v657_v18 = vsel %vm640_vm6, %v635_v12, %v512_v1 }
 0x104   : > { %v598_v9 = vpop.permute.xlu0 %597 }
 0x105   : > { %v721_v16 = vsel %vm640_vm6, %v700_v8, %v598_v9 }
 0x106   : > { %976 = vmatprep.mubr.bf16.mxu0 %v721_v16  ;;  %v1544_v16 = vld [vmem:[%s2407_s8 + $0x18] sm:$0xf] }
 0x107   : > { %977 = vmatmul.mubr.bf16.gmra.mrb[20].mxu0 %v657_v18 }
 0x18a   : > { %v1614_v19 = vpop.f32.mrb[0].mxu0 }
 0x18b   : > { %v1615_v20 = vpop.f32.mrb[1].mxu0 }
 0x18c   : > { %v1616_v59 = vadd.f32 %v1615_v20, %v1614_v19  ;;  %v1617_v22 = vpop.f32.mrb[2].mxu0 }
 0x18d   : > { %v1618_v2 = vpop.f32.mrb[3].mxu0 }
 0x18e   : > { %v1619_v24 = vadd.f32 %v1618_v2, %v1617_v22  ;;  %v939_v44 = vadd.f32 %v1616_v59, %v2398_v42 }
 0x190   : > { %v942_v17 = vadd.f32 %v1619_v24, %v2398_v42 }
 0x192   : > { %v1650_v25 = vpop.f32.mrb[0].mxu1 }
 0x193   : > { %v1651_v46 = vpop.f32.mrb[1].mxu1 }
 0x194   : > { %v2387_v26 = vadd.f32 %v1651_v46, %v1650_v25  ;;  %v1653_v4 = vpop.f32.mrb[2].mxu1  ;;  %v1539_v25 = vld [vmem:[%s2407_s8 + $0xc] sm:$0xf] }
 0x195   : > { %v1654_v48 = vpop.f32.mrb[3].mxu1 }
 0x196   : > { %v2389_v29 = vadd.f32 %v1654_v48, %v1653_v4 }
 0x19e   : > { %v1620_v30 = vpop.f32.mrb[4].mxu0 }
 0x19f   : > { %v1621_v28 = vpop.f32.mrb[5].mxu0 }
 0x1a0   : > { %v1622_v31 = vadd.f32 %v1621_v28, %v1620_v30  ;;  %v1623_v14 = vpop.f32.mrb[6].mxu0 }
 0x1a1   : > { %v1624_v32 = vpop.f32.mrb[7].mxu0 }
 0x1a2   : > { %v1625_v34 = vadd.f32 %v1624_v32, %v1623_v14  ;;  %v947_v15 = vadd.f32 %v1622_v31, %v2398_v42  ;;  %v1547_v32 = vld [vmem:[%s2407_s8 + $0x20] sm:$0x1] }
 0x1a4   : > { %v950_v33 = vadd.f32 %v1625_v34, %v2398_v42 }
 0x1aa   : > { %v1656_v6 = vpop.f32.mrb[4].mxu1 }
 0x1ab   : > { %v1657_v36 = vpop.f32.mrb[5].mxu1 }
 0x1ac   : > { %v2391_v38 = vadd.f32 %v1657_v36, %v1656_v6  ;;  %v1659_v0 = vpop.f32.mrb[6].mxu1 }
 0x1ad   : > { %v1660_v39 = vpop.f32.mrb[7].mxu1 }
 0x1ae   : > { %v2393_v40 = vadd.f32 %v1660_v39, %v1659_v0 }
 0x1b2   : > { %v1678_v43 = vpop.f32.mrb[8].mxu1 }
 0x1b3   : > { %v1044_v3 = vadd.f32 %v1678_v43, %v947_v15  ;;  %v1035_v45 = vpop.f32.mrb[9].mxu1  ;;  %v1542_v15 = vld [vmem:[%s2407_s8 + $0x14] sm:$0x1] }
 0x1b4   : > { %v1036_v35 = vadd.f32 %v1035_v45, %v939_v44  ;;  %v1679_v47 = vpop.f32.mrb[10].mxu1 }
 0x1b5   : > { %v1100_v50 = vmax.f32 %v1044_v3, 0.0  ;;  %v1047_v51 = vadd.f32 %v1679_v47, %v950_v33  ;;  %v1038_v7 = vpop.f32.mrb[11].mxu1 }
 0x1b6   : > { %v1098_v11 = vmax.f32 %v1036_v35, 0.0  ;;  %v1039_v53 = vadd.f32 %v1038_v7, %v942_v17  ;;  %v1626_v54 = vpop.f32.mrb[8].mxu0 }
 0x1b7   : > { %v1584_v23 = vpack.c.bf16 %v1100_v50, %v1100_v50  ;;  %v1101_v52 = vmax.f32 %v1047_v51, 0.0  ;;  %v1627_v58 = vpop.f32.mrb[9].mxu0 }
 0x1b8   : > { %v1582_v5 = vpack.c.bf16 %v1098_v11, %v1098_v11  ;;  %v1099_v55 = vmax.f32 %v1039_v53, 0.0  ;;  %v1628_v56 = vadd.f32 %v1627_v58, %v1626_v54  ;;  %v1629_v57 = vpop.f32.mrb[10].mxu0 }
 0x1b9   : > { %v1184_v60 = vshrl.u32 %v1584_v23, 16  ;;  %v1187_v61 = vshll.u32 %v1584_v23, 16  ;;  %v1585_v21 = vpack.c.bf16 %v1101_v52, %v1101_v52  ;;  %v1630_v62 = vpop.f32.mrb[11].mxu0 }
 0x1ba   : > { %v1167_v41 = vshrl.u32 %v1582_v5, 16  ;;  %v1170_v13 = vshll.u32 %v1582_v5, 16  ;;  %v1583_v37 = vpack.c.bf16 %v1099_v55, %v1099_v55  ;;  %v1631_v49 = vadd.f32 %v1630_v62, %v1629_v57  ;;  %v2409_v63 = vpop.f32.mrb[12].mxu1  ;;  %v1549_v62 = vld [vmem:[%s2407_s8 + $0x24] sm:$0xf] }
 0x1bb   : > { %v1186_v27 = vrot.slane %v1184_v60, 7  ;;  %v1192_v10 = vshrl.u32 %v1585_v21, 16  ;;  %v1195_v1 = vshll.u32 %v1585_v21, 16  ;;  %v955_v8 = vadd.f32 %v1628_v56, %v2398_v42  ;;  %v1051_v9 = vpop.f32.mrb[13].mxu1 }
 0x1bc   : > { %v1169_v18 = vrot.slane %v1167_v41, 7  ;;  %v1175_v19 = vshrl.u32 %v1583_v37, 16  ;;  %v1178_v20 = vshll.u32 %v1583_v37, 16  ;;  %v2419_v59 = vpop.f32.mrb[14].mxu1  ;;  %v958_v22 = vadd.f32 %v1631_v49, %v2398_v42 }
 0x1bd   : > { %v1189_v2 = vor.u32 %v1187_v61, %v1186_v27  ;;  %v1190_v24 = vrot.slane %v1186_v27, 4  ;;  %v1194_v4 = vrot.slane %v1192_v10, 7  ;;  %v1052_v48 = vadd.f32 %v1051_v9, %v955_v8  ;;  %v1054_v30 = vpop.f32.mrb[15].mxu1 }
 0x1be   : > { %v1172_v28 = vor.u32 %v1170_v13, %v1169_v18  ;;  %v1173_v31 = vrot.slane %v1169_v18, 4  ;;  %v1177_v34 = vrot.slane %v1175_v19, 7  ;;  %v1055_v6 = vadd.f32 %v1054_v30, %v958_v22 }
 0x1bf   : > { %v1343_v36 = vsel %vm2414_vm12, %v1189_v2, %v1544_v16  ;;  %v1197_v0 = vor.u32 %v1195_v1, %v1194_v4  ;;  %v1199_v39 = vrot.slane %v1194_v4, 4  ;;  %v1102_v43 = vmax.f32 %v1052_v48, 0.0  ;;  %v1552_v1 = vld [vmem:[%s2407_s8 + $0x2c] sm:$0x1] }
 0x1c0   : > { %1545 = vst [vmem:[%s2407_s8 + $0x18] sm:$0xf] %v1343_v36  ;;  %v1333_v44 = vsel %vm2414_vm12, %v1172_v28, %v1539_v25  ;;  %v1180_v3 = vor.u32 %v1178_v20, %v1177_v34  ;;  %v1182_v45 = vrot.slane %v1177_v34, 4  ;;  %v1103_v33 = vmax.f32 %v1055_v6, 0.0 }
 0x1c1   : > { %1540 = vst [vmem:[%s2407_s8 + $0xc] sm:$0xf] %v1333_v44  ;;  %v1198_v35 = vsel %vm2425_vm13, %v1190_v24, %v1197_v0  ;;  %v1347_v47 = vsel %vm2431_vm14, %v1199_v39, %v1547_v32  ;;  %v1586_v17 = vpack.c.bf16 %v1102_v43, %v1102_v43  ;;  %v995_v20 = vadd.f32 %v2391_v38, %v2398_v42 }
 0x1c2   : > { %1546 = vst.msk [vmem:[%s2407_s8 + $0x1c] sm:$0xf] %vm1329_vm7, %v1198_v35  ;;  %1548 = vst [vmem:[%s2407_s8 + $0x20] sm:$0x1] %v1347_v47  ;;  %v1181_v50 = vsel %vm2425_vm13, %v1173_v31, %v1180_v3  ;;  %v1340_v51 = vsel %vm2431_vm14, %v1182_v45, %v1542_v15  ;;  %v1587_v7 = vpack.c.bf16 %v1103_v33, %v1103_v33  ;;  %v1632_v11 = vpop.f32.mrb[12].mxu0  ;;  %v2454_v53 = vpop.f32.mrb[16].mxu1 }
 0x1c3   : > { %1541 = vst.msk [vmem:[%s2407_s8 + $0x10] sm:$0xf] %vm1329_vm7, %v1181_v50  ;;  %1543 = vst [vmem:[%s2407_s8 + $0x14] sm:$0x1] %v1340_v51  ;;  %v1201_v54 = vshrl.u32 %v1586_v17, 16  ;;  %v1633_v23 = vpop.f32.mrb[13].mxu0  ;;  %v987_v22 = vadd.f32 %v2387_v26, %v2398_v42  ;;  %v998_v38 = vadd.f32 %v2393_v40, %v2398_v42  ;;  %v990_v36 = vadd.f32 %v2389_v29, %v2398_v42 }
 0x1c4   : > { %v2459_v52 = vpop.f32.mrb[17].mxu1  ;;  %v1209_v58 = vshrl.u32 %v1587_v7, 16  ;;  %v1634_v5 = vadd.f32 %v1633_v23, %v1632_v11  ;;  %v1635_v55 = vpop.f32.mrb[14].mxu0  ;;  %v1204_v60 = vshll.u32 %v1586_v17, 16  ;;  %v1212_v13 = vshll.u32 %v1587_v7, 16 }
 0x1c5   : > { %v2461_v56 = vpop.f32.mrb[18].mxu1  ;;  %v1203_v57 = vrot.slane %v1201_v54, 7  ;;  %v1636_v61 = vpop.f32.mrb[15].mxu0  ;;  %v1554_v51 = vld [vmem:[%s2407_s8 + $0x30] sm:$0xf] }
 0x1c6   : > { %v2463_v21 = vpop.f32.mrb[19].mxu1  ;;  %v1211_v41 = vrot.slane %v1209_v58, 7  ;;  %v963_v37 = vadd.f32 %v1634_v5, %v2398_v42  ;;  %v1637_v49 = vadd.f32 %v1636_v61, %v1635_v55  ;;  %v1557_v61 = vld [vmem:[%s2407_s8 + $0x38] sm:$0x1] }
 0x1c7   : > { %v1206_v27 = vor.u32 %v1204_v60, %v1203_v57  ;;  %v1207_v10 = vrot.slane %v1203_v57, 4 }
 0x1c8   : > { %v1214_v8 = vor.u32 %v1212_v13, %v1211_v41  ;;  %v1216_v9 = vrot.slane %v1211_v41, 4  ;;  %v1060_v16 = vadd.f32 %v2409_v63, %v963_v37  ;;  %v966_v18 = vadd.f32 %v1637_v49, %v2398_v42 }
 0x1c9   : > { %v1350_v19 = vsel %vm2414_vm12, %v1206_v27, %v1549_v62 }
 0x1ca   : > { %1550 = vst [vmem:[%s2407_s8 + $0x24] sm:$0xf] %v1350_v19  ;;  %v1215_v2 = vsel %vm2425_vm13, %v1207_v10, %v1214_v8  ;;  %v1354_v24 = vsel %vm2431_vm14, %v1216_v9, %v1552_v1  ;;  %v1104_v25 = vmax.f32 %v1060_v16, 0.0  ;;  %v1063_v63 = vadd.f32 %v2419_v59, %v966_v18  ;;  %v1690_v4 = vpop.f32.mrb[20].mxu1  ;;  %v1574_v10 = vld [vmem:[%s2407_s8 + $0x60] sm:$0xf] }
 0x1cb   : > { %1551 = vst.msk [vmem:[%s2407_s8 + $0x28] sm:$0xf] %vm1329_vm7, %v1215_v2  ;;  %1553 = vst [vmem:[%s2407_s8 + $0x2c] sm:$0x1] %v1354_v24  ;;  %v1092_v48 = vadd.f32 %v1690_v4, %v995_v20  ;;  %v1083_v30 = vpop.f32.mrb[21].mxu1 }
 0x1cc   : > { %v1588_v26 = vpack.c.bf16 %v1104_v25, %v1104_v25  ;;  %v1105_v28 = vmax.f32 %v1063_v63, 0.0  ;;  %v1084_v31 = vadd.f32 %v1083_v30, %v987_v22  ;;  %v1691_v32 = vpop.f32.mrb[22].mxu1  ;;  %v1569_v9 = vld [vmem:[%s2407_s8 + $0x54] sm:$0xf]  ;;  %v1577_v25 = vld [vmem:[%s2407_s8 + $0x68] sm:$0x1] }
 0x1cd   : > { %v1112_v34 = vmax.f32 %v1092_v48, 0.0  ;;  %v1095_v6 = vadd.f32 %v1691_v32, %v998_v38  ;;  %v1086_v59 = vpop.f32.mrb[23].mxu1 }
 0x1ce   : > { %v1218_v0 = vshrl.u32 %v1588_v26, 16  ;;  %v1589_v39 = vpack.c.bf16 %v1105_v28, %v1105_v28  ;;  %v1110_v15 = vmax.f32 %v1084_v31, 0.0  ;;  %v1638_v43 = vpop.f32.mrb[16].mxu0  ;;  %v1087_v45 = vadd.f32 %v1086_v59, %v990_v36  ;;  %v1572_v36 = vld [vmem:[%s2407_s8 + $0x5c] sm:$0x1] }
 0x1cf   : > { %v1596_v44 = vpack.c.bf16 %v1112_v34, %v1112_v34  ;;  %v1113_v3 = vmax.f32 %v1095_v6, 0.0  ;;  %v1639_v33 = vpop.f32.mrb[17].mxu0  ;;  %v1221_v35 = vshll.u32 %v1588_v26, 16 }
 0x1d0   : > { %v1220_v40 = vrot.slane %v1218_v0, 7  ;;  %v1226_v47 = vshrl.u32 %v1589_v39, 16  ;;  %v1594_v17 = vpack.c.bf16 %v1110_v15, %v1110_v15  ;;  %v1641_v50 = vpop.f32.mrb[18].mxu0  ;;  %v1229_v7 = vshll.u32 %v1589_v39, 16 }
 0x1d1   : > { %v1286_v11 = vshrl.u32 %v1596_v44, 16  ;;  %v1597_v29 = vpack.c.bf16 %v1113_v3, %v1113_v3  ;;  %v1111_v54 = vmax.f32 %v1087_v45, 0.0  ;;  %v1642_v23 = vpop.f32.mrb[19].mxu0  ;;  %v1289_v55 = vshll.u32 %v1596_v44, 16 }
 0x1d2   : > { %v1223_v58 = vor.u32 %v1221_v35, %v1220_v40  ;;  %v1228_v5 = vrot.slane %v1226_v47, 7  ;;  %v1269_v57 = vshrl.u32 %v1594_v17, 16  ;;  %v1224_v60 = vrot.slane %v1220_v40, 4 }
 0x1d3   : > { %v1288_v62 = vrot.slane %v1286_v11, 7  ;;  %v1272_v41 = vshll.u32 %v1594_v17, 16  ;;  %v1294_v13 = vshrl.u32 %v1597_v29, 16  ;;  %v1297_v18 = vshll.u32 %v1597_v29, 16 }
 0x1d4   : > { %v1357_v37 = vsel %vm2414_vm12, %v1223_v58, %v1554_v51  ;;  %v1231_v49 = vor.u32 %v1229_v7, %v1228_v5  ;;  %v1233_v27 = vrot.slane %v1228_v5, 4  ;;  %v1271_v1 = vrot.slane %v1269_v57, 7 }
 0x1d5   : > { %1555 = vst [vmem:[%s2407_s8 + $0x30] sm:$0xf] %v1357_v37  ;;  %v1291_v8 = vor.u32 %v1289_v55, %v1288_v62  ;;  %v1296_v16 = vrot.slane %v1294_v13, 7  ;;  %v1595_v19 = vpack.c.bf16 %v1111_v54, %v1111_v54  ;;  %v1292_v2 = vrot.slane %v1288_v62, 4  ;;  %v1559_v13 = vld [vmem:[%s2407_s8 + $0x3c] sm:$0xf] }
 0x1d6   : > { %v1232_v20 = vsel %vm2425_vm13, %v1224_v60, %v1231_v49  ;;  %v1361_v22 = vsel %vm2431_vm14, %v1233_v27, %v1557_v61  ;;  %v1274_v24 = vor.u32 %v1272_v41, %v1271_v1  ;;  %v1640_v26 = vadd.f32 %v1639_v33, %v1638_v43  ;;  %v1562_v37 = vld [vmem:[%s2407_s8 + $0x44] sm:$0x1] }
 0x1d7   : > { %1556 = vst.msk [vmem:[%s2407_s8 + $0x34] sm:$0xf] %vm1329_vm7, %v1232_v20  ;;  %1558 = vst [vmem:[%s2407_s8 + $0x38] sm:$0x1] %v1361_v22  ;;  %v1385_v63 = vsel %vm2414_vm12, %v1291_v8, %v1574_v10  ;;  %v1299_v4 = vor.u32 %v1297_v18, %v1296_v16  ;;  %v1301_v48 = vrot.slane %v1296_v16, 4  ;;  %v1277_v30 = vshrl.u32 %v1595_v19, 16 }
 0x1d8   : > { %1575 = vst [vmem:[%s2407_s8 + $0x60] sm:$0xf] %v1385_v63  ;;  %v1378_v38 = vsel %vm2414_vm12, %v1274_v24, %v1569_v9  ;;  %v1643_v28 = vadd.f32 %v1642_v23, %v1641_v50  ;;  %v1280_v6 = vshll.u32 %v1595_v19, 16  ;;  %v971_v59 = vadd.f32 %v1640_v26, %v2398_v42 }
 0x1d9   : > { %1570 = vst [vmem:[%s2407_s8 + $0x54] sm:$0xf] %v1378_v38  ;;  %v1300_v31 = vsel %vm2425_vm13, %v1292_v2, %v1299_v4  ;;  %v1389_v32 = vsel %vm2431_vm14, %v1301_v48, %v1577_v25  ;;  %v1279_v34 = vrot.slane %v1277_v30, 7  ;;  %v1275_v15 = vrot.slane %v1271_v1, 4  ;;  %v1564_v2 = vld [vmem:[%s2407_s8 + $0x48] sm:$0xf] }
 0x1da   : > { %1576 = vst.msk [vmem:[%s2407_s8 + $0x64] sm:$0xf] %vm1329_vm7, %v1300_v31  ;;  %1578 = vst [vmem:[%s2407_s8 + $0x68] sm:$0x1] %v1389_v32  ;;  %v974_v0 = vadd.f32 %v1643_v28, %v2398_v42  ;;  %v1644_v39 = vpop.f32.mrb[20].mxu0  ;;  %v1068_v45 = vadd.f32 %v2459_v52, %v971_v59 }
 0x1db   : > { %v1282_v43 = vor.u32 %v1280_v6, %v1279_v34  ;;  %v1284_v44 = vrot.slane %v1279_v34, 4  ;;  %v1645_v3 = vpop.f32.mrb[21].mxu0  ;;  %v1567_v4 = vld [vmem:[%s2407_s8 + $0x50] sm:$0x1] }
 0x1dc   : > { %v1071_v33 = vadd.f32 %v2463_v21, %v974_v0  ;;  %v1646_v40 = vadd.f32 %v1645_v3, %v1644_v39  ;;  %v1647_v35 = vpop.f32.mrb[22].mxu0  ;;  %v1106_v51 = vmax.f32 %v1068_v45, 0.0 }
 0x1dd   : > { %v1283_v47 = vsel %vm2425_vm13, %v1275_v15, %v1282_v43  ;;  %v1382_v17 = vsel %vm2431_vm14, %v1284_v44, %v1572_v36  ;;  %v1648_v50 = vpop.f32.mrb[23].mxu0 }
 0x1de   : > { %1571 = vst.msk [vmem:[%s2407_s8 + $0x58] sm:$0xf] %vm1329_vm7, %v1283_v47  ;;  %1573 = vst [vmem:[%s2407_s8 + $0x5c] sm:$0x1] %v1382_v17  ;;  %v1107_v7 = vmax.f32 %v1071_v33, 0.0  ;;  %v979_v52 = vadd.f32 %v1646_v40, %v2398_v42  ;;  %v1649_v11 = vadd.f32 %v1648_v50, %v1647_v35  ;;  %v1590_v21 = vpack.c.bf16 %v1106_v51, %v1106_v51 }
 0x1e0   : > { %v1591_v29 = vpack.c.bf16 %v1107_v7, %v1107_v7  ;;  %v1076_v54 = vadd.f32 %v2454_v53, %v979_v52  ;;  %v982_v23 = vadd.f32 %v1649_v11, %v2398_v42  ;;  %v1235_v58 = vshrl.u32 %v1590_v21, 16 }
 0x1e1   : > { %v1238_v61 = vshll.u32 %v1590_v21, 16 }
 0x1e2   : > { %v1243_v5 = vshrl.u32 %v1591_v29, 16  ;;  %v1108_v55 = vmax.f32 %v1076_v54, 0.0  ;;  %v1079_v57 = vadd.f32 %v2461_v56, %v982_v23  ;;  %v1237_v60 = vrot.slane %v1235_v58, 7 }
 0x1e3   : > { %v1246_v41 = vshll.u32 %v1591_v29, 16 }
 0x1e4   : > { %v1245_v62 = vrot.slane %v1243_v5, 7  ;;  %v1592_v49 = vpack.c.bf16 %v1108_v55, %v1108_v55  ;;  %v1109_v27 = vmax.f32 %v1079_v57, 0.0  ;;  %v1240_v53 = vor.u32 %v1238_v61, %v1237_v60 }
 0x1e5   : > { %v1241_v10 = vrot.slane %v1237_v60, 4 }
 0x1e6   : > { %v1248_v42 = vor.u32 %v1246_v41, %v1245_v62  ;;  %v1250_v1 = vrot.slane %v1245_v62, 4  ;;  %v1252_v8 = vshrl.u32 %v1592_v49, 16  ;;  %v1593_v9 = vpack.c.bf16 %v1109_v27, %v1109_v27 }
 0x1e7   : > { %v1364_v56 = vsel %vm2414_vm12, %v1240_v53, %v1559_v13  ;;  %v1255_v20 = vshll.u32 %v1592_v49, 16 }
 0x1e8   : > { %v1249_v16 = vsel %vm2425_vm13, %v1241_v10, %v1248_v42  ;;  %v1368_v18 = vsel %vm2431_vm14, %v1250_v1, %v1562_v37  ;;  %1560 = vst [vmem:[%s2407_s8 + $0x3c] sm:$0xf] %v1364_v56  ;;  %v1254_v19 = vrot.slane %v1252_v8, 7  ;;  %v1260_v22 = vshrl.u32 %v1593_v9, 16 }
 0x1e9   : > { %1561 = vst.msk [vmem:[%s2407_s8 + $0x40] sm:$0xf] %vm1329_vm7, %v1249_v16  ;;  %1563 = vst [vmem:[%s2407_s8 + $0x44] sm:$0x1] %v1368_v18  ;;  %v1263_v63 = vshll.u32 %v1593_v9, 16 }
 0x1ea   : > { %v1257_v24 = vor.u32 %v1255_v20, %v1254_v19  ;;  %v1262_v25 = vrot.slane %v1260_v22, 7  ;;  %v1258_v48 = vrot.slane %v1254_v19, 4 }
 0x1ec   : > { %v1371_v30 = vsel %vm2414_vm12, %v1257_v24, %v1564_v2  ;;  %v1265_v38 = vor.u32 %v1263_v63, %v1262_v25  ;;  %v1267_v26 = vrot.slane %v1262_v25, 4 }
 0x1ed   : > { %1565 = vst [vmem:[%s2407_s8 + $0x48] sm:$0xf] %v1371_v30 }
 0x1ee   : > { %v1266_v28 = vsel %vm2425_vm13, %v1258_v48, %v1265_v38  ;;  %v1375_v31 = vsel %vm2431_vm14, %v1267_v26, %v1567_v4 }
 0x1ef   : > { %1566 = vst.msk [vmem:[%s2407_s8 + $0x4c] sm:$0xf] %vm1329_vm7, %v1266_v28  ;;  %1568 = vst [vmem:[%s2407_s8 + $0x50] sm:$0x1] %v1375_v31 }
 0x1f0 PF: > { %s13_s16 = sadd.s32 1, %s1829_s16   ;;  %s2582_s12 = smov %s1821_s14 }
 0x1f1   : > { %p10_p7 = scmp.ge.s32.totalorder %s13_s16, 6   ;;  %s2583_s13 = smov %s1825_s15 }
 0x1f2   : > { %s2584_s14 = smov %s2587_s17  ;;  %s2585_s15 = smov %s2591_s18 }
 0x1f3   :  { %12 = sbr.rel (!%p10_p7) target bundleno = 3 (0x3), region = 68 }

</bundles_post_ra>
